<compile_context>
chip_gen: v7x
topology: tpu7x:2x2x1
jax: 0.10.0
libtpu: 0.0.40
codegen_flags: <defaults>
</compile_context>

<pallas_src>
import jax
import jax.numpy as jnp
from jax.experimental import pallas as pl
from jax.experimental.pallas import tpu as pltpu

BN_EPS = 1e-5


def _nonlocal_kernel(x_ref, mp_ref,
                     wth_ref, bth_ref,
                     wpg_ref,
                     wo_ref, bo_ref,
                     out_ref,
                     phi_scr, g_scr):
    di = phi_scr.shape[-1]

    # Fused phi|g projection of the pooled features, computed once per batch element
    # (n == 0); the bf16 scratches persist across the n (query-tile) grid axis.
    @pl.when(pl.program_id(1) == 0)
    def _():
        pg = jnp.dot(mp_ref[...], wpg_ref[...],
                     preferred_element_type=jnp.float32)          # (M, 2*di) f32 acc
        phi_scr[...] = pg[:, :di].astype(jnp.bfloat16)
        g_scr[...] = pg[:, di:].astype(jnp.bfloat16)

    x = x_ref[...]                                                # (TN, C_in) f32, residual
    # scale (dim_inner ** -0.5) is pre-folded into w_theta / b_theta
    theta = jnp.dot(x.astype(jnp.bfloat16), wth_ref[...],
                    preferred_element_type=jnp.float32) + bth_ref[...]   # (TN, di) f32

    # (TN, di) x (M, di) contracting last dims -> (TN, M); no explicit phi transpose.
    s = jax.lax.dot_general(theta.astype(jnp.bfloat16), phi_scr[...],
                            (((1,), (1,)), ((), ())),
                            preferred_element_type=jnp.float32)

    # softmax over M (kept in f32)
    s_max = jnp.max(s, axis=-1, keepdims=True)
    e = jnp.exp(s - s_max)
    denom = jnp.sum(e, axis=-1, keepdims=True)
    p = e * pl.reciprocal(denom, approx=True)                     # EUP reciprocal, one per row

    # aggregate values: (TN, M) x (M, di) -> (TN, di)
    t = jnp.dot(p.astype(jnp.bfloat16), g_scr[...],
                preferred_element_type=jnp.float32)

    # output projection with eval-mode BatchNorm and b_g pre-folded, then residual add.
    y = jnp.dot(t.astype(jnp.bfloat16), wo_ref[...],
                preferred_element_type=jnp.float32) + bo_ref[...]
    out_ref[...] = y + x


def _pick_tile(n, target):
    """Largest multiple of 8 that divides n and is <= target; fallback to full n."""
    target = min(target, n)
    for cand in range(target, 0, -1):
        if n % cand == 0 and (cand % 8 == 0 or cand == n):
            return cand
    return n


def nonlocal_block_pallas(x, params, *, tn_target=512):
    """x: (B, C_in, T, H, W) float32 (PyTorch NCDHW convention)."""
    B, C_in, T, H, W = x.shape
    dim_inner = params["w_theta"].shape[1]
    dim_out = params["w_out"].shape[1]
    assert dim_out == C_in, "residual add requires dim_out == dim_in (as in the PyTorch block)"
    assert H % 2 == 0 and W % 2 == 0, "1x2x2 maxpool glue requires even H and W"

    N = T * H * W
    M = T * (H // 2) * (W // 2)
    TN = _pick_tile(N, tn_target)
    n_tiles = N // TN

    # ---- constant folding outside the hot path ----
    scale = float(dim_inner) ** (-0.5)
    w_theta = (params["w_theta"] * scale).astype(jnp.bfloat16)     # (C_in, di) bf16
    b_theta = params["b_theta"] * scale                            # (1, di)    f32

    # fused phi|g weight; b_phi dropped (softmax shift-invariance), b_g folded below.
    w_pg = jnp.concatenate([params["w_phi"], params["w_g"]],
                           axis=1).astype(jnp.bfloat16)            # (C_in, 2*di) bf16

    inv_std = jax.lax.rsqrt(params["bn_var"] + BN_EPS)             # (1, C_out)
    bn_scale = params["bn_gamma"] * inv_std                        # (1, C_out)
    w_out = (params["w_out"] * bn_scale).astype(jnp.bfloat16)      # (di, C_out) bf16
    # softmax rows sum to 1  =>  p @ (mp@w_g + b_g) = p @ (mp@w_g) + b_g; fold b_g @ w_out.
    b_out_conv = params["b_out"] + params["b_g"] @ params["w_out"]  # (1, C_out)
    b_out = (b_out_conv - params["bn_mean"]) * bn_scale + params["bn_beta"]

    # ---- plain-JAX glue: 1x2x2 maxpool + NCDHW -> channels-last flat ----
    mp = jnp.max(x.reshape(B, C_in, T, H // 2, 2, W // 2, 2), axis=(4, 6))
    x_flat = jnp.transpose(x.reshape(B, C_in, N), (0, 2, 1))       # (B, N, C_in) f32
    mp_flat = jnp.transpose(mp.reshape(B, C_in, M),
                            (0, 2, 1)).astype(jnp.bfloat16)        # (B, M, C_in) bf16

    # Weight/bias blocks have a constant index_map; Pallas does not re-DMA them per step.
    wspec = lambda shp: pl.BlockSpec(shp, lambda b, n: (0, 0))

    out_flat = pl.pallas_call(
        _nonlocal_kernel,
        out_shape=jax.ShapeDtypeStruct((B, N, dim_out), jnp.float32),
        grid_spec=pltpu.PrefetchScalarGridSpec(
            num_scalar_prefetch=0,
            grid=(B, n_tiles),
            in_specs=[
                # x tile (also the residual); kernel sees (TN, C_in)
                pl.BlockSpec((pl.Squeezed(), TN, C_in), lambda b, n: (b, n, 0)),
                # pooled feats, resident over n; kernel sees (M, C_in)
                pl.BlockSpec((pl.Squeezed(), M, C_in), lambda b, n: (b, 0, 0)),
                wspec((C_in, dim_inner)), wspec((1, dim_inner)),       # theta W (bf16), b
                wspec((C_in, 2 * dim_inner)),                          # fused phi|g W (bf16)
                wspec((dim_inner, dim_out)), wspec((1, dim_out)),      # out W (bf16, BN fold), b
            ],
            out_specs=pl.BlockSpec((pl.Squeezed(), TN, dim_out), lambda b, n: (b, n, 0)),
            scratch_shapes=[
                pltpu.VMEM((M, dim_inner), jnp.bfloat16),   # phi projection (persists over n)
                pltpu.VMEM((M, dim_inner), jnp.bfloat16),   # g   projection (persists over n)
            ],
        ),
        compiler_params=pltpu.CompilerParams(
            # n must stay "arbitrary": the phi/g scratch is carried across it.
            dimension_semantics=("parallel", "arbitrary"),
            vmem_limit_bytes=48 * 1024 * 1024,
        ),
    )(
        x_flat, mp_flat,
        w_theta, b_theta,
        w_pg,
        w_out, b_out,
    )

    # back to NCDHW
    return jnp.transpose(out_flat, (0, 2, 1)).reshape(B, dim_out, T, H, W)


def init_params(key, dim_in, dim_out, dim_inner):
    """Deterministic parameter init (PyTorch-conv-style uniform bounds).
    Conv weights are stored transposed, (C_in, C_out), so the kernel can do x @ W."""
    ks = jax.random.split(key, 8)

    def conv_init(kw, kb, cin, cout):
        bound = 1.0 / jnp.sqrt(cin)
        w = jax.random.uniform(kw, (cin, cout), jnp.float32, -bound, bound)
        b = jax.random.uniform(kb, (1, cout), jnp.float32, -bound, bound)
        return w, b

    w_theta, b_theta = conv_init(ks[0], ks[1], dim_in, dim_inner)
    w_phi, b_phi = conv_init(ks[2], ks[3], dim_in, dim_inner)
    w_g, b_g = conv_init(ks[4], ks[5], dim_in, dim_inner)
    w_out, b_out = conv_init(ks[6], ks[7], dim_inner, dim_out)

    # TODO(synk): PyTorch training-mode BatchNorm (batch statistics + running-stat
    # updates) is not reproduced; eval-mode semantics with running stats are used.
    return dict(
        w_theta=w_theta, b_theta=b_theta,
        w_phi=w_phi, b_phi=b_phi,
        w_g=w_g, b_g=b_g,
        w_out=w_out, b_out=b_out,
        bn_gamma=jnp.ones((1, dim_out), jnp.float32),
        bn_beta=jnp.zeros((1, dim_out), jnp.float32),
        bn_mean=jnp.zeros((1, dim_out), jnp.float32),
        bn_var=jnp.ones((1, dim_out), jnp.float32),
    )


def nonlocal_block_ref(x, params):
    """Pure-JAX f32 reference mirroring the PyTorch forward (eval-mode BN)."""
    B, C_in, T, H, W = x.shape
    dim_inner = params["w_theta"].shape[1]

    mp = jnp.max(x.reshape(B, C_in, T, H // 2, 2, W // 2, 2), axis=(4, 6))

    def conv1(inp, w, b):  # (B,C,T,h,w) -> (B,Cout,T,h,w)
        Bq, Cq, Tq, Hq, Wq = inp.shape
        flat = inp.reshape(Bq, Cq, -1)
        y = jnp.einsum("bcs,co->bos", flat, w) + b.reshape(1, -1, 1)
        return y.reshape(Bq, w.shape[1], Tq, Hq, Wq)

    theta = conv1(x, params["w_theta"], params["b_theta"])
    phi = conv1(mp, params["w_phi"], params["b_phi"])
    g = conv1(mp, params["w_g"], params["b_g"])

    theta5d = theta.shape
    theta_f = theta.reshape(B, dim_inner, -1)
    phi_f = phi.reshape(B, dim_inner, -1)
    g_f = g.reshape(B, dim_inner, -1)

    tp = jnp.einsum("bcn,bcm->bnm", theta_f, phi_f) * (dim_inner ** -0.5)
    p = jax.nn.softmax(tp, axis=-1)
    t = jnp.einsum("bcm,bnm->bcn", g_f, p).reshape(theta5d)

    out = conv1(t, params["w_out"], params["b_out"])
    inv_std = jax.lax.rsqrt(params["bn_var"].reshape(1, -1, 1, 1, 1) + BN_EPS)
    out = (out - params["bn_mean"].reshape(1, -1, 1, 1, 1)) * inv_std \
        * params["bn_gamma"].reshape(1, -1, 1, 1, 1) + params["bn_beta"].reshape(1, -1, 1, 1, 1)
    return out + x


if __name__ == "__main__":
    key = jax.random.PRNGKey(0)
    kx, kp = jax.random.split(key)

    # Small but 128-lane-aligned config: N = 512 (one query tile), M = 128.
    B, C, T, H, W = 2, 128, 2, 16, 16
    dim_in, dim_out, dim_inner = C, C, 64

    x = jax.random.normal(kx, (B, C, T, H, W), jnp.float32)
    params = init_params(kp, dim_in, dim_out, dim_inner)

    fwd = jax.jit(nonlocal_block_pallas)
    out = jax.block_until_ready(fwd(x, params))

    ref = nonlocal_block_ref(x, params)
    assert out.shape == ref.shape
    max_diff = jnp.max(jnp.abs(out - ref))
    # bf16 MXU operands (f32 accumulation) vs the f32 reference -> loosened tolerance.
    assert jnp.allclose(out, ref, rtol=3e-2, atol=3e-2), f"max abs diff {max_diff}"

    print("KERNEL_OK")
</pallas_src>

<mosaic_0001>
module attributes {stable_mosaic.version = 11 : i64} {
  func.func @_nonlocal_kernel(%arg0: i32, %arg1: i32, %arg2: memref<1x512x128xf32, #tpu.memory_space<vmem>>, %arg3: memref<1x128x128xbf16, #tpu.memory_space<vmem>>, %arg4: memref<128x64xbf16, #tpu.memory_space<vmem>>, %arg5: memref<1x64xf32, #tpu.memory_space<vmem>>, %arg6: memref<128x128xbf16, #tpu.memory_space<vmem>>, %arg7: memref<64x128xbf16, #tpu.memory_space<vmem>>, %arg8: memref<1x128xf32, #tpu.memory_space<vmem>>, %arg9: memref<1x512x128xf32, #tpu.memory_space<vmem>>, %arg10: memref<128x64xbf16, #tpu.memory_space<vmem>>, %arg11: memref<128x64xbf16, #tpu.memory_space<vmem>>) attributes {dimension_semantics = [#tpu.dimension_semantics<parallel>, #tpu.dimension_semantics<arbitrary>], iteration_bounds = array<i64: 2, 1>, scalar_prefetch = 0 : i64, scratch_operands = 2 : i64, tpu.core_type = #tpu.core_type<tc>, window_params = [{transform_indices = @transform_0, window_bounds = array<i64: 1, 512, 128>}, {transform_indices = @transform_1, window_bounds = array<i64: 1, 128, 128>}, {pipeline_mode = #tpu.pipeline_mode<synchronous>, transform_indices = @transform_2, window_bounds = array<i64: 128, 64>}, {pipeline_mode = #tpu.pipeline_mode<synchronous>, transform_indices = @transform_3, window_bounds = array<i64: 1, 64>}, {pipeline_mode = #tpu.pipeline_mode<synchronous>, transform_indices = @transform_4, window_bounds = array<i64: 128, 128>}, {pipeline_mode = #tpu.pipeline_mode<synchronous>, transform_indices = @transform_5, window_bounds = array<i64: 64, 128>}, {pipeline_mode = #tpu.pipeline_mode<synchronous>, transform_indices = @transform_6, window_bounds = array<i64: 1, 128>}, {transform_indices = @transform_7, window_bounds = array<i64: 1, 512, 128>}]} {
    %c0_i32 = arith.constant 0 : i32
    %0 = arith.cmpi eq, %arg1, %c0_i32 : i32
    %1 = arith.extui %0 : i1 to i32
    %c0_i32_0 = arith.constant 0 : i32
    %2 = arith.cmpi ne, %1, %c0_i32_0 : i32
    scf.if %2 {
      %c0_23 = arith.constant 0 : index
      %c0_24 = arith.constant 0 : index
      %c0_25 = arith.constant 0 : index
      %37 = vector.load %arg3[%c0_23, %c0_24, %c0_25] : memref<1x128x128xbf16, #tpu.memory_space<vmem>>, vector<1x128x128xbf16>
      %38 = vector.shape_cast %37 : vector<1x128x128xbf16> to vector<128x128xbf16>
      %c0_26 = arith.constant 0 : index
      %c0_27 = arith.constant 0 : index
      %39 = vector.load %arg6[%c0_26, %c0_27] : memref<128x128xbf16, #tpu.memory_space<vmem>>, vector<128x128xbf16>
      %cst_28 = arith.constant dense<0.000000e+00> : vector<128x128xf32>
      %40 = tpu.matmul %38, %39, %cst_28 {dimension_numbers = #tpu.dot_dimension_numbers<[1], [0], [0], [1], [0, 0, 1, 1], [], []>} : vector<128x128xbf16>, vector<128x128xbf16>, vector<128x128xf32> -> vector<128x128xf32>
      %41 = vector.extract_strided_slice %40 {offsets = [0, 0], sizes = [128, 64], strides = [1, 1]} : vector<128x128xf32> to vector<128x64xf32>
      %42 = arith.truncf %41 : vector<128x64xf32> to vector<128x64xbf16>
      %c0_29 = arith.constant 0 : index
      %c0_30 = arith.constant 0 : index
      %43 = vector.load %arg10[%c0_29, %c0_30] : memref<128x64xbf16, #tpu.memory_space<vmem>>, vector<128x64xbf16>
      tpu.vector_store %arg10[%c0_29, %c0_30], %42 {strides = array<i32>} : memref<128x64xbf16, #tpu.memory_space<vmem>>, vector<128x64xbf16>,
      %44 = vector.extract_strided_slice %40 {offsets = [0, 64], sizes = [128, 64], strides = [1, 1]} : vector<128x128xf32> to vector<128x64xf32>
      %45 = arith.truncf %44 : vector<128x64xf32> to vector<128x64xbf16>
      %c0_31 = arith.constant 0 : index
      %c0_32 = arith.constant 0 : index
      %46 = vector.load %arg11[%c0_31, %c0_32] : memref<128x64xbf16, #tpu.memory_space<vmem>>, vector<128x64xbf16>
      tpu.vector_store %arg11[%c0_31, %c0_32], %45 {strides = array<i32>} : memref<128x64xbf16, #tpu.memory_space<vmem>>, vector<128x64xbf16>,
    } else {
    }
    %c0 = arith.constant 0 : index
    %c0_1 = arith.constant 0 : index
    %c0_2 = arith.constant 0 : index
    %3 = vector.load %arg2[%c0, %c0_1, %c0_2] : memref<1x512x128xf32, #tpu.memory_space<vmem>>, vector<1x512x128xf32>
    %4 = vector.shape_cast %3 : vector<1x512x128xf32> to vector<512x128xf32>
    %5 = arith.truncf %4 : vector<512x128xf32> to vector<512x128xbf16>
    %c0_3 = arith.constant 0 : index
    %c0_4 = arith.constant 0 : index
    %6 = vector.load %arg4[%c0_3, %c0_4] : memref<128x64xbf16, #tpu.memory_space<vmem>>, vector<128x64xbf16>
    %cst = arith.constant dense<0.000000e+00> : vector<512x64xf32>
    %7 = tpu.matmul %5, %6, %cst {dimension_numbers = #tpu.dot_dimension_numbers<[1], [0], [0], [1], [0, 0, 1, 1], [], []>} : vector<512x128xbf16>, vector<128x64xbf16>, vector<512x64xf32> -> vector<512x64xf32>
    %c0_5 = arith.constant 0 : index
    %c0_6 = arith.constant 0 : index
    %8 = vector.load %arg5[%c0_5, %c0_6] : memref<1x64xf32, #tpu.memory_space<vmem>>, vector<1x64xf32>
    %9 = vector.broadcast %8 : vector<1x64xf32> to vector<512x64xf32>
    %10 = arith.addf %7, %9 : vector<512x64xf32>
    %11 = arith.truncf %10 : vector<512x64xf32> to vector<512x64xbf16>
    %c0_7 = arith.constant 0 : index
    %c0_8 = arith.constant 0 : index
    %12 = vector.load %arg10[%c0_7, %c0_8] : memref<128x64xbf16, #tpu.memory_space<vmem>>, vector<128x64xbf16>
    %cst_9 = arith.constant dense<0.000000e+00> : vector<512x128xf32>
    %13 = tpu.matmul %11, %12, %cst_9 {dimension_numbers = #tpu.dot_dimension_numbers<[1], [1], [0], [0], [0, 0, 1, 0], [], []>} : vector<512x64xbf16>, vector<128x64xbf16>, vector<512x128xf32> -> vector<512x128xf32>
    %cst_10 = arith.constant dense<0xFF800000> : vector<512xf32>
    %14 = vector.multi_reduction <maximumf>, %13, %cst_10 [1] : vector<512x128xf32> to vector<512xf32>
    %15 = vector.shape_cast %14 : vector<512xf32> to vector<512x1xf32>
    %16 = vector.broadcast %15 : vector<512x1xf32> to vector<512x128xf32>
    %17 = arith.subf %13, %16 : vector<512x128xf32>
    %18 = math.exp %17 : vector<512x128xf32>
    %cst_11 = arith.constant dense<0.000000e+00> : vector<512xf32>
    %19 = vector.multi_reduction <add>, %18, %cst_11 [1] : vector<512x128xf32> to vector<512xf32>
    %20 = vector.shape_cast %19 : vector<512xf32> to vector<512x1xf32>
    %21 = tpu.reciprocal %20 {approx = true} : vector<512x1xf32> -> vector<512x1xf32>
    %22 = vector.broadcast %21 : vector<512x1xf32> to vector<512x128xf32>
    %23 = arith.mulf %18, %22 : vector<512x128xf32>
    %24 = arith.truncf %23 : vector<512x128xf32> to vector<512x128xbf16>
    %c0_12 = arith.constant 0 : index
    %c0_13 = arith.constant 0 : index
    %25 = vector.load %arg11[%c0_12, %c0_13] : memref<128x64xbf16, #tpu.memory_space<vmem>>, vector<128x64xbf16>
    %cst_14 = arith.constant dense<0.000000e+00> : vector<512x64xf32>
    %26 = tpu.matmul %24, %25, %cst_14 {dimension_numbers = #tpu.dot_dimension_numbers<[1], [0], [0], [1], [0, 0, 1, 1], [], []>} : vector<512x128xbf16>, vector<128x64xbf16>, vector<512x64xf32> -> vector<512x64xf32>
    %27 = arith.truncf %26 : vector<512x64xf32> to vector<512x64xbf16>
    %c0_15 = arith.constant 0 : index
    %c0_16 = arith.constant 0 : index
    %28 = vector.load %arg7[%c0_15, %c0_16] : memref<64x128xbf16, #tpu.memory_space<vmem>>, vector<64x128xbf16>
    %cst_17 = arith.constant dense<0.000000e+00> : vector<512x128xf32>
    %29 = tpu.matmul %27, %28, %cst_17 {dimension_numbers = #tpu.dot_dimension_numbers<[1], [0], [0], [1], [0, 0, 1, 1], [], []>} : vector<512x64xbf16>, vector<64x128xbf16>, vector<512x128xf32> -> vector<512x128xf32>
    %c0_18 = arith.constant 0 : index
    %c0_19 = arith.constant 0 : index
    %30 = vector.load %arg8[%c0_18, %c0_19] : memref<1x128xf32, #tpu.memory_space<vmem>>, vector<1x128xf32>
    %31 = vector.broadcast %30 : vector<1x128xf32> to vector<512x128xf32>
    %32 = arith.addf %29, %31 : vector<512x128xf32>
    %33 = arith.addf %32, %4 : vector<512x128xf32>
    %c0_20 = arith.constant 0 : index
    %c0_21 = arith.constant 0 : index
    %c0_22 = arith.constant 0 : index
    %34 = vector.load %arg9[%c0_20, %c0_21, %c0_22] : memref<1x512x128xf32, #tpu.memory_space<vmem>>, vector<1x512x128xf32>
    %35 = vector.shape_cast %34 : vector<1x512x128xf32> to vector<512x128xf32>
    %36 = vector.shape_cast %33 : vector<512x128xf32> to vector<1x512x128xf32>
    tpu.vector_store %arg9[%c0_20, %c0_21, %c0_22], %36 {strides = array<i32>} : memref<1x512x128xf32, #tpu.memory_space<vmem>>, vector<1x512x128xf32>,
    return
  }
  func.func @transform_0(%arg0: i32, %arg1: i32) -> (i32, i32, i32) {
    %c0_i32 = arith.constant 0 : i32
    %c0_i32_0 = arith.constant 0 : i32
    return %arg0, %arg1, %c0_i32 : i32, i32, i32
  }
  func.func @transform_1(%arg0: i32, %arg1: i32) -> (i32, i32, i32) {
    %c0_i32 = arith.constant 0 : i32
    %c0_i32_0 = arith.constant 0 : i32
    %c0_i32_1 = arith.constant 0 : i32
    return %arg0, %c0_i32, %c0_i32_0 : i32, i32, i32
  }
  func.func @transform_2(%arg0: i32, %arg1: i32) -> (i32, i32) {
    %c0_i32 = arith.constant 0 : i32
    %c0_i32_0 = arith.constant 0 : i32
    %c0_i32_1 = arith.constant 0 : i32
    return %c0_i32, %c0_i32_0 : i32, i32
  }
  func.func @transform_3(%arg0: i32, %arg1: i32) -> (i32, i32) {
    %c0_i32 = arith.constant 0 : i32
    %c0_i32_0 = arith.constant 0 : i32
    %c0_i32_1 = arith.constant 0 : i32
    return %c0_i32, %c0_i32_0 : i32, i32
  }
  func.func @transform_4(%arg0: i32, %arg1: i32) -> (i32, i32) {
    %c0_i32 = arith.constant 0 : i32
    %c0_i32_0 = arith.constant 0 : i32
    %c0_i32_1 = arith.constant 0 : i32
    return %c0_i32, %c0_i32_0 : i32, i32
  }
  func.func @transform_5(%arg0: i32, %arg1: i32) -> (i32, i32) {
    %c0_i32 = arith.constant 0 : i32
    %c0_i32_0 = arith.constant 0 : i32
    %c0_i32_1 = arith.constant 0 : i32
    return %c0_i32, %c0_i32_0 : i32, i32
  }
  func.func @transform_6(%arg0: i32, %arg1: i32) -> (i32, i32) {
    %c0_i32 = arith.constant 0 : i32
    %c0_i32_0 = arith.constant 0 : i32
    %c0_i32_1 = arith.constant 0 : i32
    return %c0_i32, %c0_i32_0 : i32, i32
  }
  func.func @transform_7(%arg0: i32, %arg1: i32) -> (i32, i32, i32) {
    %c0_i32 = arith.constant 0 : i32
    %c0_i32_0 = arith.constant 0 : i32
    return %arg0, %arg1, %c0_i32 : i32, i32, i32
  }
}

</mosaic_0001>

<bundles_post_ra>
// kernel: nonlocal_block_pallas.1
= control target key start
LH: loop header
LB: loop body
LE: loop exit
PB: predicated region body
PF: predicated region fallthrough
CT: control target
= control target key end

     0   :  { %12 = vsyncpa [#allocation5], 0  ;;  %s5644_s0 = inlined_call_operand.vmem [shape: f32[2,512,128], index: 0, kind: input, shape index: {}]   ;;  %s5645_s1 = inlined_call_operand.vmem [shape: bf16[2,128,128], index: 1, kind: input, shape index: {}]   ;;  %s5646_s2 = inlined_call_operand.vmem [shape: bf16[128,64], index: 2, kind: input, shape index: {}]   ;;  %s5647_s3 = inlined_call_operand.vmem [shape: f32[1,64], index: 3, kind: input, shape index: {}]   ;;  %s5648_s4 = inlined_call_operand.vmem [shape: bf16[128,128], index: 4, kind: input, shape index: {}]   ;;  %s5649_s5 = inlined_call_operand.vmem [shape: bf16[64,128], index: 5, kind: input, shape index: {}]   ;;  %s5650_s6 = inlined_call_operand.vmem [shape: f32[1,128], index: 6, kind: input, shape index: {}]   ;;  %s5651_s7 = inlined_call_operand.hbm [shape: f32[2,512,128], index: 7, kind: output, shape index: {}]  }
   0x1   :  { %14 = vsyncpa [#allocation5 + $0x1], 0  ;;  %s4283_s24 = smov 0   ;;  %s4285_s25 = smov 0  }
   0x2   :  { %s4287_s26 = smov 0   ;;  %s4289_s27 = smov 0  }
   0x3   :  { %s4291_s28 = smov 0   ;;  %s4293_s29 = smov 0  }
   0x4 LB: > { %s3117_s30 = sadd.s32 4294967295, %s4237_s29   ;;  %s3118_s8 = sadd.s32 4294967294, %s4237_s29   ;;  %s4237_s29 = sphi %s4293_s29, %s20_s29   ;;  %s4233_s28 = sphi %s4291_s28, %s5766_s28   ;;  %s4229_s27 = sphi %s4289_s27, %s5765_s27   ;;  %s4225_s26 = sphi %s4287_s26, %s5764_s26   ;;  %s4221_s25 = sphi %s4285_s25, %s5763_s25   ;;  %s4217_s24 = sphi %s4283_s24, %s5762_s24  }
   0x5   : > { %s32_s9 = sadd.s32 1, %s4233_s28  ;;  %s200_s10 = sadd.s32 1, %s4225_s26 }
   0x6   : > { %p34_p0 = scmp.ge.s32.totalorder %s32_s9, 2  ;;  %p210_p1 = scmp.ne.s32.totalorder %s4225_s26, %s4221_s25 }
   0x7   : > { %p211_p2 = scmp.eq.s32.totalorder %s3117_s30, 1  ;;  %p216_p3 = scmp.ne.s32.totalorder %s4221_s25, %s4217_s24 }
   0x8   : > { %s5768_s9 = smov (%p34_p0, %s32_s9), 0  ;;  %p217_p5 = scmp.eq.s32.totalorder %s3118_s8, 1 }
   0x9   : > { %p4323_p4 = por %p211_p2, %p210_p1  ;;  %s195_s12 = ssub.s32 %s4233_s28, %s5768_s9 }
   0xa   : > { %p3121_p6 = scmp.ge.s32.totalorder %s4237_s29, 1  ;;  %p198_p7 = scmp.eq.s32.totalorder %s195_s12, 0 }
   0xb   : > { %p4330_p8 = por %p217_p5, %p216_p3  ;;  %p271_p9 = scmp.lt.s32.totalorder %s4237_s29, 3 }
   0xc   : > { %s4336_s14 = scalar_select %p198_p7, %s4225_s26, %s200_s10  }
   0xd   : > { %p272_p10 = pnand %p3121_p6, %p271_p9 }
   0xf   : > { %275 = sbr.rel (%p272_p10) target bundleno = 1577 (0x629), region = 48 }
  0x16   : > { %v3811_v0 = vld [vmem:[%s5648_s4] sm:$0xff]   ;;  %p313_p11 = scmp.lt.s32.totalorder %s4229_s27, 1  ;;  %v3812_v1 = vld [vmem:[%s5648_s4 + $0x8] sm:$0xff]   ;;  %v3813_v2 = vld [vmem:[%s5648_s4 + $0x10] sm:$0xff]   ;;  %vm566_vm0 = vcmask 523264   ;;  %s309_s20 = sand.u32 1, %s4221_s25  }
  0x17   : > { %3401 = vmatprep.subr.bf16.mxu1 %v3811_v0  ;;  %v3814_v3 = vld [vmem:[%s5648_s4 + $0x18] sm:$0xff]   ;;  %v3815_v5 = vld [vmem:[%s5648_s4 + $0x20] sm:$0xff]   ;;  %v3816_v6 = vld [vmem:[%s5648_s4 + $0x28] sm:$0xff]   ;;  %s3228_s30 = sshll.u32 %s4229_s27, 13  ;;  %s4240_s18 = smov [#allocation4]  }
  0x18   : > { %s4346_s19 = scalar_select %p313_p11, %s4229_s27, 1  ;;  %3402 = vmatpush3.bf16.msra.mxu1 %v3811_v0  ;;  %v3817_v7 = vld [vmem:[%s5648_s4 + $0x30] sm:$0xff]   ;;  %v3818_v8 = vld [vmem:[%s5648_s4 + $0x38] sm:$0xff]   ;;  %v3825_v9 = vld [vmem:[%s5646_s2] sm:$0xff]  }
  0x19   : > { %3403 = vmatprep.subr.bf16.mxu1 %v3812_v1  ;;  %v3826_v12 = vld [vmem:[%s5646_s2 + $0x8] sm:$0xff]   ;;  %v3827_v13 = vld [vmem:[%s5646_s2 + $0x10] sm:$0xff]   ;;  %v3830_v16 = vld [vmem:[%s5646_s2 + $0x18] sm:$0xff]   ;;  %s5588_s27 = scalar_lea.hbm %s5651_s7, %s3228_s30 }
  0x1a   : > { %s3227_s22 = sshll.u32 %s4346_s19, 6  ;;  %v3831_v17 = vld [vmem:[%s5646_s2 + $0x20] sm:$0xff]   ;;  %s3226_s23 = sshll.u32 %s4346_s19, 9  ;;  %v3832_v20 = vld [vmem:[%s5646_s2 + $0x28] sm:$0xff]   ;;  %v3833_v21 = vld [vmem:[%s5646_s2 + $0x30] sm:$0xff]  }
  0x1b   : > { %s4355_s8 = scalar_lea.vmem %s5645_s1, %s3227_s22  ;;  %s4401_s16 = scalar_lea.vmem %s5644_s0, %s3226_s23  ;;  %v3834_v26 = vld [vmem:[%s5646_s2 + $0x38] sm:$0xff]  }
  0x1c   : > { %3404 = vmatpush3.bf16.msra.mxu1 %v3812_v1  ;;  %v3819_v4 = vld [vmem:[%s4355_s8] sm:$0xff]   ;;  %v3820_v10 = vld [vmem:[%s4355_s8 + $0x8] sm:$0xff]   ;;  %v3821_v11 = vld [vmem:[%s4355_s8 + $0x10] sm:$0xff]   ;;  %s3122_s22 = sshll.u32 %s309_s20, 9  ;;  %s5598_s19 = scalar_lea.sflag [#allocation5], %s309_s20 }
  0x1d   : > { %3405 = vmatprep.subr.bf16.mxu1 %v3813_v2  ;;  %3417 = vmatprep.mubr.bf16.mxu1 %v3819_v4  ;;  %v3822_v14 = vld [vmem:[%s4355_s8 + $0x18] sm:$0xff]   ;;  %v3823_v15 = vld [vmem:[%s4355_s8 + $0x20] sm:$0xff]   ;;  %v3824_v18 = vld [vmem:[%s4355_s8 + $0x28] sm:$0xff]   ;;  %s5397_s23 = scalar_lea.vmem [#allocation4], %s3122_s22 }
  0x1e   : > { %v3828_v19 = vld [vmem:[%s4355_s8 + $0x30] sm:$0xff]   ;;  %v615_v22 = vld [vmem:[%s4401_s16] sm:$0xff]  ;;  %v616_v23 = vld [vmem:[%s4401_s16 + $0x8] sm:$0xff]  ;;  %s3026_s10 = sshll.u32 %s5397_s23, 4  ;;  %s5590_s10 = int_to_ptr.vmem [resolvable:$true] %s3026_s10 }
  0x1f   : > { %v3829_v24 = vld [vmem:[%s4355_s8 + $0x38] sm:$0xff]   ;;  %v679_v25 = vpack.c.bf16 %v616_v23, %v615_v22  ;;  %v617_v27 = vld [vmem:[%s4401_s16 + $0x10] sm:$0xff]  ;;  %v619_v29 = vld [vmem:[%s4401_s16 + $0x20] sm:$0xff]  ;;  %s4239_s8 = smov 64   ;;  %s4159_s17 = scalar_lea.vmem %s5590_s10, 8192 }
  0x20   : > { %3406 = vmatpush3.bf16.msra.mxu1 %v3813_v2  ;;  %v618_v28 = vld [vmem:[%s4401_s16 + $0x18] sm:$0xff]  ;;  %v620_v30 = vld [vmem:[%s4401_s16 + $0x28] sm:$0xff]  ;;  %v621_v33 = vld [vmem:[%s4401_s16 + $0x30] sm:$0xff]  ;;  %p4160_p12 = scmp.ne.s32.totalorder %s5590_s10, %s4159_s17 }
  0x21   : > { %3407 = vmatprep.subr.bf16.mxu1 %v3814_v3  ;;  %v680_v31 = vpack.c.bf16 %v618_v28, %v617_v27  ;;  %v681_v32 = vpack.c.bf16 %v620_v30, %v619_v29  ;;  %v622_v34 = vld [vmem:[%s4401_s16 + $0x38] sm:$0xff]  ;;  %v623_v35 = vld [vmem:[%s4401_s16 + $0x40] sm:$0xff]  ;;  %v624_v36 = vld [vmem:[%s4401_s16 + $0x48] sm:$0xff] }
  0x22   : > { %v682_v37 = vpack.c.bf16 %v622_v34, %v621_v33  ;;  %v683_v38 = vpack.c.bf16 %v624_v36, %v623_v35  ;;  %v625_v39 = vld [vmem:[%s4401_s16 + $0x50] sm:$0xff]  ;;  %v626_v40 = vld [vmem:[%s4401_s16 + $0x58] sm:$0xff]  ;;  %v627_v41 = vld [vmem:[%s4401_s16 + $0x60] sm:$0xff]  ;;  %p4161_p13 = pnand %p4160_p12, %p4323_p4 }
  0x23   : > { %v628_v42 = vld [vmem:[%s4401_s16 + $0x68] sm:$0xff]  ;;  %v684_v43 = vpack.c.bf16 %v626_v40, %v625_v39  ;;  %v629_v45 = vld [vmem:[%s4401_s16 + $0x70] sm:$0xff]  ;;  %v630_v46 = vld [vmem:[%s4401_s16 + $0x78] sm:$0xff] }
  0x24   : > { %3408 = vmatpush3.bf16.msra.mxu1 %v3814_v3  ;;  %v685_v44 = vpack.c.bf16 %v628_v42, %v627_v41  ;;  %v631_v47 = vld [vmem:[%s4401_s16 + $0x80] sm:$0xff]  ;;  %v632_v48 = vld [vmem:[%s4401_s16 + $0x88] sm:$0xff]  ;;  %v686_v49 = vpack.c.bf16 %v630_v46, %v629_v45  ;;  %v633_v51 = vld [vmem:[%s4401_s16 + $0x90] sm:$0xff]  ;;  %p4162_p0 = pneg %p4161_p13 }
  0x25   : > { %3409 = vmatprep.subr.bf16.mxu1 %v3815_v5  ;;  %v687_v50 = vpack.c.bf16 %v632_v48, %v631_v47  ;;  %v634_v52 = vld [vmem:[%s4401_s16 + $0x98] sm:$0xff]  ;;  %v635_v53 = vld [vmem:[%s4401_s16 + $0xa0] sm:$0xff]  ;;  %v636_v54 = vld [vmem:[%s4401_s16 + $0xa8] sm:$0xff] }
  0x26   : > { %v688_v55 = vpack.c.bf16 %v634_v52, %v633_v51  ;;  %v689_v56 = vpack.c.bf16 %v636_v54, %v635_v53  ;;  %v637_v57 = vld [vmem:[%s4401_s16 + $0xb0] sm:$0xff]  ;;  %v638_v58 = vld [vmem:[%s4401_s16 + $0xb8] sm:$0xff]  ;;  %v639_v59 = vld [vmem:[%s4401_s16 + $0xc0] sm:$0xff] }
  0x27   : > { %v640_v60 = vld [vmem:[%s4401_s16 + $0xc8] sm:$0xff]  ;;  %v690_v61 = vpack.c.bf16 %v638_v58, %v637_v57  ;;  %v641_v63 = vld [vmem:[%s4401_s16 + $0xd0] sm:$0xff]  ;;  %v642_v0 = vld [vmem:[%s4401_s16 + $0xd8] sm:$0xff] }
  0x28   : > { %3410 = vmatpush3.bf16.msra.mxu1 %v3815_v5  ;;  %v691_v62 = vpack.c.bf16 %v640_v60, %v639_v59  ;;  %v643_v1 = vld [vmem:[%s4401_s16 + $0xe0] sm:$0xff]  ;;  %v644_v2 = vld [vmem:[%s4401_s16 + $0xe8] sm:$0xff]  ;;  %v692_v3 = vpack.c.bf16 %v642_v0, %v641_v63  ;;  %v645_v5 = vld [vmem:[%s4401_s16 + $0xf0] sm:$0xff] }
  0x29   : > { %3411 = vmatprep.subr.bf16.mxu1 %v3816_v6  ;;  %v693_v4 = vpack.c.bf16 %v644_v2, %v643_v1  ;;  %v657_v23 = vld [vmem:[%s4401_s16 + $0x150] sm:$0xff]  ;;  %v662_v30 = vld [vmem:[%s4401_s16 + $0x178] sm:$0xff] }
  0x2a   : > { %v661_v29 = vld [vmem:[%s4401_s16 + $0x170] sm:$0xff]  ;;  %v666_v36 = vld [vmem:[%s4401_s16 + $0x198] sm:$0xff] }
  0x2b   : > { %v702_v33 = vpack.c.bf16 %v662_v30, %v661_v29  ;;  %v665_v35 = vld [vmem:[%s4401_s16 + $0x190] sm:$0xff]  ;;  %v670_v42 = vld [vmem:[%s4401_s16 + $0x1b8] sm:$0xff] }
  0x2c   : > { %3412 = vmatpush3.bf16.msra.mxu1 %v3816_v6  ;;  %v646_v6 = vld [vmem:[%s4401_s16 + $0xf8] sm:$0xff]  ;;  %v704_v39 = vpack.c.bf16 %v666_v36, %v665_v35  ;;  %v669_v41 = vld [vmem:[%s4401_s16 + $0x1b0] sm:$0xff] }
  0x2d   : > { %3413 = vmatprep.subr.bf16.mxu1 %v3817_v7  ;;  %v706_v45 = vpack.c.bf16 %v670_v42, %v669_v41  ;;  %v673_v47 = vld [vmem:[%s4401_s16 + $0x1d0] sm:$0xff]  ;;  %v674_v48 = vld [vmem:[%s4401_s16 + $0x1d8] sm:$0xff] }
  0x2e   : > { %v708_v51 = vpack.c.bf16 %v674_v48, %v673_v47  ;;  %v677_v53 = vld [vmem:[%s4401_s16 + $0x1f0] sm:$0xff]  ;;  %v678_v54 = vld [vmem:[%s4401_s16 + $0x1f8] sm:$0xff] }
  0x30   : > { %3414 = vmatpush3.bf16.msra.mxu1 %v3817_v7  ;;  %v647_v7 = vld [vmem:[%s4401_s16 + $0x100] sm:$0xff] }
  0x31   : > { %3415 = vmatprep.subr.bf16.mxu1 %v3818_v8 }
  0x34   : > { %3416 = vmatpush3.bf16.msra.mxu1 %v3818_v8  ;;  %v648_v8 = vld [vmem:[%s4401_s16 + $0x108] sm:$0xff] }
  0x35   : > { %3433 = vmatprep.subr.bf16.mxu1 %v3825_v9 }
  0x37   : > { %3418 = vmatmul.mubr.bf16.vlgmr.msra.gmra.mrb[0].mxu1 %v3820_v10  ;;  %v695_v10 = vpack.c.bf16 %v648_v8, %v647_v7 }
  0x38   : > { %3421 = vmatprep.mubr.bf16.mxu1 %v3821_v11  ;;  %3434 = vmatpush3.bf16.msra.mxu1 %v3825_v9  ;;  %v694_v9 = vpack.c.bf16 %v646_v6, %v645_v5  ;;  %v649_v11 = vld [vmem:[%s4401_s16 + $0x110] sm:$0xff] }
  0x39   : > { %3435 = vmatprep.subr.bf16.mxu1 %v3826_v12 }
  0x3c   : > { %3436 = vmatpush3.bf16.msra.mxu1 %v3826_v12  ;;  %v650_v12 = vld [vmem:[%s4401_s16 + $0x118] sm:$0xff] }
  0x3d   : > { %3437 = vmatprep.subr.bf16.mxu1 %v3827_v13 }
  0x3f   : > { %3422 = vmatmul.mubr.bf16.gmra.mrb[4].mxu1 %v3822_v14  ;;  %v652_v14 = vld [vmem:[%s4401_s16 + $0x128] sm:$0xff] }
  0x40   : > { %3425 = vmatprep.mubr.bf16.mxu1 %v3823_v15  ;;  %3438 = vmatpush3.bf16.msra.mxu1 %v3827_v13  ;;  %v651_v13 = vld [vmem:[%s4401_s16 + $0x120] sm:$0xff]  ;;  %v696_v15 = vpack.c.bf16 %v650_v12, %v649_v11 }
  0x41   : > { %3439 = vmatprep.subr.bf16.mxu1 %v3830_v16 }
  0x44   : > { %3440 = vmatpush3.bf16.msra.mxu1 %v3830_v16  ;;  %v697_v16 = vpack.c.bf16 %v652_v14, %v651_v13 }
  0x45   : > { %3441 = vmatprep.subr.bf16.mxu1 %v3831_v17 }
  0x47   : > { %3426 = vmatmul.mubr.bf16.gmra.mrb[8].mxu1 %v3824_v18  ;;  %v654_v18 = vld [vmem:[%s4401_s16 + $0x138] sm:$0xff] }
  0x48   : > { %3429 = vmatprep.mubr.bf16.mxu1 %v3828_v19  ;;  %3442 = vmatpush3.bf16.msra.mxu1 %v3831_v17  ;;  %v653_v17 = vld [vmem:[%s4401_s16 + $0x130] sm:$0xff]  ;;  %v655_v19 = vld [vmem:[%s4401_s16 + $0x140] sm:$0xff] }
  0x49   : > { %3443 = vmatprep.subr.bf16.mxu1 %v3832_v20 }
  0x4c   : > { %3444 = vmatpush3.bf16.msra.mxu1 %v3832_v20  ;;  %v656_v20 = vld [vmem:[%s4401_s16 + $0x148] sm:$0xff] }
  0x4d   : > { %3445 = vmatprep.subr.bf16.mxu1 %v3833_v21  ;;  %v699_v22 = vpack.c.bf16 %v656_v20, %v655_v19 }
  0x4f   : > { %3430 = vmatmul.mubr.bf16.gmra.mrb[12].mxu1 %v3829_v24  ;;  %v658_v24 = vld [vmem:[%s4401_s16 + $0x158] sm:$0xff] }
  0x50   : > { %3446 = vmatpush3.bf16.msra.mxu1 %v3833_v21  ;;  %3449 = vmatprep.mubr.bf16.mxu1 %v679_v25  ;;  %v698_v21 = vpack.c.bf16 %v654_v18, %v653_v17  ;;  %v659_v25 = vld [vmem:[%s4401_s16 + $0x160] sm:$0xff]  ;;  %v700_v27 = vpack.c.bf16 %v658_v24, %v657_v23 }
  0x51   : > { %3447 = vmatprep.subr.bf16.mxu1 %v3834_v26 }
  0x54   : > { %3448 = vmatpush3.bf16.msra.mxu1 %v3834_v26  ;;  %v660_v26 = vld [vmem:[%s4401_s16 + $0x168] sm:$0xff] }
  0x55   : > { %v701_v28 = vpack.c.bf16 %v660_v26, %v659_v25 }
  0x57   : > { %3450 = vmatmul.mubr.bf16.vlgmr.msra.gmra.mrb[16].mxu1 %v680_v31  ;;  %v663_v31 = vld [vmem:[%s4401_s16 + $0x180] sm:$0xff] }
  0x58   : > { %3453 = vmatprep.mubr.bf16.mxu1 %v681_v32  ;;  %v664_v32 = vld [vmem:[%s4401_s16 + $0x188] sm:$0xff] }
  0x59   : > { %v703_v34 = vpack.c.bf16 %v664_v32, %v663_v31 }
  0x5f   : > { %3454 = vmatmul.mubr.bf16.gmra.mrb[20].mxu1 %v682_v37  ;;  %v667_v37 = vld [vmem:[%s4401_s16 + $0x1a0] sm:$0xff] }
  0x60   : > { %3457 = vmatprep.mubr.bf16.mxu1 %v683_v38  ;;  %v668_v38 = vld [vmem:[%s4401_s16 + $0x1a8] sm:$0xff] }
  0x61   : > { %v705_v40 = vpack.c.bf16 %v668_v38, %v667_v37 }
  0x67   : > { %3458 = vmatmul.mubr.bf16.gmra.mrb[24].mxu1 %v684_v43  ;;  %v671_v43 = vld [vmem:[%s4401_s16 + $0x1c0] sm:$0xff] }
  0x68   : > { %3461 = vmatprep.mubr.bf16.mxu1 %v685_v44  ;;  %v672_v44 = vld [vmem:[%s4401_s16 + $0x1c8] sm:$0xff] }
  0x69   : > { %v707_v46 = vpack.c.bf16 %v672_v44, %v671_v43 }
  0x6f   : > { %3462 = vmatmul.mubr.bf16.gmra.mrb[28].mxu1 %v686_v49  ;;  %v675_v49 = vld [vmem:[%s4401_s16 + $0x1e0] sm:$0xff] }
  0x70   : > { %3465 = vmatprep.mubr.bf16.mxu1 %v687_v50  ;;  %v676_v50 = vld [vmem:[%s4401_s16 + $0x1e8] sm:$0xff] }
  0x71   : > { %v709_v52 = vpack.c.bf16 %v676_v50, %v675_v49 }
  0x77   : > { %3466 = vmatmul.mubr.bf16.gmra.mrb[32].mxu1 %v688_v55  ;;  %v710_v55 = vpack.c.bf16 %v678_v54, %v677_v53 }
  0x78   : > { %3469 = vmatprep.mubr.bf16.mxu1 %v689_v56 }
  0x7f   : > { %3470 = vmatmul.mubr.bf16.gmra.mrb[36].mxu1 %v690_v61 }
  0x80   : > { %3473 = vmatprep.mubr.bf16.mxu1 %v691_v62 }
  0x87   : > { %3474 = vmatmul.mubr.bf16.gmra.mrb[40].mxu1 %v692_v3 }
  0x88   : > { %3477 = vmatprep.mubr.bf16.mxu1 %v693_v4 }
  0x8f   : > { %3478 = vmatmul.mubr.bf16.gmra.mrb[44].mxu1 %v694_v9 }
  0x90   : > { %3481 = vmatprep.mubr.bf16.mxu1 %v695_v10 }
  0x97   : > { %3482 = vmatmul.mubr.bf16.gmra.mrb[48].mxu1 %v696_v15 }
  0x98   : > { %3485 = vmatprep.mubr.bf16.mxu1 %v697_v16 }
  0x9f   : > { %3486 = vmatmul.mubr.bf16.gmra.mrb[52].mxu1 %v698_v21 }
  0xa0   : > { %3489 = vmatprep.mubr.bf16.mxu1 %v699_v22  ;;  %v4501_v22 = vld [vmem:[%s5647_s3] ss:$0 sm:$0xff] }
  0xa7   : > { %3490 = vmatmul.mubr.bf16.gmra.mrb[56].mxu1 %v700_v27 }
  0xa8   : > { %3493 = vmatprep.mubr.bf16.mxu1 %v701_v28 }
  0xaf   : > { %3494 = vmatmul.mubr.bf16.gmra.mrb[60].mxu1 %v702_v33 }
  0xb0   : > { %3497 = vmatprep.mubr.bf16.mxu1 %v703_v34 }
  0xb7   : > { %3498 = vmatmul.mubr.bf16.gmra.mrb[64].mxu1 %v704_v39 }
  0xb8   : > { %3501 = vmatprep.mubr.bf16.mxu1 %v705_v40 }
  0xbf   : > { %3502 = vmatmul.mubr.bf16.gmra.mrb[68].mxu1 %v706_v45 }
  0xc0   : > { %3505 = vmatprep.mubr.bf16.mxu1 %v707_v46 }
  0xc7   : > { %3506 = vmatmul.mubr.bf16.gmra.mrb[72].mxu1 %v708_v51 }
  0xc8   : > { %3509 = vmatprep.mubr.bf16.mxu1 %v709_v52 }
  0xcf   : > { %3510 = vmatmul.mubr.bf16.gmra.mrb[76].mxu1 %v710_v55 }
 0x10a   : > { %v3419_v56 = vpop.f32.mrb[0].mxu1 }
 0x10b   : > { %v495_v57 = vpop.f32.mrb[1].mxu1 }
 0x10c   : > { %v3420_v58 = vpop.f32.mrb[2].mxu1 }
 0x10d   : > { %v559_v59 = vpack.c.bf16 %v3420_v58, %v3419_v56  ;;  %v498_v60 = vpop.f32.mrb[3].mxu1 }
 0x10e   : > { %v558_v61 = vpack.c.bf16 %v498_v60, %v495_v57 }
 0x10f   : > { %568 = vst.msk [vmem:[#allocation2 + $0x8] sm:$0xff] %vm566_vm0, %v559_v59  ;;  %585 = vrot.lane.b32.xlu1 %v559_v59, %s4239_s8 }
 0x110   : > { %567 = vst.msk [vmem:[#allocation2] sm:$0xff] %vm566_vm0, %v558_v61  ;;  %583 = vrot.lane.b32.xlu0 %v558_v61, %s4239_s8 }
 0x112   : > { %v3423_v62 = vpop.f32.mrb[4].mxu1 }
 0x113   : > { %v511_v63 = vpop.f32.mrb[5].mxu1 }
 0x114   : > { %v3424_v0 = vpop.f32.mrb[6].mxu1 }
 0x115   : > { %v561_v1 = vpack.c.bf16 %v3424_v0, %v3423_v62  ;;  %v514_v2 = vpop.f32.mrb[7].mxu1 }
 0x116   : > { %v560_v3 = vpack.c.bf16 %v514_v2, %v511_v63  ;;  %v1104_v6 = vld [vmem:[#allocation2 + $0x8] sm:$0xff] }
 0x117   : > { %570 = vst.msk [vmem:[#allocation2 + $0x18] sm:$0xff] %vm566_vm0, %v561_v1  ;;  %v1103_v4 = vld [vmem:[#allocation2] sm:$0xff]  ;;  %589 = vrot.lane.b32.xlu1 %v561_v1, %s4239_s8  ;;  %v1212_v14 = vsel %vm566_vm0, %v1104_v6, 0 }
 0x118   : > { %569 = vst.msk [vmem:[#allocation2 + $0x10] sm:$0xff] %vm566_vm0, %v560_v3  ;;  %3745 = vmatprep.subr.msk.bf16.mxu0 %vm566_vm0, %v1103_v4  ;;  %587 = vrot.lane.b32.xlu0 %v560_v3, %s4239_s8  ;;  %v1209_v5 = vsel %vm566_vm0, %v1103_v4, 0 }
 0x119   : > { %3514 = vmatpush3.bf16.xpose.msra.mxu0 %v1209_v5 }
 0x11a   : > { %3746 = vmatprep.subr.msk.bf16.mxu0 %vm566_vm0, %v1104_v6  ;;  %v3427_v7 = vpop.f32.mrb[8].mxu1 }
 0x11b   : > { %v527_v8 = vpop.f32.mrb[9].mxu1 }
 0x11c   : > { %v3428_v9 = vpop.f32.mrb[10].mxu1 }
 0x11d   : > { %v563_v10 = vpack.c.bf16 %v3428_v9, %v3427_v7  ;;  %v530_v11 = vpop.f32.mrb[11].mxu1 }
 0x11e   : > { %v562_v12 = vpack.c.bf16 %v530_v11, %v527_v8  ;;  %v1106_v23 = vld [vmem:[#allocation2 + $0x18] sm:$0xff] }
 0x11f   : > { %572 = vst.msk [vmem:[#allocation2 + $0x28] sm:$0xff] %vm566_vm0, %v563_v10  ;;  %v1105_v13 = vld [vmem:[#allocation2 + $0x10] sm:$0xff]  ;;  %593 = vrot.lane.b32.xlu1 %v563_v10, %s4239_s8  ;;  %v1218_v34 = vsel %vm566_vm0, %v1106_v23, 0 }
 0x120   : > { %571 = vst.msk [vmem:[#allocation2 + $0x20] sm:$0xff] %vm566_vm0, %v562_v12  ;;  %591 = vrot.lane.b32.xlu0 %v562_v12, %s4239_s8  ;;  %v1215_v21 = vsel %vm566_vm0, %v1105_v13, 0 }
 0x121   : > { %3516 = vmatpush3.bf16.xpose.msra.mxu0 %v1212_v14 }
 0x122   : > { %3747 = vmatprep.subr.msk.bf16.mxu0 %vm566_vm0, %v1105_v13  ;;  %v3431_v15 = vpop.f32.mrb[12].mxu1 }
 0x123   : > { %v543_v16 = vpop.f32.mrb[13].mxu1 }
 0x124   : > { %v3432_v17 = vpop.f32.mrb[14].mxu1 }
 0x125   : > { %v4491_v18 = vpack.c.bf16 %v3432_v17, %v3431_v15  ;;  %v546_v19 = vpop.f32.mrb[15].mxu1 }
 0x126   : > { %v564_v20 = vpack.c.bf16 %v546_v19, %v543_v16  ;;  %v1108_v47 = vld [vmem:[#allocation2 + $0x28] sm:$0xff] }
 0x127   : > { %574 = vst.msk [vmem:[#allocation2 + $0x38] sm:$0xff] %vm566_vm0, %v4491_v18  ;;  %v1107_v32 = vld [vmem:[#allocation2 + $0x20] sm:$0xff]  ;;  %v1224_v58 = vsel %vm566_vm0, %v1108_v47, 0 }
 0x128   : > { %573 = vst.msk [vmem:[#allocation2 + $0x30] sm:$0xff] %vm566_vm0, %v564_v20  ;;  %595 = vrot.lane.b32.xlu0 %v564_v20, %s4239_s8  ;;  %v1221_v45 = vsel %vm566_vm0, %v1107_v32, 0 }
 0x129   : > { %3518 = vmatpush3.bf16.xpose.msra.mxu0 %v1215_v21 }
 0x12a   : > { %3748 = vmatprep.subr.msk.bf16.mxu0 %vm566_vm0, %v1106_v23  ;;  %v3451_v24 = vpop.f32.mrb[16].mxu1 }
 0x12b   : > { %v4505_v25 = vadd.f32 %v3451_v24, %v4501_v22  ;;  %v816_v26 = vpop.f32.mrb[17].mxu1 }
 0x12c   : > { %v817_v27 = vadd.f32 %v4501_v22, %v816_v26  ;;  %v3452_v28 = vpop.f32.mrb[18].mxu1 }
 0x12d   : > { %v4509_v29 = vadd.f32 %v3452_v28, %v4501_v22  ;;  %v819_v30 = vpop.f32.mrb[19].mxu1 }
 0x12e   : > { %v820_v31 = vadd.f32 %v4501_v22, %v819_v30  ;;  %v1110_v7 = vld [vmem:[#allocation2 + $0x38] sm:$0xff] }
 0x12f   : > { %v1072_v33 = vpack.c.bf16 %v4509_v29, %v4505_v25  ;;  %v1109_v56 = vld [vmem:[#allocation2 + $0x30] sm:$0xff]  ;;  %v1230_v17 = vsel %vm566_vm0, %v1110_v7, 0 }
 0x130   : > { %v1071_v35 = vpack.c.bf16 %v820_v31, %v817_v27  ;;  %v1227_v5 = vsel %vm566_vm0, %v1109_v56, 0 }
 0x131   : > { %3520 = vmatpush3.bf16.xpose.msra.mxu0 %v1218_v34 }
 0x132   : > { %3749 = vmatprep.subr.msk.bf16.mxu0 %vm566_vm0, %v1107_v32  ;;  %3529 = vmatprep.mubr.msk.bf16.mxu0 %vm566_vm0, %v1071_v35  ;;  %v3455_v36 = vpop.f32.mrb[20].mxu1 }
 0x133   : > { %v4518_v37 = vadd.f32 %v3455_v36, %v4501_v22  ;;  %v832_v38 = vpop.f32.mrb[21].mxu1 }
 0x134   : > { %v4521_v39 = vadd.f32 %v4501_v22, %v832_v38  ;;  %v3456_v40 = vpop.f32.mrb[22].mxu1 }
 0x135   : > { %v4524_v41 = vadd.f32 %v3456_v40, %v4501_v22  ;;  %v835_v42 = vpop.f32.mrb[23].mxu1 }
 0x136   : > { %v836_v43 = vadd.f32 %v4501_v22, %v835_v42 }
 0x137   : > { %v1074_v44 = vpack.c.bf16 %v4524_v41, %v4518_v37 }
 0x138   : > { %v1073_v46 = vpack.c.bf16 %v836_v43, %v4521_v39 }
 0x139   : > { %3522 = vmatpush3.bf16.xpose.msra.mxu0 %v1221_v45 }
 0x13a   : > { %3750 = vmatprep.subr.msk.bf16.mxu0 %vm566_vm0, %v1108_v47  ;;  %v3459_v48 = vpop.f32.mrb[24].mxu1 }
 0x13b   : > { %v4533_v49 = vadd.f32 %v3459_v48, %v4501_v22  ;;  %v848_v50 = vpop.f32.mrb[25].mxu1 }
 0x13c   : > { %v849_v51 = vadd.f32 %v4501_v22, %v848_v50  ;;  %v3460_v52 = vpop.f32.mrb[26].mxu1 }
 0x13d   : > { %v4537_v53 = vadd.f32 %v3460_v52, %v4501_v22  ;;  %v851_v54 = vpop.f32.mrb[27].mxu1 }
 0x13e   : > { %v852_v55 = vadd.f32 %v4501_v22, %v851_v54 }
 0x13f   : > { %v1076_v57 = vpack.c.bf16 %v4537_v53, %v4533_v49 }
 0x140   : > { %v1075_v59 = vpack.c.bf16 %v852_v55, %v849_v51 }
 0x141   : > { %3524 = vmatpush3.bf16.xpose.msra.mxu0 %v1224_v58 }
 0x142   : > { %3751 = vmatprep.subr.msk.bf16.mxu0 %vm566_vm0, %v1109_v56  ;;  %v3463_v60 = vpop.f32.mrb[28].mxu1 }
 0x143   : > { %v4545_v61 = vadd.f32 %v3463_v60, %v4501_v22  ;;  %v864_v62 = vpop.f32.mrb[29].mxu1 }
 0x144   : > { %v865_v63 = vadd.f32 %v4501_v22, %v864_v62  ;;  %v3464_v0 = vpop.f32.mrb[30].mxu1 }
 0x145   : > { %v4549_v1 = vadd.f32 %v3464_v0, %v4501_v22  ;;  %v867_v2 = vpop.f32.mrb[31].mxu1 }
 0x146   : > { %v868_v3 = vadd.f32 %v4501_v22, %v867_v2 }
 0x147   : > { %v1078_v4 = vpack.c.bf16 %v4549_v1, %v4545_v61 }
 0x148   : > { %v1077_v6 = vpack.c.bf16 %v868_v3, %v865_v63 }
 0x149   : > { %3526 = vmatpush3.bf16.xpose.msra.mxu0 %v1227_v5 }
 0x14a   : > { %3752 = vmatprep.subr.msk.bf16.mxu0 %vm566_vm0, %v1110_v7  ;;  %v3467_v8 = vpop.f32.mrb[32].mxu1 }
 0x14b   : > { %v4557_v9 = vadd.f32 %v3467_v8, %v4501_v22  ;;  %v880_v10 = vpop.f32.mrb[33].mxu1 }
 0x14c   : > { %v881_v11 = vadd.f32 %v4501_v22, %v880_v10  ;;  %v3468_v12 = vpop.f32.mrb[34].mxu1 }
 0x14d   : > { %v4561_v13 = vadd.f32 %v3468_v12, %v4501_v22  ;;  %v883_v14 = vpop.f32.mrb[35].mxu1 }
 0x14e   : > { %v884_v15 = vadd.f32 %v4501_v22, %v883_v14 }
 0x14f   : > { %v1080_v16 = vpack.c.bf16 %v4561_v13, %v4557_v9 }
 0x150   : > { %v1079_v19 = vpack.c.bf16 %v884_v15, %v881_v11 }
 0x151   : > { %3528 = vmatpush3.bf16.xpose.msra.mxu0 %v1230_v17 }
 0x152   : > { %v3471_v20 = vpop.f32.mrb[36].mxu1 }
 0x153   : > { %v4568_v21 = vadd.f32 %v3471_v20, %v4501_v22  ;;  %v896_v23 = vpop.f32.mrb[37].mxu1 }
 0x154   : > { %v897_v24 = vadd.f32 %v4501_v22, %v896_v23  ;;  %v3472_v26 = vpop.f32.mrb[38].mxu1 }
 0x155   : > { %v4572_v27 = vadd.f32 %v3472_v26, %v4501_v22  ;;  %v899_v28 = vpop.f32.mrb[39].mxu1 }
 0x156   : > { %v900_v30 = vadd.f32 %v4501_v22, %v899_v28 }
 0x157   : > { %v1082_v31 = vpack.c.bf16 %v4572_v27, %v4568_v21 }
 0x158   : > { %3530 = vmatmul.mubr.msk.bf16.vlgmr.msra.gmra.mrb[0].mxu0 %vm566_vm0, %v1072_v33  ;;  %v1081_v32 = vpack.c.bf16 %v900_v30, %v897_v24 }
 0x159   : > { %3533 = vmatprep.mubr.msk.bf16.mxu0 %vm566_vm0, %v1073_v46 }
 0x15a   : > { %v3475_v34 = vpop.f32.mrb[40].mxu1 }
 0x15b   : > { %v4583_v35 = vadd.f32 %v3475_v34, %v4501_v22  ;;  %v912_v36 = vpop.f32.mrb[41].mxu1 }
 0x15c   : > { %v913_v38 = vadd.f32 %v4501_v22, %v912_v36  ;;  %v3476_v39 = vpop.f32.mrb[42].mxu1 }
 0x15d   : > { %v4587_v40 = vadd.f32 %v3476_v39, %v4501_v22  ;;  %v915_v42 = vpop.f32.mrb[43].mxu1 }
 0x15e   : > { %v916_v43 = vadd.f32 %v4501_v22, %v915_v42 }
 0x15f   : > { %v1084_v25 = vpack.c.bf16 %v4587_v40, %v4583_v35 }
 0x160   : > { %3534 = vmatmul.mubr.msk.bf16.gmra.mrb[4].mxu0 %vm566_vm0, %v1074_v44  ;;  %v1083_v29 = vpack.c.bf16 %v916_v43, %v913_v38 }
 0x161   : > { %3537 = vmatprep.mubr.msk.bf16.mxu0 %vm566_vm0, %v1075_v59 }
 0x162   : > { %v3479_v33 = vpop.f32.mrb[44].mxu1 }
 0x163   : > { %v4598_v45 = vadd.f32 %v3479_v33, %v4501_v22  ;;  %v928_v46 = vpop.f32.mrb[45].mxu1 }
 0x164   : > { %v929_v47 = vadd.f32 %v4501_v22, %v928_v46  ;;  %v3480_v48 = vpop.f32.mrb[46].mxu1 }
 0x165   : > { %v4602_v50 = vadd.f32 %v3480_v48, %v4501_v22  ;;  %v931_v51 = vpop.f32.mrb[47].mxu1 }
 0x166   : > { %v932_v52 = vadd.f32 %v4501_v22, %v931_v51 }
 0x167   : > { %v1086_v37 = vpack.c.bf16 %v4602_v50, %v4598_v45 }
 0x168   : > { %3538 = vmatmul.mubr.msk.bf16.gmra.mrb[8].mxu0 %vm566_vm0, %v1076_v57  ;;  %v1085_v41 = vpack.c.bf16 %v932_v52, %v929_v47 }
 0x169   : > { %3541 = vmatprep.mubr.msk.bf16.mxu0 %vm566_vm0, %v1077_v6 }
 0x16a   : > { %v3483_v44 = vpop.f32.mrb[48].mxu1 }
 0x16b   : > { %v4613_v54 = vadd.f32 %v3483_v44, %v4501_v22  ;;  %v944_v55 = vpop.f32.mrb[49].mxu1 }
 0x16c   : > { %v4616_v56 = vadd.f32 %v4501_v22, %v944_v55  ;;  %v3484_v58 = vpop.f32.mrb[50].mxu1 }
 0x16d   : > { %v4619_v59 = vadd.f32 %v3484_v58, %v4501_v22  ;;  %v947_v60 = vpop.f32.mrb[51].mxu1 }
 0x16e   : > { %v4622_v49 = vadd.f32 %v4501_v22, %v947_v60 }
 0x16f   : > { %v1088_v53 = vpack.c.bf16 %v4619_v59, %v4613_v54 }
 0x170   : > { %3542 = vmatmul.mubr.msk.bf16.gmra.mrb[12].mxu0 %vm566_vm0, %v1078_v4  ;;  %v1087_v57 = vpack.c.bf16 %v4622_v49, %v4616_v56 }
 0x171   : > { %3545 = vmatprep.mubr.msk.bf16.mxu0 %vm566_vm0, %v1079_v19 }
 0x172   : > { %v3487_v62 = vpop.f32.mrb[52].mxu1 }
 0x173   : > { %v4634_v63 = vadd.f32 %v3487_v62, %v4501_v22  ;;  %v960_v0 = vpop.f32.mrb[53].mxu1 }
 0x174   : > { %v4637_v2 = vadd.f32 %v4501_v22, %v960_v0  ;;  %v3488_v3 = vpop.f32.mrb[54].mxu1 }
 0x175   : > { %v4640_v5 = vadd.f32 %v3488_v3, %v4501_v22  ;;  %v963_v61 = vpop.f32.mrb[55].mxu1 }
 0x176   : > { %v4643_v1 = vadd.f32 %v4501_v22, %v963_v61 }
 0x177   : > { %v1090_v4 = vpack.c.bf16 %v4640_v5, %v4634_v63 }
 0x178   : > { %3546 = vmatmul.mubr.msk.bf16.gmra.mrb[16].mxu0 %vm566_vm0, %v1080_v16  ;;  %v1089_v6 = vpack.c.bf16 %v4643_v1, %v4637_v2 }
 0x179   : > { %3549 = vmatprep.mubr.msk.bf16.mxu0 %vm566_vm0, %v1081_v32 }
 0x17a   : > { %v3491_v7 = vpop.f32.mrb[56].mxu1 }
 0x17b   : > { %v4652_v8 = vadd.f32 %v3491_v7, %v4501_v22  ;;  %v976_v9 = vpop.f32.mrb[57].mxu1 }
 0x17c   : > { %v4655_v10 = vadd.f32 %v4501_v22, %v976_v9  ;;  %v3492_v11 = vpop.f32.mrb[58].mxu1 }
 0x17d   : > { %v4658_v12 = vadd.f32 %v3492_v11, %v4501_v22  ;;  %v979_v13 = vpop.f32.mrb[59].mxu1 }
 0x17e   : > { %v4661_v14 = vadd.f32 %v4501_v22, %v979_v13 }
 0x17f   : > { %v1092_v15 = vpack.c.bf16 %v4658_v12, %v4652_v8 }
 0x180   : > { %3550 = vmatmul.mubr.msk.bf16.gmra.mrb[20].mxu0 %vm566_vm0, %v1082_v31  ;;  %v1091_v16 = vpack.c.bf16 %v4661_v14, %v4655_v10 }
 0x181   : > { %v586_v17 = vpop.permute.xlu1 %585  ;;  %3553 = vmatprep.mubr.msk.bf16.mxu0 %vm566_vm0, %v1083_v29 }
 0x182   : > { %608 = vst.msk [vmem:[#allocation3 + $0x8] sm:$0xff] %vm566_vm0, %v586_v17  ;;  %v584_v19 = vpop.permute.xlu0 %583  ;;  %v3495_v20 = vpop.f32.mrb[60].mxu1 }
 0x183   : > { %607 = vst.msk [vmem:[#allocation3] sm:$0xff] %vm566_vm0, %v584_v19  ;;  %v4672_v21 = vadd.f32 %v3495_v20, %v4501_v22  ;;  %v992_v23 = vpop.f32.mrb[61].mxu1 }
 0x184   : > { %v4675_v24 = vadd.f32 %v4501_v22, %v992_v23  ;;  %v3496_v26 = vpop.f32.mrb[62].mxu1 }
 0x185   : > { %v4678_v27 = vadd.f32 %v3496_v26, %v4501_v22  ;;  %v995_v28 = vpop.f32.mrb[63].mxu1 }
 0x186   : > { %v4681_v30 = vadd.f32 %v4501_v22, %v995_v28 }
 0x187   : > { %v1094_v31 = vpack.c.bf16 %v4678_v27, %v4672_v21 }
 0x188   : > { %3554 = vmatmul.mubr.msk.bf16.gmra.mrb[24].mxu0 %vm566_vm0, %v1084_v25  ;;  %v1093_v32 = vpack.c.bf16 %v4681_v30, %v4675_v24 }
 0x189   : > { %v590_v34 = vpop.permute.xlu1 %589  ;;  %3557 = vmatprep.mubr.msk.bf16.mxu0 %vm566_vm0, %v1085_v41  ;;  %v2130_v40 = vld [vmem:[#allocation3 + $0x8] sm:$0xff] }
 0x18a   : > { %v588_v36 = vpop.permute.xlu0 %587  ;;  %v2129_v38 = vld [vmem:[#allocation3] sm:$0xff]  ;;  %610 = vst.msk [vmem:[#allocation3 + $0x18] sm:$0xff] %vm566_vm0, %v590_v34  ;;  %v3499_v39 = vpop.f32.mrb[64].mxu1 }
 0x18b   : > { %609 = vst.msk [vmem:[#allocation3 + $0x10] sm:$0xff] %vm566_vm0, %v588_v36  ;;  %3593 = vmatprep.subr.bf16.mxu1 %v2129_v38  ;;  %v4695_v42 = vadd.f32 %v3499_v39, %v4501_v22  ;;  %v1008_v35 = vpop.f32.mrb[65].mxu1 }
 0x18c   : > { %3594 = vmatpush3.bf16.msra.mxu1 %v2129_v38  ;;  %v4698_v43 = vadd.f32 %v4501_v22, %v1008_v35  ;;  %v3500_v25 = vpop.f32.mrb[66].mxu1 }
 0x18d   : > { %3595 = vmatprep.subr.bf16.mxu1 %v2130_v40  ;;  %v4701_v29 = vadd.f32 %v3500_v25, %v4501_v22  ;;  %v1011_v33 = vpop.f32.mrb[67].mxu1 }
 0x18e   : > { %v4704_v46 = vadd.f32 %v4501_v22, %v1011_v33 }
 0x18f   : > { %v1096_v47 = vpack.c.bf16 %v4701_v29, %v4695_v42 }
 0x190   : > { %3558 = vmatmul.mubr.msk.bf16.gmra.mrb[28].mxu0 %vm566_vm0, %v1086_v37  ;;  %3596 = vmatpush3.bf16.msra.mxu1 %v2130_v40  ;;  %v1095_v48 = vpack.c.bf16 %v4704_v46, %v4698_v43 }
 0x191   : > { %3561 = vmatprep.mubr.msk.bf16.mxu0 %vm566_vm0, %v1087_v57  ;;  %v594_v51 = vpop.permute.xlu1 %593  ;;  %v2132_v41 = vld [vmem:[#allocation3 + $0x18] sm:$0xff] }
 0x192   : > { %v2131_v52 = vld [vmem:[#allocation3 + $0x10] sm:$0xff]  ;;  %v592_v44 = vpop.permute.xlu0 %591  ;;  %612 = vst.msk [vmem:[#allocation3 + $0x28] sm:$0xff] %vm566_vm0, %v594_v51  ;;  %v3503_v55 = vpop.f32.mrb[68].mxu1 }
 0x193   : > { %3597 = vmatprep.subr.bf16.mxu1 %v2131_v52  ;;  %611 = vst.msk [vmem:[#allocation3 + $0x20] sm:$0xff] %vm566_vm0, %v592_v44  ;;  %v1033_v45 = vadd.f32 %v3503_v55, %v4501_v22  ;;  %v1024_v50 = vpop.f32.mrb[69].mxu1 }
 0x194   : > { %3598 = vmatpush3.bf16.msra.mxu1 %v2131_v52  ;;  %v1025_v37 = vadd.f32 %v4501_v22, %v1024_v50  ;;  %v3504_v58 = vpop.f32.mrb[70].mxu1 }
 0x195   : > { %3599 = vmatprep.subr.bf16.mxu1 %v2132_v41  ;;  %v1036_v56 = vadd.f32 %v3504_v58, %v4501_v22  ;;  %v1027_v60 = vpop.f32.mrb[71].mxu1 }
 0x196   : > { %v1028_v49 = vadd.f32 %v4501_v22, %v1027_v60 }
 0x197   : > { %v1098_v57 = vpack.c.bf16 %v1036_v56, %v1033_v45 }
 0x198   : > { %3562 = vmatmul.mubr.msk.bf16.gmra.mrb[32].mxu0 %vm566_vm0, %v1088_v53  ;;  %3600 = vmatpush3.bf16.msra.mxu1 %v2132_v41  ;;  %v1097_v62 = vpack.c.bf16 %v1028_v49, %v1025_v37 }
 0x199   : > { %3565 = vmatprep.mubr.msk.bf16.mxu0 %vm566_vm0, %v1089_v6  ;;  %v2134_v3 = vld [vmem:[#allocation3 + $0x28] sm:$0xff] }
 0x19a   : > { %v2133_v0 = vld [vmem:[#allocation3 + $0x20] sm:$0xff]  ;;  %v596_v61 = vpop.permute.xlu0 %595  ;;  %v3507_v7 = vpop.f32.mrb[72].mxu1 }
 0x19b   : > { %3601 = vmatprep.subr.bf16.mxu1 %v2133_v0  ;;  %613 = vst.msk [vmem:[#allocation3 + $0x30] sm:$0xff] %vm566_vm0, %v596_v61  ;;  %v1049_v9 = vadd.f32 %v3507_v7, %v4501_v22  ;;  %v1040_v11 = vpop.f32.mrb[73].mxu1 }
 0x19c   : > { %3602 = vmatpush3.bf16.msra.mxu1 %v2133_v0  ;;  %v1041_v54 = vadd.f32 %v4501_v22, %v1040_v11  ;;  %v3508_v59 = vpop.f32.mrb[74].mxu1 }
 0x19d   : > { %3603 = vmatprep.subr.bf16.mxu1 %v2134_v3  ;;  %v1052_v53 = vadd.f32 %v3508_v59, %v4501_v22  ;;  %v1043_v2 = vpop.f32.mrb[75].mxu1 }
 0x19e   : > { %v1044_v1 = vadd.f32 %v4501_v22, %v1043_v2 }
 0x19f   : > { %v1100_v6 = vpack.c.bf16 %v1052_v53, %v1049_v9 }
 0x1a0   : > { %3566 = vmatmul.mubr.msk.bf16.gmra.mrb[36].mxu0 %vm566_vm0, %v1090_v4  ;;  %3604 = vmatpush3.bf16.msra.mxu1 %v2134_v3  ;;  %v1099_v13 = vpack.c.bf16 %v1044_v1, %v1041_v54 }
 0x1a1   : > { %3569 = vmatprep.mubr.msk.bf16.mxu0 %vm566_vm0, %v1091_v16 }
 0x1a2   : > { %v2135_v17 = vld [vmem:[#allocation3 + $0x30] sm:$0xff]  ;;  %v3511_v19 = vpop.f32.mrb[76].mxu1 }
 0x1a3   : > { %3605 = vmatprep.subr.bf16.mxu1 %v2135_v17  ;;  %v1065_v20 = vadd.f32 %v3511_v19, %v4501_v22  ;;  %v1056_v23 = vpop.f32.mrb[77].mxu1 }
 0x1a4   : > { %3606 = vmatpush3.bf16.msra.mxu1 %v2135_v17  ;;  %v1057_v26 = vadd.f32 %v4501_v22, %v1056_v23  ;;  %v3512_v28 = vpop.f32.mrb[78].mxu1 }
 0x1a5   : > { %v1068_v63 = vadd.f32 %v3512_v28, %v4501_v22  ;;  %v1059_v5 = vpop.f32.mrb[79].mxu1 }
 0x1a6   : > { %v1060_v4 = vadd.f32 %v4501_v22, %v1059_v5 }
 0x1a7   : > { %v1102_v34 = vpack.c.bf16 %v1068_v63, %v1065_v20 }
 0x1a8   : > { %3570 = vmatmul.mubr.msk.bf16.gmra.mrb[40].mxu0 %vm566_vm0, %v1092_v15  ;;  %v1101_v10 = vpack.c.bf16 %v1060_v4, %v1057_v26 }
 0x1a9   : > { %3573 = vmatprep.mubr.msk.bf16.mxu0 %vm566_vm0, %v1093_v32 }
 0x1b0   : > { %3574 = vmatmul.mubr.msk.bf16.gmra.mrb[44].mxu0 %vm566_vm0, %v1094_v31 }
 0x1b1   : > { %3577 = vmatprep.mubr.msk.bf16.mxu0 %vm566_vm0, %v1095_v48 }
 0x1b8   : > { %3578 = vmatmul.mubr.msk.bf16.gmra.mrb[48].mxu0 %vm566_vm0, %v1096_v47 }
 0x1b9   : > { %3581 = vmatprep.mubr.msk.bf16.mxu0 %vm566_vm0, %v1097_v62 }
 0x1c0   : > { %3582 = vmatmul.mubr.msk.bf16.gmra.mrb[52].mxu0 %vm566_vm0, %v1098_v57 }
 0x1c1   : > { %3585 = vmatprep.mubr.msk.bf16.mxu0 %vm566_vm0, %v1099_v13 }
 0x1c8   : > { %3586 = vmatmul.mubr.msk.bf16.gmra.mrb[56].mxu0 %vm566_vm0, %v1100_v6 }
 0x1c9   : > { %3589 = vmatprep.mubr.msk.bf16.mxu0 %vm566_vm0, %v1101_v10 }
 0x1d0   : > { %3590 = vmatmul.mubr.msk.bf16.gmra.mrb[60].mxu0 %vm566_vm0, %v1102_v34 }
 0x22b   : > { %v4772_v22 = vpop.f32.mrb[0].mxu0 }
 0x22c   : > { %1525 = vmax.xlane.f32.xlu1 %v4772_v22  ;;  %v4775_v8 = vpop.f32.mrb[1].mxu0 }
 0x22d   : > { %1521 = vmax.xlane.f32.xlu0 %v4775_v8  ;;  %v4778_v12 = vpop.f32.mrb[2].mxu0 }
 0x22e   : > { %v4780_v14 = vpop.f32.mrb[3].mxu0 }
 0x230   : > { %1527 = vmax.xlane.f32.xlu1 %v4778_v12 }
 0x231   : > { %1523 = vmax.xlane.f32.xlu0 %v4780_v14 }
 0x233   : > { %v4784_v15 = vpop.f32.mrb[4].mxu0 }
 0x234   : > { %v4786_v16 = vpop.f32.mrb[5].mxu0 }
 0x235   : > { %1533 = vmax.xlane.f32.xlu0 %v4784_v15  ;;  %v4789_v21 = vpop.f32.mrb[6].mxu0 }
 0x236   : > { %1535 = vmax.xlane.f32.xlu1 %v4789_v21  ;;  %v4792_v24 = vpop.f32.mrb[7].mxu0 }
 0x239   : > { %1529 = vmax.xlane.f32.xlu0 %v4786_v16 }
 0x23a   : > { %1531 = vmax.xlane.f32.xlu1 %v4792_v24 }
 0x23b   : > { %v4796_v27 = vpop.f32.mrb[8].mxu0 }
 0x23c   : > { %v4798_v30 = vpop.f32.mrb[9].mxu0 }
 0x23d   : > { %1541 = vmax.xlane.f32.xlu0 %v4796_v27  ;;  %v4801_v31 = vpop.f32.mrb[10].mxu0 }
 0x23e   : > { %1543 = vmax.xlane.f32.xlu1 %v4801_v31  ;;  %v4804_v32 = vpop.f32.mrb[11].mxu0 }
 0x241   : > { %1537 = vmax.xlane.f32.xlu0 %v4798_v30 }
 0x242   : > { %1539 = vmax.xlane.f32.xlu1 %v4804_v32 }
 0x243   : > { %v4808_v36 = vpop.f32.mrb[12].mxu0 }
 0x244   : > { %v4810_v38 = vpop.f32.mrb[13].mxu0 }
 0x245   : > { %1549 = vmax.xlane.f32.xlu0 %v4808_v36  ;;  %v4813_v39 = vpop.f32.mrb[14].mxu0 }
 0x246   : > { %1551 = vmax.xlane.f32.xlu1 %v4813_v39  ;;  %v4816_v42 = vpop.f32.mrb[15].mxu0 }
 0x249   : > { %1545 = vmax.xlane.f32.xlu0 %v4810_v38 }
 0x24a   : > { %1547 = vmax.xlane.f32.xlu1 %v4816_v42 }
 0x24b   : > { %v4820_v35 = vpop.f32.mrb[16].mxu0 }
 0x24c   : > { %v4822_v40 = vpop.f32.mrb[17].mxu0 }
 0x24d   : > { %1557 = vmax.xlane.f32.xlu0 %v4820_v35  ;;  %v4825_v43 = vpop.f32.mrb[18].mxu0 }
 0x24e   : > { %1559 = vmax.xlane.f32.xlu1 %v4825_v43  ;;  %v4828_v25 = vpop.f32.mrb[19].mxu0 }
 0x251   : > { %1553 = vmax.xlane.f32.xlu0 %v4822_v40 }
 0x252   : > { %1555 = vmax.xlane.f32.xlu1 %v4828_v25 }
 0x253   : > { %v4832_v29 = vpop.f32.mrb[20].mxu0 }
 0x254   : > { %v4834_v33 = vpop.f32.mrb[21].mxu0 }
 0x255   : > { %1565 = vmax.xlane.f32.xlu0 %v4832_v29  ;;  %v4837_v46 = vpop.f32.mrb[22].mxu0 }
 0x256   : > { %1567 = vmax.xlane.f32.xlu1 %v4837_v46  ;;  %v4840_v47 = vpop.f32.mrb[23].mxu0 }
 0x259   : > { %1561 = vmax.xlane.f32.xlu0 %v4834_v33 }
 0x25a   : > { %1563 = vmax.xlane.f32.xlu1 %v4840_v47 }
 0x25b   : > { %v4844_v48 = vpop.f32.mrb[24].mxu0 }
 0x25c   : > { %v4846_v51 = vpop.f32.mrb[25].mxu0 }
 0x25d   : > { %1573 = vmax.xlane.f32.xlu0 %v4844_v48  ;;  %v4849_v52 = vpop.f32.mrb[26].mxu0 }
 0x25e   : > { %1575 = vmax.xlane.f32.xlu1 %v4849_v52  ;;  %v4852_v41 = vpop.f32.mrb[27].mxu0 }
 0x261   : > { %1569 = vmax.xlane.f32.xlu0 %v4846_v51 }
 0x262   : > { %1571 = vmax.xlane.f32.xlu1 %v4852_v41 }
 0x263   : > { %v4856_v44 = vpop.f32.mrb[28].mxu0 }
 0x264   : > { %v4858_v55 = vpop.f32.mrb[29].mxu0 }
 0x265   : > { %1581 = vmax.xlane.f32.xlu0 %v4856_v44  ;;  %v4861_v45 = vpop.f32.mrb[30].mxu0 }
 0x266   : > { %1583 = vmax.xlane.f32.xlu1 %v4861_v45  ;;  %v4864_v50 = vpop.f32.mrb[31].mxu0 }
 0x269   : > { %1577 = vmax.xlane.f32.xlu0 %v4858_v55 }
 0x26a   : > { %1579 = vmax.xlane.f32.xlu1 %v4864_v50 }
 0x26b   : > { %v4868_v37 = vpop.f32.mrb[32].mxu0 }
 0x26c   : > { %v4870_v58 = vpop.f32.mrb[33].mxu0 }
 0x26d   : > { %1589 = vmax.xlane.f32.xlu0 %v4868_v37  ;;  %v4873_v56 = vpop.f32.mrb[34].mxu0 }
 0x26e   : > { %5690 = vst [vmem:[#allocation7_spill] sm:$0xff] %v4873_v56  ;;  %1591 = vmax.xlane.f32.xlu1 %v4873_v56  ;;  %v4876_v60 = vpop.f32.mrb[35].mxu0 }
 0x271   : > { %1585 = vmax.xlane.f32.xlu0 %v4870_v58 }
 0x272   : > { %1587 = vmax.xlane.f32.xlu1 %v4876_v60 }
 0x273   : > { %v4880_v49 = vpop.f32.mrb[36].mxu0 }
 0x274   : > { %v4882_v57 = vpop.f32.mrb[37].mxu0 }
 0x275   : > { %1597 = vmax.xlane.f32.xlu0 %v4880_v49  ;;  %v4885_v62 = vpop.f32.mrb[38].mxu0 }
 0x276   : > { %5691 = vst [vmem:[#allocation8_spill] sm:$0xff] %v4885_v62  ;;  %1599 = vmax.xlane.f32.xlu1 %v4885_v62  ;;  %v4888_v0 = vpop.f32.mrb[39].mxu0 }
 0x277   : > { %5692 = vst [vmem:[#allocation9_spill] sm:$0xff] %v4888_v0 }
 0x279   : > { %1593 = vmax.xlane.f32.xlu0 %v4882_v57 }
 0x27a   : > { %1595 = vmax.xlane.f32.xlu1 %v4888_v0 }
 0x27b   : > { %v4892_v3 = vpop.f32.mrb[40].mxu0 }
 0x27c   : > { %5693 = vst [vmem:[#allocation10_spill] sm:$0xff] %v4892_v3  ;;  %v4894_v61 = vpop.f32.mrb[41].mxu0 }
 0x27d   : > { %1605 = vmax.xlane.f32.xlu0 %v4892_v3  ;;  %v4897_v7 = vpop.f32.mrb[42].mxu0 }
 0x27e   : > { %5694 = vst [vmem:[#allocation11_spill] sm:$0xff] %v4897_v7  ;;  %1601 = vmax.xlane.f32.xlu1 %v4894_v61  ;;  %v4900_v9 = vpop.f32.mrb[43].mxu0 }
 0x27f   : > { %5695 = vst [vmem:[#allocation12_spill] sm:$0xff] %v4900_v9 }
 0x282   : > { %1607 = vmax.xlane.f32.xlu1 %v4897_v7 }
 0x283   : > { %v4903_v11 = vpop.f32.mrb[44].mxu0 }
 0x284   : > { %5696 = vst [vmem:[#allocation13_spill] sm:$0xff] %v4903_v11  ;;  %v4905_v54 = vpop.f32.mrb[45].mxu0 }
 0x285   : > { %5697 = vst [vmem:[#allocation14_spill] sm:$0xff] %v4905_v54  ;;  %v4907_v59 = vpop.f32.mrb[46].mxu0 }
 0x286   : > { %5698 = vst [vmem:[#allocation15_spill] sm:$0xff] %v4907_v59  ;;  %1603 = vmax.xlane.f32.xlu1 %v4900_v9  ;;  %1615 = vmax.xlane.f32.xlu0 %v4907_v59  ;;  %v4911_v53 = vpop.f32.mrb[47].mxu0 }
 0x287   : > { %5699 = vst [vmem:[#allocation16_spill] sm:$0xff] %v4911_v53 }
 0x28a   : > { %1613 = vmax.xlane.f32.xlu1 %v4903_v11 }
 0x28b   : > { %v4914_v2 = vpop.f32.mrb[48].mxu0 }
 0x28c   : > { %5700 = vst [vmem:[#allocation17_spill] sm:$0xff] %v4914_v2  ;;  %1621 = vmax.xlane.f32.xlu0 %v4914_v2  ;;  %v4917_v1 = vpop.f32.mrb[49].mxu0 }
 0x28d   : > { %5701 = vst [vmem:[#allocation18_spill] sm:$0xff] %v4917_v1  ;;  %v4919_v6 = vpop.f32.mrb[50].mxu0 }
 0x28e   : > { %5702 = vst [vmem:[#allocation19_spill] sm:$0xff] %v4919_v6  ;;  %1609 = vmax.xlane.f32.xlu1 %v4905_v54  ;;  %v4922_v13 = vpop.f32.mrb[51].mxu0 }
 0x28f   : > { %5703 = vst [vmem:[#allocation20_spill] sm:$0xff] %v4922_v13 }
 0x290   : > { %1623 = vmax.xlane.f32.xlu0 %v4919_v6 }
 0x292   : > { %1611 = vmax.xlane.f32.xlu1 %v4911_v53 }
 0x293   : > { %v4926_v17 = vpop.f32.mrb[52].mxu0 }
 0x294   : > { %v4928_v19 = vpop.f32.mrb[53].mxu0 }
 0x295   : > { %5704 = vst [vmem:[#allocation21_spill] sm:$0xff] %v4928_v19  ;;  %v4930_v20 = vpop.f32.mrb[54].mxu0 }
 0x296   : > { %1617 = vmax.xlane.f32.xlu1 %v4917_v1  ;;  %v4933_v23 = vpop.f32.mrb[55].mxu0 }
 0x297   : > { %5705 = vst [vmem:[#allocation22_spill] sm:$0xff] %v4933_v23 }
 0x29a   : > { %1619 = vmax.xlane.f32.xlu1 %v4922_v13 }
 0x29b   : > { %v4936_v26 = vpop.f32.mrb[56].mxu0 }
 0x29c   : > { %v4938_v28 = vpop.f32.mrb[57].mxu0 }
 0x29d   : > { %v4940_v63 = vpop.f32.mrb[58].mxu0 }
 0x29e   : > { %5706 = vst [vmem:[#allocation23_spill] sm:$0xff] %v4940_v63  ;;  %1625 = vmax.xlane.f32.xlu1 %v4928_v19  ;;  %v4943_v5 = vpop.f32.mrb[59].mxu0 }
 0x2a2   : > { %1627 = vmax.xlane.f32.xlu1 %v4933_v23 }
 0x2a3   : > { %v4946_v4 = vpop.f32.mrb[60].mxu0 }
 0x2a4   : > { %v4948_v34 = vpop.f32.mrb[61].mxu0 }
 0x2a5   : > { %v4950_v10 = vpop.f32.mrb[62].mxu0 }
 0x2a6   : > { %v4952_v6 = vpop.f32.mrb[63].mxu0 }
 0x2a7   : > { %5707 = vst [vmem:[#allocation24_spill] sm:$0xff] %v4952_v6 }
 0x2b9   : > { %v1526_v13 = vpop.xlane.xlu1 %1525 }
 0x2ba   : > { %v1651_v59 = vsub.f32 %v4772_v22, %v1526_v13  ;;  %v1522_v53 = vpop.xlane.xlu0 %1521 }
 0x2bb   : > { %v1649_v7 = vsub.f32 %v4775_v8, %v1522_v53 }
 0x2bc   : > { %v1717_v2 = vmul.f32 1.442695, %v1651_v59 }
 0x2bd   : > { %v1713_v19 = vmul.f32 1.442695, %v1649_v7  ;;  %v1528_v9 = vpop.xlane.xlu1 %1527 }
 0x2be   : > { %3839 = vpow2.f32 %v1717_v2  ;;  %v1652_v23 = vsub.f32 %v4778_v12, %v1528_v9  ;;  %v1524_v1 = vpop.xlane.xlu0 %1523 }
 0x2bf   : > { %3841 = vpow2.f32 %v1713_v19  ;;  %v1650_v62 = vsub.f32 %v4780_v14, %v1524_v1 }
 0x2c0   : > { %v1719_v11 = vmul.f32 1.442695, %v1652_v23 }
 0x2c1   : > { %v1715_v54 = vmul.f32 1.442695, %v1650_v62 }
 0x2c2   : > { %3843 = vpow2.f32 %v1719_v11  ;;  %v1534_v0 = vpop.xlane.xlu0 %1533 }
 0x2c3   : > { %v1655_v56 = vsub.f32 %v4784_v15, %v1534_v0  ;;  %v1536_v22 = vpop.xlane.xlu1 %1535  ;;  %3845 = vpow2.f32 %v1715_v54 }
 0x2c4   : > { %v1656_v8 = vsub.f32 %v4789_v21, %v1536_v22 }
 0x2c5   : > { %v1725_v13 = vmul.f32 1.442695, %v1655_v56 }
 0x2c6   : > { %v1530_v3 = vpop.xlane.xlu0 %1529  ;;  %v1727_v15 = vmul.f32 1.442695, %v1656_v8 }
 0x2c7   : > { %v1653_v7 = vsub.f32 %v4786_v16, %v1530_v3  ;;  %v1532_v59 = vpop.xlane.xlu1 %1531  ;;  %3847 = vpow2.f32 %v1725_v13 }
 0x2c8   : > { %v4961_v12 = vpop.eup %3839  ;;  %v1654_v56 = vsub.f32 %v4792_v24, %v1532_v59 }
 0x2c9   : > { %v4963_v9 = vpop.eup %3841  ;;  %v1721_v14 = vmul.f32 1.442695, %v1653_v7  ;;  %1845 = vadd.xlane.f32.xlu0 %v4961_v12 }
 0x2ca   : > { %v1542_v62 = vpop.xlane.xlu0 %1541  ;;  %1841 = vadd.xlane.f32.xlu1 %v4963_v9  ;;  %v1723_v16 = vmul.f32 1.442695, %v1654_v56 }
 0x2cb   : > { %3849 = vpow2.f32 %v1721_v14  ;;  %v1544_v0 = vpop.xlane.xlu1 %1543  ;;  %v1659_v3 = vsub.f32 %v4796_v27, %v1542_v62 }
 0x2cc   : > { %v4968_v21 = vpop.eup %3843  ;;  %3851 = vpow2.f32 %v1727_v15  ;;  %v1660_v27 = vsub.f32 %v4801_v31, %v1544_v0 }
 0x2cd   : > { %v4972_v53 = vpop.eup %3845  ;;  %3853 = vpow2.f32 %v1723_v16  ;;  %v1733_v2 = vmul.f32 1.442695, %v1659_v3 }
 0x2ce   : > { %1847 = vadd.xlane.f32.xlu1 %v4968_v21  ;;  %v1538_v54 = vpop.xlane.xlu0 %1537 }
 0x2cf   : > { %v1540_v11 = vpop.xlane.xlu1 %1539  ;;  %v1657_v1 = vsub.f32 %v4798_v30, %v1538_v54  ;;  %3855 = vpow2.f32 %v1733_v2  ;;  %v1735_v30 = vmul.f32 1.442695, %v1660_v27 }
 0x2d0   : > { %v1658_v0 = vsub.f32 %v4804_v32, %v1540_v11 }
 0x2d1   : > { %v4976_v19 = vpop.eup %3847  ;;  %v1729_v13 = vmul.f32 1.442695, %v1657_v1 }
 0x2d2   : > { %1843 = vadd.xlane.f32.xlu1 %v4972_v53  ;;  %v1550_v22 = vpop.xlane.xlu0 %1549  ;;  %v1731_v54 = vmul.f32 1.442695, %v1658_v0 }
 0x2d3   : > { %v1552_v24 = vpop.xlane.xlu1 %1551  ;;  %3857 = vpow2.f32 %v1729_v13  ;;  %v1663_v2 = vsub.f32 %v4808_v36, %v1550_v22 }
 0x2d4   : > { %3859 = vpow2.f32 %v1735_v30  ;;  %v1664_v36 = vsub.f32 %v4813_v39, %v1552_v24 }
 0x2d5   : > { %v4978_v23 = vpop.eup %3849  ;;  %3861 = vpow2.f32 %v1731_v54  ;;  %v1741_v32 = vmul.f32 1.442695, %v1663_v2 }
 0x2d6   : > { %1849 = vadd.xlane.f32.xlu0 %v4978_v23  ;;  %1853 = vadd.xlane.f32.xlu1 %v4976_v19  ;;  %v4983_v7 = vpop.eup %3851  ;;  %v1546_v14 = vpop.xlane.xlu0 %1545 }
 0x2d7   : > { %v1548_v8 = vpop.xlane.xlu1 %1547  ;;  %v4989_v62 = vpop.eup %3853  ;;  %v1661_v11 = vsub.f32 %v4810_v38, %v1546_v14  ;;  %3863 = vpow2.f32 %v1741_v32 }
 0x2d8   : > { %v1662_v54 = vsub.f32 %v4816_v42, %v1548_v8 }
 0x2d9   : > { %v4993_v15 = vpop.eup %3855  ;;  %v1737_v22 = vmul.f32 1.442695, %v1661_v11 }
 0x2da   : > { %1629 = vmax.xlane.f32.xlu0 %v4926_v17  ;;  %1855 = vadd.xlane.f32.xlu1 %v4983_v7  ;;  %5708 = vst [vmem:[#allocation25_spill] sm:$0xff] %v4993_v15  ;;  %v1558_v56 = vpop.xlane.xlu0 %1557  ;;  %v1739_v32 = vmul.f32 1.442695, %v1662_v54 }
 0x2db   : > { %v4987_v59 = vpop.xlane.xlu1 %1559  ;;  %3865 = vpow2.f32 %v1737_v22  ;;  %v1667_v39 = vsub.f32 %v4820_v35, %v1558_v56 }
 0x2dd   : > { %v5000_v3 = vpop.eup %3857  ;;  %v1749_v42 = vmul.f32 1.442695, %v1667_v39 }
 0x2de   : > { %1631 = vmax.xlane.f32.xlu0 %v4930_v20  ;;  %1851 = vadd.xlane.f32.xlu1 %v4989_v62  ;;  %v1554_v27 = vpop.xlane.xlu0 %1553  ;;  %v5007_v13 = vpop.eup %3859 }
 0x2df   : > { %v1556_v31 = vpop.xlane.xlu1 %1555  ;;  %5709 = vst [vmem:[#allocation26_spill] sm:$0xff] %v5007_v13  ;;  %v5022_v14 = vpop.eup %3861  ;;  %v1665_v8 = vsub.f32 %v4822_v40, %v1554_v27 }
 0x2e0   : > { %v1666_v56 = vsub.f32 %v4828_v25, %v1556_v31 }
 0x2e1   : > { %v5028_v11 = vpop.eup %3863  ;;  %v1745_v35 = vmul.f32 1.442695, %v1665_v8 }
 0x2e2   : > { %1861 = vadd.xlane.f32.xlu1 %v4993_v15  ;;  %1633 = vmax.xlane.f32.xlu0 %v4938_v28  ;;  %v1566_v15 = vpop.xlane.xlu0 %1565  ;;  %5710 = vst [vmem:[#allocation27_spill] sm:$0xff] %v5028_v11  ;;  %v1747_v40 = vmul.f32 1.442695, %v1666_v56 }
 0x2e3   : > { %v4998_v16 = vpop.xlane.xlu1 %1567  ;;  %v1671_v31 = vsub.f32 %v4832_v29, %v1566_v15 }
 0x2e6   : > { %1857 = vadd.xlane.f32.xlu1 %v5000_v3  ;;  %1637 = vmax.xlane.f32.xlu0 %v4936_v26  ;;  %v1562_v38 = vpop.xlane.xlu0 %1561 }
 0x2e7   : > { %v5005_v1 = vpop.xlane.xlu1 %1563  ;;  %v1669_v39 = vsub.f32 %v4834_v33, %v1562_v38  ;;  %v1668_v38 = vsub.f32 %v4825_v43, %v4987_v59 }
 0x2e8   : > { %v1670_v43 = vsub.f32 %v4840_v47, %v5005_v1 }
 0x2e9   : > { %v1753_v8 = vmul.f32 1.442695, %v1669_v39  ;;  %v1751_v39 = vmul.f32 1.442695, %v1668_v38 }
 0x2ea   : > { %1863 = vadd.xlane.f32.xlu1 %v5007_v13  ;;  %1639 = vmax.xlane.f32.xlu0 %v4940_v63  ;;  %v1743_v13 = vmul.f32 1.442695, %v1664_v36 }
 0x2eb   : > { %v5012_v30 = vpop.xlane.xlu1 %1575 }
 0x2ec   : > { %3867 = vpow2.f32 %v1743_v13  ;;  %v5036_v13 = vpop.eup %3865 }
 0x2ed   : > { %3869 = vpow2.f32 %v1739_v32 }
 0x2ee   : > { %1641 = vmax.xlane.f32.xlu0 %v4948_v34  ;;  %3871 = vpow2.f32 %v1749_v42 }
 0x2ef   : > { %v5016_v0 = vpop.xlane.xlu1 %1571  ;;  %3873 = vpow2.f32 %v1745_v35 }
 0x2f0   : > { %3875 = vpow2.f32 %v1747_v40 }
 0x2f1   : > { %3877 = vpow2.f32 %v1753_v8  ;;  %v1672_v8 = vsub.f32 %v4837_v46, %v4998_v16 }
 0x2f2   : > { %1643 = vmax.xlane.f32.xlu0 %v4952_v6  ;;  %v1574_v6 = vpop.xlane.xlu0 %1573 }
 0x2f3   : > { %v5020_v2 = vpop.xlane.xlu1 %1583  ;;  %v1675_v29 = vsub.f32 %v4844_v48, %v1574_v6  ;;  %v1759_v38 = vmul.f32 1.442695, %v1672_v8 }
 0x2f6   : > { %1859 = vadd.xlane.f32.xlu0 %v5022_v14  ;;  %v1570_v22 = vpop.xlane.xlu0 %1569  ;;  %v5040_v54 = vpop.eup %3867 }
 0x2f7   : > { %v5026_v24 = vpop.xlane.xlu1 %1579  ;;  %v1673_v33 = vsub.f32 %v4846_v51, %v1570_v22 }
 0x2f9   : > { %v1761_v15 = vmul.f32 1.442695, %v1673_v33  ;;  %v1755_v33 = vmul.f32 1.442695, %v1670_v43 }
 0x2fa   : > { %1869 = vadd.xlane.f32.xlu0 %v5028_v11  ;;  %v1582_v27 = vpop.xlane.xlu0 %1581  ;;  %v1757_v11 = vmul.f32 1.442695, %v1671_v31  ;;  %v1765_v31 = vmul.f32 1.442695, %v1675_v29 }
 0x2fb   : > { %597 = vrot.lane.b32.xlu1 %v4491_v18, %s4239_s8  ;;  %v5034_v36 = vpop.xlane.xlu1 %1591  ;;  %v5045_v18 = vpop.eup %3869  ;;  %v1679_v48 = vsub.f32 %v4856_v44, %v1582_v27  ;;  %v1674_v44 = vsub.f32 %v4852_v41, %v5016_v0  ;;  %s4163_s8 = sshll.u32 %s4240_s18, 4  ;;  %s4164_s8 = int_to_ptr.vmem [resolvable:$false] %s4163_s8 }
 0x2fc   : > { %5711 = vst [vmem:[#allocation28_spill] sm:$0xff] %v5045_v18  ;;  %v5051_v25 = vpop.eup %3871  ;;  %3879 = vpow2.f32 %v1757_v11  ;;  %s4165_s21 = scalar_lea.vmem %s4164_s8, 16384  ;;  %p4166_p1 = scmp.lt.s32.totalorder %s5590_s10, %s4164_s8 }
 0x2fd   : > { %5712 = vst [vmem:[#allocation29_spill] sm:$0xff] %v5051_v25  ;;  %v5055_v35 = vpop.eup %3873  ;;  %3881 = vpow2.f32 %v1761_v15  ;;  %v1773_v47 = vmul.f32 1.442695, %v1679_v48  ;;  %p4167_p2 = scmp.lt.s32.totalorder %s4165_s21, %s4159_s17 }
 0x2fe   : > { %1865 = vadd.xlane.f32.xlu0 %v5036_v13  ;;  %v1578_v63 = vpop.xlane.xlu0 %1577  ;;  %v5063_v40 = vpop.eup %3875  ;;  %3883 = vpow2.f32 %v1751_v39  ;;  %v1763_v39 = vmul.f32 1.442695, %v1674_v44  ;;  %v5713_v44 = vld [vmem:[#allocation10_spill] sm:$0xff] }
 0x2ff   : > { %v5042_v32 = vpop.xlane.xlu1 %1587  ;;  %v1677_v51 = vsub.f32 %v4858_v55, %v1578_v63  ;;  %v5073_v22 = vpop.eup %3877  ;;  %3885 = vpow2.f32 %v1765_v31  ;;  %p4168_p3 = por %p4167_p2, %p4166_p1 }
 0x301   : > { %v1769_v6 = vmul.f32 1.442695, %v1677_v51  ;;  %p4169_p5 = pnand %p4168_p3, %p4162_p0 }
 0x302   : > { %1871 = vadd.xlane.f32.xlu0 %v5040_v54 }
 0x303   : > { %v5049_v42 = vpop.xlane.xlu1 %1599  ;;  %3887 = vpow2.f32 %v1769_v6 }
 0x304   : > { %3889 = vpow2.f32 %v1755_v33 }
 0x305   : > { %3891 = vpow2.f32 %v1773_v47 }
 0x306   : > { %1867 = vadd.xlane.f32.xlu0 %v5045_v18  ;;  %v5081_v55 = vpop.eup %3879  ;;  %3893 = vpow2.f32 %v1759_v38 }
 0x307   : > { %v5057_v56 = vpop.xlane.xlu1 %1595  ;;  %v5090_v46 = vpop.eup %3881 }
 0x308   : > { %v5092_v16 = vpop.eup %3883 }
 0x309   : > { %v5099_v0 = vpop.eup %3885 }
 0x30a   : > { %1877 = vadd.xlane.f32.xlu0 %v5051_v25  ;;  %v1590_v25 = vpop.xlane.xlu0 %1589 }
 0x30b   : > { %v5067_v18 = vpop.xlane.xlu1 %1601  ;;  %v1683_v29 = vsub.f32 %v4868_v37, %v1590_v25  ;;  %v1678_v25 = vsub.f32 %v4864_v50, %v5026_v24 }
 0x30d   : > { %v1781_v51 = vmul.f32 1.442695, %v1683_v29  ;;  %v1771_v6 = vmul.f32 1.442695, %v1678_v25 }
 0x30e   : > { %1873 = vadd.xlane.f32.xlu0 %v5055_v35  ;;  %v1586_v59 = vpop.xlane.xlu0 %1585 }
 0x30f   : > { %v5075_v11 = vpop.xlane.xlu1 %1607  ;;  %v1681_v1 = vsub.f32 %v4870_v58, %v1586_v59  ;;  %v1676_v58 = vsub.f32 %v4849_v52, %v5012_v30  ;;  %v5108_v52 = vpop.eup %3887 }
 0x310   : > { %v5110_v30 = vpop.eup %3889 }
 0x311   : > { %v1777_v15 = vmul.f32 1.442695, %v1681_v1  ;;  %v1767_v37 = vmul.f32 1.442695, %v1676_v58  ;;  %v5117_v33 = vpop.eup %3891 }
 0x312   : > { %1875 = vadd.xlane.f32.xlu0 %v5063_v40  ;;  %v1598_v63 = vpop.xlane.xlu0 %1597  ;;  %v5119_v50 = vpop.eup %3893 }
 0x313   : > { %v5088_v27 = vpop.xlane.xlu1 %1603  ;;  %3895 = vpow2.f32 %v1777_v15  ;;  %v1687_v59 = vsub.f32 %v4880_v49, %v1598_v63  ;;  %v1689_v49 = vsub.f32 %v4894_v61, %v5067_v18  ;;  %v5714_v18 = vld [vmem:[#allocation7_spill] sm:$0xff] }
 0x314   : > { %3897 = vpow2.f32 %v1763_v39  ;;  %v1684_v15 = vsub.f32 %v5714_v18, %v5034_v36 }
 0x315   : > { %3899 = vpow2.f32 %v1781_v51  ;;  %v1789_v24 = vmul.f32 1.442695, %v1687_v59  ;;  %v1793_v61 = vmul.f32 1.442695, %v1689_v49 }
 0x316   : > { %1645 = vmax.xlane.f32.xlu0 %v4946_v4  ;;  %v1594_v41 = vpop.xlane.xlu0 %1593  ;;  %3901 = vpow2.f32 %v1767_v37  ;;  %v5716_v37 = vld [vmem:[#allocation9_spill] sm:$0xff] }
 0x317   : > { %v5101_v31 = vpop.xlane.xlu1 %1613  ;;  %v1685_v43 = vsub.f32 %v4882_v57, %v1594_v41  ;;  %v1680_v57 = vsub.f32 %v4861_v45, %v5020_v2  ;;  %v1682_v45 = vsub.f32 %v4876_v60, %v5042_v32  ;;  %v5715_v41 = vld [vmem:[#allocation14_spill] sm:$0xff]  ;;  %v1686_v25 = vsub.f32 %v5716_v37, %v5057_v56 }
 0x319   : > { %v1785_v48 = vmul.f32 1.442695, %v1685_v43  ;;  %v1775_v63 = vmul.f32 1.442695, %v1680_v57  ;;  %v1779_v60 = vmul.f32 1.442695, %v1682_v45 }
 0x31a   : > { %1881 = vadd.xlane.f32.xlu0 %v5073_v22  ;;  %v1606_v2 = vpop.xlane.xlu0 %1605  ;;  %v1783_v43 = vmul.f32 1.442695, %v1684_v15  ;;  %v5717_v57 = vld [vmem:[#allocation13_spill] sm:$0xff]  ;;  %v5720_v15 = vld [vmem:[#allocation12_spill] sm:$0xff] }
 0x31b   : > { %v1610_v8 = vpop.xlane.xlu1 %1609  ;;  %3903 = vpow2.f32 %v1785_v48  ;;  %v1691_v29 = vsub.f32 %v5713_v44, %v1606_v2 }
 0x31c   : > { %3905 = vpow2.f32 %v1771_v6  ;;  %v1693_v51 = vsub.f32 %v5715_v41, %v1610_v8  ;;  %v1695_v6 = vsub.f32 %v5717_v57, %v5101_v31  ;;  %v5718_v8 = vld [vmem:[#allocation8_spill] sm:$0xff] }
 0x31d   : > { %v5127_v47 = vpop.eup %3895  ;;  %3907 = vpow2.f32 %v1789_v24  ;;  %v1797_v39 = vmul.f32 1.442695, %v1691_v29  ;;  %v1688_v49 = vsub.f32 %v5718_v8, %v5049_v42  ;;  %v1690_v42 = vsub.f32 %v5720_v15, %v5088_v27 }
 0x31e   : > { %1885 = vadd.xlane.f32.xlu0 %v5081_v55  ;;  %v5129_v1 = vpop.eup %3897  ;;  %3909 = vpow2.f32 %v1775_v63  ;;  %v1801_v24 = vmul.f32 1.442695, %v1693_v51  ;;  %v1787_v63 = vmul.f32 1.442695, %v1686_v25  ;;  %v1616_v56 = vpop.xlane.xlu0 %1615  ;;  %v1805_v29 = vmul.f32 1.442695, %v1695_v6 }
 0x31f   : > { %1635 = vmax.xlane.f32.xlu1 %v4943_v5  ;;  %v5131_v38 = vpop.xlane.xlu1 %1611  ;;  %v5138_v32 = vpop.eup %3899  ;;  %3911 = vpow2.f32 %v1793_v61  ;;  %v5719_v61 = vld [vmem:[#allocation18_spill] sm:$0xff]  ;;  %v1791_v18 = vmul.f32 1.442695, %v1688_v49  ;;  %v5722_v51 = vld [vmem:[#allocation17_spill] sm:$0xff]  ;;  %v5723_v25 = vld [vmem:[#allocation11_spill] sm:$0xff] }
 0x320   : > { %v5140_v58 = vpop.eup %3901  ;;  %3913 = vpow2.f32 %v1779_v60  ;;  %v1795_v57 = vmul.f32 1.442695, %v1690_v42  ;;  %v5725_v49 = vld [vmem:[#allocation21_spill] sm:$0xff]  ;;  %v5728_v42 = vld [vmem:[#allocation15_spill] sm:$0xff] }
 0x321   : > { %3915 = vpow2.f32 %v1797_v39 }
 0x322   : > { %1889 = vadd.xlane.f32.xlu0 %v5090_v46  ;;  %3917 = vpow2.f32 %v1783_v43  ;;  %v1622_v60 = vpop.xlane.xlu0 %1621 }
 0x323   : > { %1879 = vadd.xlane.f32.xlu1 %v5092_v16  ;;  %v1618_v59 = vpop.xlane.xlu1 %1617  ;;  %3919 = vpow2.f32 %v1801_v24  ;;  %v1699_v43 = vsub.f32 %v5722_v51, %v1622_v60  ;;  %v1696_v60 = vsub.f32 %v5728_v42, %v1616_v56 }
 0x324   : > { %v1697_v31 = vsub.f32 %v5719_v61, %v1618_v59  ;;  %3921 = vpow2.f32 %v1787_v63  ;;  %v1692_v59 = vsub.f32 %v5723_v25, %v5075_v11  ;;  %v5726_v61 = vld [vmem:[#allocation16_spill] sm:$0xff] }
 0x325   : > { %v5147_v36 = vpop.eup %3903  ;;  %3923 = vpow2.f32 %v1805_v29  ;;  %v1813_v8 = vmul.f32 1.442695, %v1699_v43  ;;  %v5730_v25 = vld [vmem:[#allocation20_spill] sm:$0xff] }
 0x326   : > { %1893 = vadd.xlane.f32.xlu0 %v5099_v0  ;;  %v5149_v48 = vpop.eup %3905  ;;  %v1809_v37 = vmul.f32 1.442695, %v1697_v31  ;;  %3925 = vpow2.f32 %v1791_v18  ;;  %v1799_v29 = vmul.f32 1.442695, %v1692_v59  ;;  %v1694_v31 = vsub.f32 %v5726_v61, %v5131_v38 }
 0x327   : > { %1647 = vmax.xlane.f32.xlu1 %v4950_v10  ;;  %v5157_v45 = vpop.eup %3907  ;;  %v1620_v44 = vpop.xlane.xlu1 %1619  ;;  %v1807_v38 = vmul.f32 1.442695, %v1696_v60 }
 0x328   : > { %v5159_v2 = vpop.eup %3909  ;;  %3927 = vpow2.f32 %v1809_v37  ;;  %v1803_v51 = vmul.f32 1.442695, %v1694_v31  ;;  %v1698_v59 = vsub.f32 %v5730_v25, %v1620_v44  ;;  %v5736_v44 = vld [vmem:[#allocation22_spill] sm:$0xff] }
 0x329   : > { %v5166_v39 = vpop.eup %3911  ;;  %3929 = vpow2.f32 %v1795_v57 }
 0x32a   : > { %1897 = vadd.xlane.f32.xlu0 %v5108_v52  ;;  %5721 = vst [vmem:[#allocation10_spill] sm:$0xff] %v5166_v39  ;;  %v5168_v41 = vpop.eup %3913  ;;  %3931 = vpow2.f32 %v1813_v8 }
 0x32b   : > { %1883 = vadd.xlane.f32.xlu1 %v5110_v30  ;;  %v1626_v6 = vpop.xlane.xlu1 %1625  ;;  %v5175_v27 = vpop.eup %3915  ;;  %3933 = vpow2.f32 %v1799_v29  ;;  %v1811_v29 = vmul.f32 1.442695, %v1698_v59 }
 0x32c   : > { %5724 = vst [vmem:[#allocation7_spill] sm:$0xff] %v5175_v27  ;;  %v5177_v24 = vpop.eup %3917  ;;  %v1701_v63 = vsub.f32 %v5725_v49, %v1626_v6  ;;  %v1624_v6 = vpop.xlane.xlu0 %1623  ;;  %v5733_v49 = vld [vmem:[#allocation19_spill] sm:$0xff] }
 0x32d   : > { %v5184_v11 = vpop.eup %3919 }
 0x32e   : > { %1901 = vadd.xlane.f32.xlu0 %v5117_v33  ;;  %5727 = vst [vmem:[#allocation14_spill] sm:$0xff] %v5184_v11  ;;  %v5186_v18 = vpop.eup %3921  ;;  %v1817_v15 = vmul.f32 1.442695, %v1701_v63  ;;  %v1700_v63 = vsub.f32 %v5733_v49, %v1624_v6 }
 0x32f   : > { %1887 = vadd.xlane.f32.xlu1 %v5119_v50  ;;  %v5191_v43 = vpop.eup %3923  ;;  %v1628_v56 = vpop.xlane.xlu1 %1627 }
 0x330   : > { %5729 = vst [vmem:[#allocation9_spill] sm:$0xff] %v5191_v43  ;;  %v5193_v37 = vpop.eup %3925  ;;  %3935 = vpow2.f32 %v1817_v15  ;;  %v1702_v15 = vsub.f32 %v5736_v44, %v1628_v56  ;;  %v1815_v60 = vmul.f32 1.442695, %v1700_v63 }
 0x331   : > { %3937 = vpow2.f32 %v1803_v51 }
 0x332   : > { %1905 = vadd.xlane.f32.xlu0 %v5127_v47  ;;  %v5198_v57 = vpop.eup %3927  ;;  %3939 = vpow2.f32 %v1807_v38  ;;  %v1819_v38 = vmul.f32 1.442695, %v1702_v15 }
 0x333   : > { %1891 = vadd.xlane.f32.xlu1 %v5129_v1  ;;  %5731 = vst [vmem:[#allocation13_spill] sm:$0xff] %v5198_v57  ;;  %v5200_v8 = vpop.eup %3929  ;;  %3941 = vpow2.f32 %v1811_v29 }
 0x334   : > { %5732 = vst [vmem:[#allocation8_spill] sm:$0xff] %v5200_v8  ;;  %v5205_v61 = vpop.eup %3931  ;;  %3943 = vpow2.f32 %v1815_v60 }
 0x335   : > { %5734 = vst [vmem:[#allocation18_spill] sm:$0xff] %v5205_v61  ;;  %v5207_v31 = vpop.eup %3933 }
 0x336   : > { %1909 = vadd.xlane.f32.xlu0 %v5138_v32  ;;  %5735 = vst [vmem:[#allocation12_spill] sm:$0xff] %v5207_v31 }
 0x337   : > { %1895 = vadd.xlane.f32.xlu1 %v5140_v58 }
 0x33a   : > { %1913 = vadd.xlane.f32.xlu0 %v5147_v36  ;;  %v5212_v51 = vpop.eup %3935 }
 0x33b   : > { %1899 = vadd.xlane.f32.xlu1 %v5149_v48  ;;  %5737 = vst [vmem:[#allocation17_spill] sm:$0xff] %v5212_v51  ;;  %v5214_v25 = vpop.eup %3937 }
 0x33c   : > { %5738 = vst [vmem:[#allocation11_spill] sm:$0xff] %v5214_v25  ;;  %v5218_v6 = vpop.eup %3939 }
 0x33d   : > { %5739 = vst [vmem:[#allocation21_spill] sm:$0xff] %v5218_v6  ;;  %v5221_v63 = vpop.eup %3941 }
 0x33e   : > { %1917 = vadd.xlane.f32.xlu0 %v5157_v45  ;;  %5740 = vst [vmem:[#allocation16_spill] sm:$0xff] %v5221_v63  ;;  %v5224_v15 = vpop.eup %3943 }
 0x33f   : > { %1903 = vadd.xlane.f32.xlu1 %v5159_v2  ;;  %5741 = vst [vmem:[#allocation15_spill] sm:$0xff] %v5224_v15 }
 0x342   : > { %1921 = vadd.xlane.f32.xlu0 %v5166_v39 }
 0x343   : > { %1907 = vadd.xlane.f32.xlu1 %v5168_v41 }
 0x346   : > { %1925 = vadd.xlane.f32.xlu0 %v5175_v27 }
 0x347   : > { %1911 = vadd.xlane.f32.xlu1 %v5177_v24 }
 0x34a   : > { %1929 = vadd.xlane.f32.xlu0 %v5184_v11 }
 0x34b   : > { %1915 = vadd.xlane.f32.xlu1 %v5186_v18 }
 0x34e   : > { %1933 = vadd.xlane.f32.xlu0 %v5191_v43 }
 0x34f   : > { %1919 = vadd.xlane.f32.xlu1 %v5193_v37 }
 0x352   : > { %1937 = vadd.xlane.f32.xlu0 %v5198_v57 }
 0x353   : > { %1923 = vadd.xlane.f32.xlu1 %v5200_v8 }
 0x356   : > { %1941 = vadd.xlane.f32.xlu0 %v5205_v61  ;;  %v1846_v56 = vpop.xlane.xlu0 %1845 }
 0x357   : > { %v1842_v42 = vpop.xlane.xlu1 %1841  ;;  %1927 = vadd.xlane.f32.xlu1 %v5207_v31 }
 0x358   : > { %3945 = vrcp.f32 %v1842_v42 }
 0x359   : > { %3947 = vpow2.f32 %v1819_v38 }
 0x35a   : > { %1945 = vadd.xlane.f32.xlu0 %v5212_v51 }
 0x35b   : > { %v1848_v59 = vpop.xlane.xlu1 %1847  ;;  %1931 = vadd.xlane.f32.xlu1 %v5214_v25 }
 0x35f   : > { %v1844_v49 = vpop.xlane.xlu1 %1843  ;;  %1935 = vadd.xlane.f32.xlu1 %v5218_v6 }
 0x360   : > { %3949 = vrcp.f32 %v1844_v49 }
 0x362   : > { %v3946_v60 = vpop.eup %3945 }
 0x363   : > { %v1850_v29 = vpop.xlane.xlu0 %1849  ;;  %v1854_v44 = vpop.xlane.xlu1 %1853  ;;  %1939 = vadd.xlane.f32.xlu1 %v5221_v63  ;;  %v2033_v25 = vmul.f32 %v3946_v60, %v4963_v9 }
 0x364   : > { %v5228_v38 = vpop.eup %3947 }
 0x367   : > { %v1630_v51 = vpop.xlane.xlu0 %1629  ;;  %v1856_v61 = vpop.xlane.xlu1 %1855  ;;  %1943 = vadd.xlane.f32.xlu1 %v5224_v15 }
 0x368   : > { %v1703_v42 = vsub.f32 %v4926_v17, %v1630_v51 }
 0x36a   : > { %v3950_v57 = vpop.eup %3949  ;;  %v1821_v6 = vmul.f32 1.442695, %v1703_v42 }
 0x36b   : > { %v1632_v49 = vpop.xlane.xlu0 %1631  ;;  %v1852_v43 = vpop.xlane.xlu1 %1851  ;;  %1947 = vadd.xlane.f32.xlu1 %v5228_v38  ;;  %v2034_v63 = vmul.f32 %v3950_v57, %v4972_v53 }
 0x36c   : > { %3951 = vpow2.f32 %v1821_v6  ;;  %v1704_v11 = vsub.f32 %v4930_v20, %v1632_v49 }
 0x36d   : > { %v2097_v31 = vpack.c.bf16 %v2034_v63, %v2033_v25 }
 0x36e   : > { %v1823_v15 = vmul.f32 1.442695, %v1704_v11 }
 0x36f   : > { %3609 = vmatprep.mubr.bf16.mxu1 %v2097_v31  ;;  %v1862_v27 = vpop.xlane.xlu1 %1861  ;;  %v1634_v17 = vpop.xlane.xlu0 %1633 }
 0x370   : > { %3953 = vpow2.f32 %v1823_v15  ;;  %v1705_v51 = vsub.f32 %v4938_v28, %v1634_v17 }
 0x371   : > { %3955 = vrcp.f32 %v1846_v56 }
 0x372   : > { %v1825_v42 = vmul.f32 1.442695, %v1705_v51 }
 0x373   : > { %v1858_v8 = vpop.xlane.xlu1 %1857  ;;  %v1638_v39 = vpop.xlane.xlu0 %1637 }
 0x374   : > { %3957 = vpow2.f32 %v1825_v42  ;;  %v1707_v9 = vsub.f32 %v4936_v26, %v1638_v39 }
 0x375   : > { %3959 = vrcp.f32 %v1848_v59 }
 0x376   : > { %v5236_v53 = vpop.eup %3951  ;;  %3961 = vrcp.f32 %v1852_v43  ;;  %v1829_v20 = vmul.f32 1.442695, %v1707_v9 }
 0x377   : > { %3963 = vrcp.f32 %v1850_v29  ;;  %v1864_v11 = vpop.xlane.xlu1 %1863  ;;  %v5238_v57 = vpop.xlane.xlu0 %1639  ;;  %1949 = vadd.xlane.f32.xlu0 %v5236_v53 }
 0x378   : > { %3965 = vpow2.f32 %v1829_v20 }
 0x379   : > { %3967 = vrcp.f32 %v1856_v61 }
 0x37a   : > { %v5241_v28 = vpop.eup %3953  ;;  %3969 = vrcp.f32 %v1854_v44 }
 0x37b   : > { %v598_v31 = vpop.permute.xlu1 %597  ;;  %v1642_v25 = vpop.xlane.xlu0 %1641  ;;  %1951 = vadd.xlane.f32.xlu1 %v5241_v28 }
 0x37c   : > { %614 = vst.msk [vmem:[#allocation3 + $0x38] sm:$0xff] %vm566_vm0, %v598_v31  ;;  %v1709_v26 = vsub.f32 %v4948_v34, %v1642_v25  ;;  %v3956_v39 = vpop.eup %3955 }
 0x37d   : > { %v2035_v44 = vmul.f32 %v3956_v39, %v4961_v12 }
 0x37e   : > { %v5246_v43 = vpop.eup %3957  ;;  %v1833_v59 = vmul.f32 1.442695, %v1709_v26 }
 0x37f   : > { %v3960_v6 = vpop.eup %3959  ;;  %1953 = vadd.xlane.f32.xlu0 %v5246_v43  ;;  %v5249_v56 = vpop.xlane.xlu0 %1643 }
 0x380   : > { %v3962_v63 = vpop.eup %3961  ;;  %3971 = vpow2.f32 %v1833_v59  ;;  %v2036_v60 = vmul.f32 %v3960_v6, %v4968_v21 }
 0x381   : > { %v3964_v29 = vpop.eup %3963  ;;  %3973 = vrcp.f32 %v1858_v8  ;;  %v2038_v49 = vmul.f32 %v3962_v63, %v4989_v62 }
 0x382   : > { %v5251_v15 = vpop.eup %3965  ;;  %3975 = vrcp.f32 %v1864_v11  ;;  %v2037_v17 = vmul.f32 %v3964_v29, %v4978_v23  ;;  %v2098_v51 = vpack.c.bf16 %v2036_v60, %v2035_v44 }
 0x383   : > { %1957 = vadd.xlane.f32.xlu0 %v5251_v15  ;;  %v1860_v34 = vpop.xlane.xlu0 %1859  ;;  %v2136_v61 = vld [vmem:[#allocation3 + $0x38] sm:$0xff]  ;;  %v3968_v42 = vpop.eup %3967 }
 0x384   : > { %3607 = vmatprep.subr.bf16.mxu1 %v2136_v61  ;;  %3977 = vrcp.f32 %v1860_v34  ;;  %v2099_v21 = vpack.c.bf16 %v2038_v49, %v2037_v17  ;;  %v3970_v8 = vpop.eup %3969  ;;  %v2040_v62 = vmul.f32 %v3968_v42, %v4983_v7  ;;  %v5742_v7 = vld [vmem:[#allocation26_spill] sm:$0xff] }
 0x385   : > { %3608 = vmatpush3.bf16.msra.mxu1 %v2136_v61  ;;  %3979 = vrcp.f32 %v1862_v27  ;;  %v2039_v11 = vmul.f32 %v3970_v8, %v4976_v19  ;;  %v5743_v19 = vld [vmem:[#allocation25_spill] sm:$0xff] }
 0x387   : > { %v1870_v9 = vpop.xlane.xlu0 %1869  ;;  %v2100_v23 = vpack.c.bf16 %v2040_v62, %v2039_v11 }
 0x388   : > { %3610 = vmatmul.mubr.bf16.vlgmr.msra.gmra.mrb[80].mxu1 %v2098_v51 }
 0x389   : > { %3613 = vmatprep.mubr.bf16.mxu1 %v2099_v21 }
 0x38a   : > { %v5258_v20 = vpop.eup %3971 }
 0x38b   : > { %1961 = vadd.xlane.f32.xlu0 %v5258_v20  ;;  %v1866_v12 = vpop.xlane.xlu0 %1865  ;;  %v3974_v31 = vpop.eup %3973 }
 0x38c   : > { %v3976_v25 = vpop.eup %3975  ;;  %v2041_v27 = vmul.f32 %v3974_v31, %v5000_v3 }
 0x38d   : > { %v2044_v29 = vmul.f32 %v3976_v25, %v5742_v7 }
 0x38e   : > { %v3978_v26 = vpop.eup %3977 }
 0x38f   : > { %v1872_v39 = vpop.xlane.xlu0 %1871  ;;  %v2042_v59 = vmul.f32 %v3978_v26, %v5022_v14  ;;  %v3980_v6 = vpop.eup %3979 }
 0x390   : > { %3614 = vmatmul.mubr.bf16.gmra.mrb[84].mxu1 %v2100_v23  ;;  %3981 = vrcp.f32 %v1872_v39  ;;  %v2043_v34 = vmul.f32 %v3980_v6, %v5743_v19 }
 0x391   : > { %3983 = vrcp.f32 %v1866_v12  ;;  %v2101_v63 = vpack.c.bf16 %v2042_v59, %v2041_v27  ;;  %v5745_v12 = vld [vmem:[#allocation27_spill] sm:$0xff] }
 0x392   : > { %3985 = vrcp.f32 %v1870_v9  ;;  %v2102_v61 = vpack.c.bf16 %v2044_v29, %v2043_v34  ;;  %v5744_v9 = vld [vmem:[#allocation28_spill] sm:$0xff]  ;;  %v5746_v29 = vld [vmem:[#allocation23_spill] sm:$0xff] }
 0x393   : > { %v1868_v60 = vpop.xlane.xlu0 %1867  ;;  %3617 = vmatprep.mubr.bf16.mxu1 %v2101_v63 }
 0x394   : > { %3987 = vrcp.f32 %v1868_v60  ;;  %v1708_v60 = vsub.f32 %v5746_v29, %v5238_v57 }
 0x397   : > { %v1878_v49 = vpop.xlane.xlu0 %1877 }
 0x398   : > { %3618 = vmatmul.mubr.bf16.gmra.mrb[88].mxu1 %v2102_v61 }
 0x39a   : > { %v3982_v44 = vpop.eup %3981 }
 0x39b   : > { %v1874_v17 = vpop.xlane.xlu0 %1873  ;;  %v3984_v3 = vpop.eup %3983  ;;  %v2048_v42 = vmul.f32 %v3982_v44, %v5040_v54 }
 0x39c   : > { %v3986_v51 = vpop.eup %3985  ;;  %3989 = vrcp.f32 %v1874_v17  ;;  %v2045_v8 = vmul.f32 %v3984_v3, %v5036_v13  ;;  %v1831_v17 = vmul.f32 1.442695, %v1708_v60  ;;  %v5747_v3 = vld [vmem:[#allocation24_spill] sm:$0xff] }
 0x39d   : > { %v2047_v11 = vmul.f32 %v3986_v51, %v5745_v12  ;;  %v1710_v51 = vsub.f32 %v5747_v3, %v5249_v56 }
 0x39e   : > { %v3988_v14 = vpop.eup %3987 }
 0x39f   : > { %v1876_v21 = vpop.xlane.xlu0 %1875  ;;  %v2046_v62 = vmul.f32 %v3988_v14, %v5744_v9  ;;  %v2104_v25 = vpack.c.bf16 %v2048_v42, %v2047_v11  ;;  %v5748_v11 = vld [vmem:[#allocation29_spill] sm:$0xff] }
 0x3a0   : > { %3991 = vrcp.f32 %v1876_v21 }
 0x3a1   : > { %v2103_v31 = vpack.c.bf16 %v2046_v62, %v2045_v8 }
 0x3a3   : > { %3621 = vmatprep.mubr.bf16.mxu1 %v2103_v31  ;;  %v1646_v23 = vpop.xlane.xlu0 %1645 }
 0x3a4   : > { %v1711_v26 = vsub.f32 %v4946_v4, %v1646_v23  ;;  %3622 = vmatmul.mubr.bf16.gmra.mrb[92].mxu1 %v2104_v25 }
 0x3a6   : > { %v1837_v39 = vmul.f32 1.442695, %v1711_v26  ;;  %v3990_v59 = vpop.eup %3989 }
 0x3a7   : > { %v1882_v27 = vpop.xlane.xlu0 %1881  ;;  %v2049_v13 = vmul.f32 %v3990_v59, %v5055_v35 }
 0x3a8   : > { %3993 = vpow2.f32 %v1837_v39 }
 0x3a9   : > { %3995 = vrcp.f32 %v1878_v49 }
 0x3aa   : > { %v3992_v54 = vpop.eup %3991 }
 0x3ab   : > { %v1886_v6 = vpop.xlane.xlu0 %1885  ;;  %v2050_v63 = vmul.f32 %v3992_v54, %v5063_v40 }
 0x3ac   : > { %v1636_v7 = vpop.xlane.xlu1 %1635 }
 0x3ad   : > { %v1706_v19 = vsub.f32 %v4943_v5, %v1636_v7  ;;  %v2105_v34 = vpack.c.bf16 %v2050_v63, %v2049_v13  ;;  %v1835_v5 = vmul.f32 1.442695, %v1710_v51 }
 0x3af   : > { %v1827_v61 = vmul.f32 1.442695, %v1706_v19  ;;  %3625 = vmatprep.mubr.bf16.mxu1 %v2105_v34  ;;  %v1890_v4 = vpop.xlane.xlu0 %1889 }
 0x3b0   : > { %v1880_v44 = vpop.xlane.xlu1 %1879 }
 0x3b1   : > { %3997 = vpow2.f32 %v1827_v61 }
 0x3b2   : > { %v5279_v35 = vpop.eup %3993  ;;  %3999 = vrcp.f32 %v1880_v44 }
 0x3b3   : > { %1965 = vadd.xlane.f32.xlu0 %v5279_v35  ;;  %v1894_v40 = vpop.xlane.xlu0 %1893  ;;  %4001 = vpow2.f32 %v1831_v17  ;;  %v3996_v8 = vpop.eup %3995 }
 0x3b4   : > { %v1648_v57 = vpop.xlane.xlu1 %1647  ;;  %4003 = vrcp.f32 %v1882_v27  ;;  %v2051_v31 = vmul.f32 %v3996_v8, %v5748_v11  ;;  %v3835_v27 = vld [vmem:[%s5649_s5] sm:$0xff]  }
 0x3b5   : > { %v1712_v14 = vsub.f32 %v4950_v10, %v1648_v57  ;;  %4005 = vpow2.f32 %v1835_v5  ;;  %3673 = vmatprep.subr.bf16.mxu0 %v3835_v27 }
 0x3b6   : > { %3674 = vmatpush3.bf16.msra.mxu0 %v3835_v27 }
 0x3b7   : > { %v1898_v42 = vpop.xlane.xlu0 %1897  ;;  %v1839_v49 = vmul.f32 1.442695, %v1712_v14 }
 0x3b8   : > { %v1884_v21 = vpop.xlane.xlu1 %1883 }
 0x3b9   : > { %4007 = vrcp.f32 %v1884_v21 }
 0x3ba   : > { %4009 = vrcp.f32 %v1886_v6 }
 0x3bb   : > { %v5283_v56 = vpop.eup %3997  ;;  %v1902_v9 = vpop.xlane.xlu0 %1901  ;;  %4011 = vpow2.f32 %v1839_v49 }
 0x3bc   : > { %v4000_v62 = vpop.eup %3999  ;;  %1955 = vadd.xlane.f32.xlu1 %v5283_v56  ;;  %v1888_v12 = vpop.xlane.xlu1 %1887 }
 0x3bd   : > { %4013 = vrcp.f32 %v1888_v12  ;;  %v2052_v10 = vmul.f32 %v4000_v62, %v5092_v16  ;;  %v5288_v25 = vpop.eup %4001 }
 0x3be   : > { %4015 = vrcp.f32 %v1890_v4  ;;  %v4004_v59 = vpop.eup %4003 }
 0x3bf   : > { %v1906_v23 = vpop.xlane.xlu0 %1905  ;;  %v2106_v26 = vpack.c.bf16 %v2052_v10, %v2051_v31  ;;  %v5294_v54 = vpop.eup %4005  ;;  %v2053_v7 = vmul.f32 %v4004_v59, %v5073_v22  ;;  %v3836_v10 = vld [vmem:[%s5649_s5 + $0x8] sm:$0xff]  }
 0x3c0   : > { %1959 = vadd.xlane.f32.xlu1 %v5288_v25  ;;  %v1892_v39 = vpop.xlane.xlu1 %1891  ;;  %3675 = vmatprep.subr.bf16.mxu0 %v3836_v10 }
 0x3c1   : > { %4017 = vrcp.f32 %v1892_v39  ;;  %3626 = vmatmul.mubr.bf16.gmra.mrb[96].mxu1 %v2106_v26  ;;  %3676 = vmatpush3.bf16.msra.mxu0 %v3836_v10 }
 0x3c2   : > { %4019 = vrcp.f32 %v1894_v40 }
 0x3c3   : > { %v1910_v6 = vpop.xlane.xlu0 %1909  ;;  %v4008_v16 = vpop.eup %4007 }
 0x3c4   : > { %v1896_v13 = vpop.xlane.xlu1 %1895  ;;  %1963 = vadd.xlane.f32.xlu1 %v5294_v54  ;;  %v4010_v63 = vpop.eup %4009  ;;  %v2054_v29 = vmul.f32 %v4008_v16, %v5110_v30 }
 0x3c5   : > { %4021 = vrcp.f32 %v1896_v13  ;;  %v5299_v60 = vpop.eup %4011  ;;  %v2055_v44 = vmul.f32 %v4010_v63, %v5081_v55 }
 0x3c6   : > { %4023 = vrcp.f32 %v1898_v42  ;;  %v2107_v61 = vpack.c.bf16 %v2054_v29, %v2053_v7  ;;  %v3838_v7 = vld [vmem:[%s5649_s5 + $0x18] sm:$0xff]  }
 0x3c7   : > { %v4014_v19 = vpop.eup %4013  ;;  %v1914_v34 = vpop.xlane.xlu0 %1913 }
 0x3c8   : > { %v1900_v4 = vpop.xlane.xlu1 %1899  ;;  %1967 = vadd.xlane.f32.xlu1 %v5299_v60  ;;  %v2056_v17 = vmul.f32 %v4014_v19, %v5119_v50  ;;  %v4016_v3 = vpop.eup %4015  ;;  %3629 = vmatprep.mubr.bf16.mxu1 %v2107_v61 }
 0x3c9   : > { %4025 = vrcp.f32 %v1900_v4  ;;  %v2057_v57 = vmul.f32 %v4016_v3, %v5090_v46 }
 0x3ca   : > { %v2108_v51 = vpack.c.bf16 %v2056_v17, %v2055_v44  ;;  %4027 = vrcp.f32 %v1902_v9 }
 0x3cb   : > { %v4018_v22 = vpop.eup %4017  ;;  %v1918_v30 = vpop.xlane.xlu0 %1917 }
 0x3cc   : > { %v1904_v40 = vpop.xlane.xlu1 %1903  ;;  %3630 = vmatmul.mubr.bf16.gmra.mrb[100].mxu1 %v2108_v51  ;;  %v2058_v5 = vmul.f32 %v4018_v22, %v5129_v1  ;;  %v4020_v14 = vpop.eup %4019 }
 0x3cd   : > { %4029 = vrcp.f32 %v1904_v40  ;;  %v2059_v21 = vmul.f32 %v4020_v14, %v5099_v0 }
 0x3ce   : > { %v2109_v42 = vpack.c.bf16 %v2058_v5, %v2057_v57  ;;  %4031 = vrcp.f32 %v1906_v23 }
 0x3cf   : > { %v4022_v49 = vpop.eup %4021  ;;  %v1922_v55 = vpop.xlane.xlu0 %1921 }
 0x3d0   : > { %v1908_v50 = vpop.xlane.xlu1 %1907  ;;  %3633 = vmatprep.mubr.bf16.mxu1 %v2109_v42  ;;  %v2060_v8 = vmul.f32 %v4022_v49, %v5140_v58  ;;  %v4024_v9 = vpop.eup %4023 }
 0x3d1   : > { %4033 = vrcp.f32 %v1908_v50  ;;  %v2061_v1 = vmul.f32 %v4024_v9, %v5108_v52 }
 0x3d2   : > { %v2110_v62 = vpack.c.bf16 %v2060_v8, %v2059_v21  ;;  %4035 = vrcp.f32 %v1910_v6  ;;  %v5750_v21 = vld [vmem:[#allocation8_spill] sm:$0xff] }
 0x3d3   : > { %v4026_v12 = vpop.eup %4025  ;;  %v1926_v0 = vpop.xlane.xlu0 %1925 }
 0x3d4   : > { %v1912_v46 = vpop.xlane.xlu1 %1911  ;;  %3634 = vmatmul.mubr.bf16.gmra.mrb[104].mxu1 %v2110_v62  ;;  %v2062_v11 = vmul.f32 %v4026_v12, %v5149_v48  ;;  %v4028_v31 = vpop.eup %4027  ;;  %v3837_v48 = vld [vmem:[%s5649_s5 + $0x10] sm:$0xff]  }
 0x3d5   : > { %4037 = vrcp.f32 %v1912_v46  ;;  %v2063_v39 = vmul.f32 %v4028_v31, %v5117_v33  ;;  %3677 = vmatprep.subr.bf16.mxu0 %v3837_v48 }
 0x3d6   : > { %v2111_v23 = vpack.c.bf16 %v2062_v11, %v2061_v1  ;;  %4039 = vrcp.f32 %v1914_v34  ;;  %3678 = vmatpush3.bf16.msra.mxu0 %v3837_v48  ;;  %v5752_v11 = vld [vmem:[#allocation12_spill] sm:$0xff] }
 0x3d7   : > { %v4030_v58 = vpop.eup %4029  ;;  %v1930_v16 = vpop.xlane.xlu0 %1929  ;;  %3679 = vmatprep.subr.bf16.mxu0 %v3838_v7 }
 0x3d8   : > { %v1916_v26 = vpop.xlane.xlu1 %1915  ;;  %3637 = vmatprep.mubr.bf16.mxu1 %v2111_v23  ;;  %v2064_v27 = vmul.f32 %v4030_v58, %v5159_v2  ;;  %v4032_v52 = vpop.eup %4031 }
 0x3d9   : > { %4041 = vrcp.f32 %v1916_v26  ;;  %v2065_v63 = vmul.f32 %v4032_v52, %v5127_v47  ;;  %v5754_v52 = vld [vmem:[#allocation11_spill] sm:$0xff] }
 0x3da   : > { %v2112_v59 = vpack.c.bf16 %v2064_v27, %v2063_v39  ;;  %4043 = vrcp.f32 %v1918_v30  ;;  %3680 = vmatpush3.bf16.msra.mxu0 %v3838_v7  ;;  %v5753_v39 = vld [vmem:[#allocation14_spill] sm:$0xff] }
 0x3db   : > { %v4034_v6 = vpop.eup %4033 }
 0x3dc   : > { %v1920_v13 = vpop.xlane.xlu1 %1919  ;;  %3638 = vmatmul.mubr.bf16.gmra.mrb[108].mxu1 %v2112_v59  ;;  %v2066_v33 = vmul.f32 %v4034_v6, %v5168_v41  ;;  %v4036_v2 = vpop.eup %4035 }
 0x3dd   : > { %4045 = vrcp.f32 %v1920_v13  ;;  %v2067_v61 = vmul.f32 %v4036_v2, %v5138_v32  ;;  %v1934_v41 = vpop.xlane.xlu0 %1933  ;;  %v5756_v2 = vld [vmem:[#allocation21_spill] sm:$0xff] }
 0x3de   : > { %v2113_v29 = vpack.c.bf16 %v2066_v33, %v2065_v63  ;;  %4047 = vrcp.f32 %v1922_v55  ;;  %v5755_v63 = vld [vmem:[#allocation9_spill] sm:$0xff] }
 0x3df   : > { %v4038_v19 = vpop.eup %4037 }
 0x3e0   : > { %v1924_v34 = vpop.xlane.xlu1 %1923  ;;  %3641 = vmatprep.mubr.bf16.mxu1 %v2113_v29  ;;  %v2068_v4 = vmul.f32 %v4038_v19, %v5177_v24  ;;  %v4040_v47 = vpop.eup %4039 }
 0x3e1   : > { %4049 = vrcp.f32 %v1924_v34  ;;  %v2069_v51 = vmul.f32 %v4040_v47, %v5147_v36  ;;  %v1938_v32 = vpop.xlane.xlu0 %1937  ;;  %v5758_v47 = vld [vmem:[#allocation16_spill] sm:$0xff] }
 0x3e2   : > { %v2114_v44 = vpack.c.bf16 %v2068_v4, %v2067_v61  ;;  %4051 = vrcp.f32 %v1926_v0  ;;  %v5757_v61 = vld [vmem:[#allocation13_spill] sm:$0xff] }
 0x3e3   : > { %v4042_v17 = vpop.eup %4041 }
 0x3e4   : > { %v1928_v3 = vpop.xlane.xlu1 %1927  ;;  %3642 = vmatmul.mubr.bf16.gmra.mrb[112].mxu1 %v2114_v44  ;;  %v2070_v22 = vmul.f32 %v4042_v17, %v5186_v18  ;;  %v4044_v30 = vpop.eup %4043  ;;  %v5749_v18 = vld [vmem:[#allocation10_spill] sm:$0xff] }
 0x3e5   : > { %4053 = vrcp.f32 %v1928_v3  ;;  %v2071_v5 = vmul.f32 %v4044_v30, %v5157_v45  ;;  %v1942_v62 = vpop.xlane.xlu0 %1941  ;;  %v5760_v30 = vld [vmem:[#allocation15_spill] sm:$0xff] }
 0x3e6   : > { %v2115_v40 = vpack.c.bf16 %v2070_v22, %v2069_v51  ;;  %4055 = vrcp.f32 %v1930_v16  ;;  %v5759_v51 = vld [vmem:[#allocation18_spill] sm:$0xff] }
 0x3e7   : > { %v4046_v57 = vpop.eup %4045 }
 0x3e8   : > { %v1932_v24 = vpop.xlane.xlu1 %1931  ;;  %3645 = vmatprep.mubr.bf16.mxu1 %v2115_v40  ;;  %v2072_v14 = vmul.f32 %v4046_v57, %v5193_v37  ;;  %v4048_v42 = vpop.eup %4047  ;;  %v5751_v37 = vld [vmem:[#allocation7_spill] sm:$0xff] }
 0x3e9   : > { %4057 = vrcp.f32 %v1932_v24  ;;  %v2073_v50 = vmul.f32 %v4048_v42, %v5749_v18  ;;  %v1946_v58 = vpop.xlane.xlu0 %1945 }
 0x3ea   : > { %v2116_v49 = vpack.c.bf16 %v2072_v14, %v2071_v5  ;;  %4059 = vrcp.f32 %v1934_v41  ;;  %v5761_v14 = vld [vmem:[#allocation17_spill] sm:$0xff] }
 0x3eb   : > { %v4050_v55 = vpop.eup %4049 }
 0x3ec   : > { %v1936_v36 = vpop.xlane.xlu1 %1935  ;;  %3646 = vmatmul.mubr.bf16.gmra.mrb[116].mxu1 %v2116_v49  ;;  %v2074_v8 = vmul.f32 %v4050_v55, %v5750_v21  ;;  %v4052_v9 = vpop.eup %4051 }
 0x3ed   : > { %4061 = vrcp.f32 %v1936_v36  ;;  %v2075_v1 = vmul.f32 %v4052_v9, %v5751_v37 }
 0x3ee   : > { %v2117_v12 = vpack.c.bf16 %v2074_v8, %v2073_v50  ;;  %4063 = vrcp.f32 %v1938_v32 }
 0x3ef   : > { %v4054_v46 = vpop.eup %4053 }
 0x3f0   : > { %v1940_v45 = vpop.xlane.xlu1 %1939  ;;  %3649 = vmatprep.mubr.bf16.mxu1 %v2117_v12  ;;  %v2076_v31 = vmul.f32 %v4054_v46, %v5752_v11  ;;  %v4056_v10 = vpop.eup %4055 }
 0x3f1   : > { %4065 = vrcp.f32 %v1940_v45  ;;  %v2077_v27 = vmul.f32 %v4056_v10, %v5753_v39 }
 0x3f2   : > { %v2118_v0 = vpack.c.bf16 %v2076_v31, %v2075_v1  ;;  %4067 = vrcp.f32 %v1942_v62 }
 0x3f3   : > { %v4058_v23 = vpop.eup %4057 }
 0x3f4   : > { %v1944_v26 = vpop.xlane.xlu1 %1943  ;;  %3650 = vmatmul.mubr.bf16.gmra.mrb[120].mxu1 %v2118_v0  ;;  %v2078_v48 = vmul.f32 %v4058_v23, %v5754_v52  ;;  %v4060_v59 = vpop.eup %4059 }
 0x3f5   : > { %4069 = vrcp.f32 %v1944_v26  ;;  %v2079_v33 = vmul.f32 %v4060_v59, %v5755_v63 }
 0x3f6   : > { %v2119_v6 = vpack.c.bf16 %v2078_v48, %v2077_v27  ;;  %4071 = vrcp.f32 %v1946_v58 }
 0x3f7   : > { %v4062_v16 = vpop.eup %4061 }
 0x3f8   : > { %v1948_v13 = vpop.xlane.xlu1 %1947  ;;  %3653 = vmatprep.mubr.bf16.mxu1 %v2119_v6  ;;  %v2080_v7 = vmul.f32 %v4062_v16, %v5756_v2  ;;  %v4064_v29 = vpop.eup %4063 }
 0x3f9   : > { %4073 = vrcp.f32 %v1948_v13  ;;  %v2081_v4 = vmul.f32 %v4064_v29, %v5757_v61 }
 0x3fa   : > { %v2120_v19 = vpack.c.bf16 %v2080_v7, %v2079_v33 }
 0x3fb   : > { %v4066_v34 = vpop.eup %4065 }
 0x3fc   : > { %3654 = vmatmul.mubr.bf16.gmra.mrb[124].mxu1 %v2120_v19  ;;  %v2082_v41 = vmul.f32 %v4066_v34, %v5758_v47  ;;  %v4068_v44 = vpop.eup %4067 }
 0x3fd   : > { %v2083_v22 = vmul.f32 %v4068_v44, %v5759_v51 }
 0x3fe   : > { %v2121_v17 = vpack.c.bf16 %v2082_v41, %v2081_v4 }
 0x3ff   : > { %v4070_v3 = vpop.eup %4069 }
 0x400   : > { %3657 = vmatprep.mubr.bf16.mxu1 %v2121_v17  ;;  %v2084_v40 = vmul.f32 %v4070_v3, %v5760_v30  ;;  %v4072_v57 = vpop.eup %4071 }
 0x401   : > { %v2085_v42 = vmul.f32 %v4072_v57, %v5761_v14 }
 0x402   : > { %v2122_v32 = vpack.c.bf16 %v2084_v40, %v2083_v22 }
 0x403   : > { %v4074_v24 = vpop.eup %4073 }
 0x404   : > { %3658 = vmatmul.mubr.bf16.gmra.mrb[128].mxu1 %v2122_v32  ;;  %v1950_v5 = vpop.xlane.xlu0 %1949  ;;  %v2086_v49 = vmul.f32 %v4074_v24, %v5228_v38 }
 0x405   : > { %4075 = vrcp.f32 %v1950_v5 }
 0x406   : > { %v2123_v55 = vpack.c.bf16 %v2086_v49, %v2085_v42 }
 0x408   : > { %v1952_v36 = vpop.xlane.xlu1 %1951  ;;  %3661 = vmatprep.mubr.bf16.mxu1 %v2123_v55 }
 0x409   : > { %4077 = vrcp.f32 %v1952_v36 }
 0x40c   : > { %v1954_v62 = vpop.xlane.xlu0 %1953 }
 0x40d   : > { %4079 = vrcp.f32 %v1954_v62 }
 0x40f   : > { %v4076_v18 = vpop.eup %4075 }
 0x410   : > { %v2087_v21 = vmul.f32 %v4076_v18, %v5236_v53  ;;  %v1958_v12 = vpop.xlane.xlu0 %1957 }
 0x413   : > { %v4078_v50 = vpop.eup %4077 }
 0x414   : > { %v2088_v8 = vmul.f32 %v4078_v50, %v5241_v28 }
 0x416   : > { %v2124_v9 = vpack.c.bf16 %v2088_v8, %v2087_v21 }
 0x417   : > { %v4080_v11 = vpop.eup %4079 }
 0x418   : > { %3662 = vmatmul.mubr.bf16.gmra.mrb[132].mxu1 %v2124_v9  ;;  %v1962_v38 = vpop.xlane.xlu0 %1961  ;;  %v2089_v28 = vmul.f32 %v4080_v11, %v5246_v43 }
 0x440   : > { %v1966_v37 = vpop.xlane.xlu0 %1965 }
 0x449   : > { %v1956_v46 = vpop.xlane.xlu1 %1955 }
 0x44a   : > { %4081 = vrcp.f32 %v1956_v46 }
 0x44b   : > { %4083 = vrcp.f32 %v1958_v12 }
 0x44d   : > { %v1960_v45 = vpop.xlane.xlu1 %1959 }
 0x44e   : > { %4085 = vrcp.f32 %v1960_v45 }
 0x44f   : > { %4087 = vrcp.f32 %v1962_v38 }
 0x451   : > { %v1964_v1 = vpop.xlane.xlu1 %1963 }
 0x452   : > { %4089 = vrcp.f32 %v1964_v1 }
 0x453   : > { %4091 = vrcp.f32 %v1966_v37 }
 0x454   : > { %v4082_v31 = vpop.eup %4081 }
 0x455   : > { %v1968_v53 = vpop.xlane.xlu1 %1967  ;;  %v2090_v10 = vmul.f32 %v4082_v31, %v5283_v56  ;;  %v4084_v0 = vpop.eup %4083 }
 0x456   : > { %4093 = vrcp.f32 %v1968_v53  ;;  %v2091_v26 = vmul.f32 %v4084_v0, %v5251_v15 }
 0x457   : > { %v2125_v23 = vpack.c.bf16 %v2090_v10, %v2089_v28 }
 0x458   : > { %v4086_v58 = vpop.eup %4085 }
 0x459   : > { %3665 = vmatprep.mubr.bf16.mxu1 %v2125_v23  ;;  %v2092_v39 = vmul.f32 %v4086_v58, %v5288_v25  ;;  %v4088_v27 = vpop.eup %4087 }
 0x45a   : > { %v2093_v43 = vmul.f32 %v4088_v27, %v5258_v20 }
 0x45b   : > { %v3611_v52 = vpop.f32.mrb[80].mxu1  ;;  %v2126_v48 = vpack.c.bf16 %v2092_v39, %v2091_v26 }
 0x45c   : > { %v4090_v59 = vpop.eup %4089  ;;  %v2171_v6 = vpop.f32.mrb[81].mxu1 }
 0x45d   : > { %v3612_v16 = vpop.f32.mrb[82].mxu1  ;;  %3666 = vmatmul.mubr.bf16.gmra.mrb[136].mxu1 %v2126_v48  ;;  %v2094_v56 = vmul.f32 %v4090_v59, %v5294_v54  ;;  %v4092_v13 = vpop.eup %4091 }
 0x45e   : > { %v2427_v63 = vpack.c.bf16 %v3612_v16, %v3611_v52  ;;  %v2174_v33 = vpop.f32.mrb[83].mxu1  ;;  %v2095_v15 = vmul.f32 %v4092_v13, %v5279_v35 }
 0x45f   : > { %v2426_v2 = vpack.c.bf16 %v2174_v33, %v2171_v6  ;;  %v2127_v7 = vpack.c.bf16 %v2094_v56, %v2093_v43 }
 0x460   : > { %v4094_v29 = vpop.eup %4093 }
 0x461   : > { %3669 = vmatprep.mubr.bf16.mxu1 %v2127_v7  ;;  %3681 = vmatprep.mubr.msk.bf16.mxu0 %vm566_vm0, %v2426_v2  ;;  %v2096_v25 = vmul.f32 %v4094_v29, %v5299_v60 }
 0x462   : > { %3682 = vmatmul.mubr.msk.bf16.vlgmr.msra.gmra.mrb[64].mxu0 %vm566_vm0, %v2427_v63 }
 0x463   : > { %v3615_v19 = vpop.f32.mrb[84].mxu1  ;;  %v2128_v34 = vpack.c.bf16 %v2096_v25, %v2095_v15 }
 0x464   : > { %v2187_v20 = vpop.f32.mrb[85].mxu1 }
 0x465   : > { %v3616_v61 = vpop.f32.mrb[86].mxu1  ;;  %3670 = vmatmul.mubr.bf16.gmra.mrb[140].mxu1 %v2128_v34 }
 0x466   : > { %v2429_v54 = vpack.c.bf16 %v3616_v61, %v3615_v19  ;;  %v2190_v4 = vpop.f32.mrb[87].mxu1 }
 0x467   : > { %v2428_v47 = vpack.c.bf16 %v2190_v4, %v2187_v20 }
 0x469   : > { %3685 = vmatprep.mubr.msk.bf16.mxu0 %vm566_vm0, %v2428_v47 }
 0x46a   : > { %3686 = vmatmul.mubr.msk.bf16.gmra.mrb[68].mxu0 %vm566_vm0, %v2429_v54 }
 0x46b   : > { %v3619_v41 = vpop.f32.mrb[88].mxu1 }
 0x46c   : > { %v2203_v44 = vpop.f32.mrb[89].mxu1 }
 0x46d   : > { %v3620_v17 = vpop.f32.mrb[90].mxu1 }
 0x46e   : > { %v2431_v35 = vpack.c.bf16 %v3620_v17, %v3619_v41  ;;  %v2206_v3 = vpop.f32.mrb[91].mxu1 }
 0x46f   : > { %v2430_v60 = vpack.c.bf16 %v2206_v3, %v2203_v44 }
 0x471   : > { %3689 = vmatprep.mubr.msk.bf16.mxu0 %vm566_vm0, %v2430_v60 }
 0x472   : > { %3690 = vmatmul.mubr.msk.bf16.gmra.mrb[72].mxu0 %vm566_vm0, %v2431_v35 }
 0x477   : > { %v3623_v51 = vpop.f32.mrb[92].mxu1 }
 0x478   : > { %v2219_v22 = vpop.f32.mrb[93].mxu1 }
 0x479   : > { %v3624_v30 = vpop.f32.mrb[94].mxu1 }
 0x47a   : > { %v2433_v40 = vpack.c.bf16 %v3624_v30, %v3623_v51  ;;  %v2222_v57 = vpop.f32.mrb[95].mxu1 }
 0x47b   : > { %v2432_v32 = vpack.c.bf16 %v2222_v57, %v2219_v22 }
 0x47d   : > { %3693 = vmatprep.mubr.msk.bf16.mxu0 %vm566_vm0, %v2432_v32 }
 0x47e   : > { %3694 = vmatmul.mubr.msk.bf16.gmra.mrb[76].mxu0 %vm566_vm0, %v2433_v40 }
 0x494   : > { %v3627_v24 = vpop.f32.mrb[96].mxu1 }
 0x495   : > { %v2235_v5 = vpop.f32.mrb[97].mxu1 }
 0x496   : > { %v3628_v14 = vpop.f32.mrb[98].mxu1 }
 0x497   : > { %v2435_v42 = vpack.c.bf16 %v3628_v14, %v3627_v24  ;;  %v2238_v49 = vpop.f32.mrb[99].mxu1 }
 0x498   : > { %v2434_v55 = vpack.c.bf16 %v2238_v49, %v2235_v5  ;;  %v5385_v5 = vld [vmem:[%s5650_s6] ss:$0 sm:$0xff] }
 0x49a   : > { %3697 = vmatprep.mubr.msk.bf16.mxu0 %vm566_vm0, %v2434_v55 }
 0x49b   : > { %3698 = vmatmul.mubr.msk.bf16.gmra.mrb[80].mxu0 %vm566_vm0, %v2435_v42 }
 0x49f   : > { %v3631_v36 = vpop.f32.mrb[100].mxu1 }
 0x4a0   : > { %v2251_v18 = vpop.f32.mrb[101].mxu1 }
 0x4a1   : > { %v3632_v50 = vpop.f32.mrb[102].mxu1 }
 0x4a2   : > { %v2437_v21 = vpack.c.bf16 %v3632_v50, %v3631_v36  ;;  %v2254_v8 = vpop.f32.mrb[103].mxu1  ;;  %v4095_v50 = vld [vmem:[%s4401_s16 + $0x10] sm:$0xff] }
 0x4a3   : > { %v2436_v9 = vpack.c.bf16 %v2254_v8, %v2251_v18 }
 0x4a5   : > { %3701 = vmatprep.mubr.msk.bf16.mxu0 %vm566_vm0, %v2436_v9 }
 0x4a6   : > { %3702 = vmatmul.mubr.msk.bf16.gmra.mrb[84].mxu0 %vm566_vm0, %v2437_v21 }
 0x4a7   : > { %v3635_v62 = vpop.f32.mrb[104].mxu1 }
 0x4a8   : > { %v2267_v12 = vpop.f32.mrb[105].mxu1 }
 0x4a9   : > { %v3636_v46 = vpop.f32.mrb[106].mxu1 }
 0x4aa   : > { %v2439_v38 = vpack.c.bf16 %v3636_v46, %v3635_v62  ;;  %v2270_v45 = vpop.f32.mrb[107].mxu1 }
 0x4ab   : > { %v2438_v37 = vpack.c.bf16 %v2270_v45, %v2267_v12  ;;  %v4096_v12 = vld [vmem:[%s4401_s16] sm:$0xff] }
 0x4ad   : > { %3705 = vmatprep.mubr.msk.bf16.mxu0 %vm566_vm0, %v2438_v37  ;;  %v4097_v37 = vld [vmem:[%s4401_s16 + $0x18] sm:$0xff] }
 0x4ae   : > { %3706 = vmatmul.mubr.msk.bf16.gmra.mrb[88].mxu0 %vm566_vm0, %v2439_v38 }
 0x4af   : > { %v3639_v1 = vpop.f32.mrb[108].mxu1 }
 0x4b0   : > { %v2283_v11 = vpop.f32.mrb[109].mxu1 }
 0x4b1   : > { %v3640_v31 = vpop.f32.mrb[110].mxu1 }
 0x4b2   : > { %v2441_v53 = vpack.c.bf16 %v3640_v31, %v3639_v1  ;;  %v2286_v28 = vpop.f32.mrb[111].mxu1  ;;  %v4098_v31 = vld [vmem:[%s4401_s16 + $0x8] sm:$0xff] }
 0x4b3   : > { %v2440_v10 = vpack.c.bf16 %v2286_v28, %v2283_v11 }
 0x4b5   : > { %3709 = vmatprep.mubr.msk.bf16.mxu0 %vm566_vm0, %v2440_v10 }
 0x4b6   : > { %3710 = vmatmul.mubr.msk.bf16.gmra.mrb[92].mxu0 %vm566_vm0, %v2441_v53 }
 0x4b7   : > { %v3643_v0 = vpop.f32.mrb[112].mxu1 }
 0x4b8   : > { %v2299_v23 = vpop.f32.mrb[113].mxu1 }
 0x4b9   : > { %v3644_v58 = vpop.f32.mrb[114].mxu1 }
 0x4ba   : > { %v2443_v26 = vpack.c.bf16 %v3644_v58, %v3643_v0  ;;  %v2302_v39 = vpop.f32.mrb[115].mxu1 }
 0x4bb   : > { %v2442_v27 = vpack.c.bf16 %v2302_v39, %v2299_v23 }
 0x4bd   : > { %3713 = vmatprep.mubr.msk.bf16.mxu0 %vm566_vm0, %v2442_v27 }
 0x4be   : > { %3714 = vmatmul.mubr.msk.bf16.gmra.mrb[96].mxu0 %vm566_vm0, %v2443_v26 }
 0x4bf   : > { %v3647_v52 = vpop.f32.mrb[116].mxu1 }
 0x4c0   : > { %v2315_v48 = vpop.f32.mrb[117].mxu1 }
 0x4c1   : > { %v3648_v59 = vpop.f32.mrb[118].mxu1 }
 0x4c2   : > { %v2445_v6 = vpack.c.bf16 %v3648_v59, %v3647_v52  ;;  %v2318_v16 = vpop.f32.mrb[119].mxu1  ;;  %v4099_v52 = vld [vmem:[%s4401_s16 + $0x30] sm:$0xff] }
 0x4c3   : > { %v2444_v43 = vpack.c.bf16 %v2318_v16, %v2315_v48  ;;  %v4100_v16 = vld [vmem:[%s4401_s16 + $0x20] sm:$0xff] }
 0x4c5   : > { %3717 = vmatprep.mubr.msk.bf16.mxu0 %vm566_vm0, %v2444_v43 }
 0x4c6   : > { %3718 = vmatmul.mubr.msk.bf16.gmra.mrb[100].mxu0 %vm566_vm0, %v2445_v6 }
 0x4c7   : > { %v3651_v56 = vpop.f32.mrb[120].mxu1 }
 0x4c8   : > { %v2331_v13 = vpop.f32.mrb[121].mxu1 }
 0x4c9   : > { %v3652_v63 = vpop.f32.mrb[122].mxu1 }
 0x4ca   : > { %v2447_v33 = vpack.c.bf16 %v3652_v63, %v3651_v56  ;;  %v2334_v2 = vpop.f32.mrb[123].mxu1 }
 0x4cb   : > { %v2446_v7 = vpack.c.bf16 %v2334_v2, %v2331_v13  ;;  %v4101_v13 = vld [vmem:[%s4401_s16 + $0x38] sm:$0xff] }
 0x4cd   : > { %3721 = vmatprep.mubr.msk.bf16.mxu0 %vm566_vm0, %v2446_v7 }
 0x4ce   : > { %3722 = vmatmul.mubr.msk.bf16.gmra.mrb[104].mxu0 %vm566_vm0, %v2447_v33  ;;  %v4102_v33 = vld [vmem:[%s4401_s16 + $0x28] sm:$0xff] }
 0x4cf   : > { %v3655_v29 = vpop.f32.mrb[124].mxu1 }
 0x4d0   : > { %v2347_v15 = vpop.f32.mrb[125].mxu1 }
 0x4d1   : > { %v3656_v25 = vpop.f32.mrb[126].mxu1 }
 0x4d2   : > { %v2449_v19 = vpack.c.bf16 %v3656_v25, %v3655_v29  ;;  %v2350_v34 = vpop.f32.mrb[127].mxu1 }
 0x4d3   : > { %v2448_v20 = vpack.c.bf16 %v2350_v34, %v2347_v15  ;;  %v4103_v34 = vld [vmem:[%s4401_s16 + $0x50] sm:$0xff] }
 0x4d5   : > { %3725 = vmatprep.mubr.msk.bf16.mxu0 %vm566_vm0, %v2448_v20 }
 0x4d6   : > { %3726 = vmatmul.mubr.msk.bf16.gmra.mrb[108].mxu0 %vm566_vm0, %v2449_v19 }
 0x4d7   : > { %v3659_v61 = vpop.f32.mrb[128].mxu1 }
 0x4d8   : > { %v2363_v54 = vpop.f32.mrb[129].mxu1 }
 0x4d9   : > { %v3660_v4 = vpop.f32.mrb[130].mxu1 }
 0x4da   : > { %v2451_v47 = vpack.c.bf16 %v3660_v4, %v3659_v61  ;;  %v2366_v41 = vpop.f32.mrb[131].mxu1  ;;  %v4104_v4 = vld [vmem:[%s4401_s16 + $0x40] sm:$0xff] }
 0x4db   : > { %v2450_v44 = vpack.c.bf16 %v2366_v41, %v2363_v54 }
 0x4dd   : > { %3729 = vmatprep.mubr.msk.bf16.mxu0 %vm566_vm0, %v2450_v44  ;;  %v4105_v44 = vld [vmem:[%s4401_s16 + $0x58] sm:$0xff] }
 0x4de   : > { %3730 = vmatmul.mubr.msk.bf16.gmra.mrb[112].mxu0 %vm566_vm0, %v2451_v47 }
 0x4eb   : > { %v3663_v17 = vpop.f32.mrb[132].mxu1 }
 0x4ec   : > { %v2379_v35 = vpop.f32.mrb[133].mxu1 }
 0x4ed   : > { %v3664_v3 = vpop.f32.mrb[134].mxu1 }
 0x4ee   : > { %v2453_v60 = vpack.c.bf16 %v3664_v3, %v3663_v17  ;;  %v2382_v51 = vpop.f32.mrb[135].mxu1 }
 0x4ef   : > { %v2452_v22 = vpack.c.bf16 %v2382_v51, %v2379_v35  ;;  %v4106_v35 = vld [vmem:[%s4401_s16 + $0x48] sm:$0xff] }
 0x4f1   : > { %3733 = vmatprep.mubr.msk.bf16.mxu0 %vm566_vm0, %v2452_v22 }
 0x4f2   : > { %3734 = vmatmul.mubr.msk.bf16.gmra.mrb[116].mxu0 %vm566_vm0, %v2453_v60 }
 0x530   : > { %v3667_v30 = vpop.f32.mrb[136].mxu1 }
 0x531   : > { %v2395_v40 = vpop.f32.mrb[137].mxu1 }
 0x532   : > { %v3668_v57 = vpop.f32.mrb[138].mxu1 }
 0x533   : > { %v2455_v32 = vpack.c.bf16 %v3668_v57, %v3667_v30  ;;  %v2398_v24 = vpop.f32.mrb[139].mxu1  ;;  %v4107_v57 = vld [vmem:[%s4401_s16 + $0x70] sm:$0xff] }
 0x534   : > { %v2454_v14 = vpack.c.bf16 %v2398_v24, %v2395_v40 }
 0x535   : > { %v3683_v42 = vpop.f32.mrb[64].mxu0 }
 0x536   : > { %v2636_v49 = vadd.f32 %v3683_v42, %v5385_v5  ;;  %v2627_v55 = vpop.f32.mrb[65].mxu0  ;;  %3737 = vmatprep.mubr.msk.bf16.mxu0 %vm566_vm0, %v2454_v14  ;;  %v4108_v42 = vld [vmem:[%s4401_s16 + $0x60] sm:$0xff] }
 0x537   : > { %v2628_v36 = vadd.f32 %v5385_v5, %v2627_v55  ;;  %v3684_v18 = vpop.f32.mrb[66].mxu0  ;;  %3738 = vmatmul.mubr.msk.bf16.gmra.mrb[120].mxu0 %vm566_vm0, %v2455_v32 }
 0x538   : > { %v2884_v21 = vadd.f32 %v4095_v50, %v2636_v49  ;;  %v2639_v8 = vadd.f32 %v3684_v18, %v5385_v5  ;;  %v3671_v9 = vpop.f32.mrb[140].mxu1  ;;  %v2630_v62 = vpop.f32.mrb[67].mxu0  ;;  %v4110_v50 = vld [vmem:[%s4401_s16 + $0x68] sm:$0xff] }
 0x539   : > { %v2882_v46 = vadd.f32 %v4096_v12, %v2628_v36  ;;  %v2631_v38 = vadd.f32 %v5385_v5, %v2630_v62  ;;  %v2411_v45 = vpop.f32.mrb[141].mxu1  ;;  %v4109_v36 = vld [vmem:[%s4401_s16 + $0x78] sm:$0xff] }
 0x53a   : > { %2948 = vst [vmem:[%s5397_s23 + $0x10] sm:$0xff] %v2884_v21  ;;  %v2885_v1 = vadd.f32 %v4097_v37, %v2639_v8  ;;  %v3672_v11 = vpop.f32.mrb[142].mxu1 }
 0x53b   : > { %2946 = vst [vmem:[%s5397_s23] sm:$0xff] %v2882_v46  ;;  %v2883_v53 = vadd.f32 %v4098_v31, %v2631_v38  ;;  %v2457_v28 = vpack.c.bf16 %v3672_v11, %v3671_v9  ;;  %v2414_v10 = vpop.f32.mrb[143].mxu1  ;;  %v4111_v38 = vld [vmem:[%s4401_s16 + $0x90] sm:$0xff]  ;;  %v4112_v11 = vld [vmem:[%s4401_s16 + $0x80] sm:$0xff] }
 0x53c   : > { %2949 = vst [vmem:[%s5397_s23 + $0x18] sm:$0xff] %v2885_v1  ;;  %v2456_v0 = vpack.c.bf16 %v2414_v10, %v2411_v45 }
 0x53d   : > { %2947 = vst [vmem:[%s5397_s23 + $0x8] sm:$0xff] %v2883_v53  ;;  %v3687_v23 = vpop.f32.mrb[68].mxu0 }
 0x53e   : > { %v2652_v58 = vadd.f32 %v3687_v23, %v5385_v5  ;;  %v2643_v26 = vpop.f32.mrb[69].mxu0  ;;  %3741 = vmatprep.mubr.msk.bf16.mxu0 %vm566_vm0, %v2456_v0  ;;  %v4114_v0 = vld [vmem:[%s4401_s16 + $0x88] sm:$0xff] }
 0x53f   : > { %v2644_v39 = vadd.f32 %v5385_v5, %v2643_v26  ;;  %v3688_v27 = vpop.f32.mrb[70].mxu0  ;;  %3742 = vmatmul.mubr.msk.bf16.gmra.mrb[124].mxu0 %vm566_vm0, %v2457_v28  ;;  %v4113_v28 = vld [vmem:[%s4401_s16 + $0x98] sm:$0xff] }
 0x540   : > { %v2888_v48 = vadd.f32 %v4099_v52, %v2652_v58  ;;  %v2655_v59 = vadd.f32 %v3688_v27, %v5385_v5  ;;  %v2646_v6 = vpop.f32.mrb[71].mxu0 }
 0x541   : > { %v2886_v43 = vadd.f32 %v4100_v16, %v2644_v39  ;;  %v2647_v56 = vadd.f32 %v5385_v5, %v2646_v6 }
 0x542   : > { %2952 = vst [vmem:[%s5397_s23 + $0x30] sm:$0xff] %v2888_v48  ;;  %v2889_v63 = vadd.f32 %v4101_v13, %v2655_v59  ;;  %v4115_v48 = vld [vmem:[%s4401_s16 + $0xb0] sm:$0xff] }
 0x543   : > { %2950 = vst [vmem:[%s5397_s23 + $0x20] sm:$0xff] %v2886_v43  ;;  %v2887_v2 = vadd.f32 %v4102_v33, %v2647_v56  ;;  %v4116_v43 = vld [vmem:[%s4401_s16 + $0xa0] sm:$0xff] }
 0x544   : > { %2953 = vst [vmem:[%s5397_s23 + $0x38] sm:$0xff] %v2889_v63  ;;  %v4117_v63 = vld [vmem:[%s4401_s16 + $0xb8] sm:$0xff] }
 0x545   : > { %2951 = vst [vmem:[%s5397_s23 + $0x28] sm:$0xff] %v2887_v2  ;;  %v3691_v7 = vpop.f32.mrb[72].mxu0  ;;  %v4118_v2 = vld [vmem:[%s4401_s16 + $0xa8] sm:$0xff] }
 0x546   : > { %v2668_v29 = vadd.f32 %v3691_v7, %v5385_v5  ;;  %v2659_v15 = vpop.f32.mrb[73].mxu0 }
 0x547   : > { %v2660_v25 = vadd.f32 %v5385_v5, %v2659_v15  ;;  %v3692_v19 = vpop.f32.mrb[74].mxu0 }
 0x548   : > { %v2892_v20 = vadd.f32 %v4103_v34, %v2668_v29  ;;  %v2671_v61 = vadd.f32 %v3692_v19, %v5385_v5  ;;  %v2662_v54 = vpop.f32.mrb[75].mxu0 }
 0x549   : > { %v2890_v47 = vadd.f32 %v4104_v4, %v2660_v25  ;;  %v2663_v41 = vadd.f32 %v5385_v5, %v2662_v54 }
 0x54a   : > { %2956 = vst [vmem:[%s5397_s23 + $0x50] sm:$0xff] %v2892_v20  ;;  %v2893_v17 = vadd.f32 %v4105_v44, %v2671_v61  ;;  %v4119_v20 = vld [vmem:[%s4401_s16 + $0xd0] sm:$0xff] }
 0x54b   : > { %2954 = vst [vmem:[%s5397_s23 + $0x40] sm:$0xff] %v2890_v47  ;;  %v2891_v3 = vadd.f32 %v4106_v35, %v2663_v41  ;;  %v4120_v47 = vld [vmem:[%s4401_s16 + $0xc0] sm:$0xff] }
 0x54c   : > { %2957 = vst [vmem:[%s5397_s23 + $0x58] sm:$0xff] %v2893_v17  ;;  %v4121_v17 = vld [vmem:[%s4401_s16 + $0xd8] sm:$0xff] }
 0x54d   : > { %2955 = vst [vmem:[%s5397_s23 + $0x48] sm:$0xff] %v2891_v3  ;;  %v4122_v3 = vld [vmem:[%s4401_s16 + $0xc8] sm:$0xff] }
 0x551   : > { %v3695_v60 = vpop.f32.mrb[76].mxu0 }
 0x552   : > { %v2684_v51 = vadd.f32 %v3695_v60, %v5385_v5  ;;  %v2675_v22 = vpop.f32.mrb[77].mxu0 }
 0x553   : > { %v2676_v30 = vadd.f32 %v5385_v5, %v2675_v22  ;;  %v3696_v40 = vpop.f32.mrb[78].mxu0 }
 0x554   : > { %v2896_v32 = vadd.f32 %v4107_v57, %v2684_v51  ;;  %v2687_v24 = vadd.f32 %v3696_v40, %v5385_v5  ;;  %v2678_v14 = vpop.f32.mrb[79].mxu0 }
 0x555   : > { %v2894_v49 = vadd.f32 %v4108_v42, %v2676_v30  ;;  %v2679_v55 = vadd.f32 %v5385_v5, %v2678_v14 }
 0x556   : > { %2960 = vst [vmem:[%s5397_s23 + $0x70] sm:$0xff] %v2896_v32  ;;  %v2897_v18 = vadd.f32 %v4109_v36, %v2687_v24  ;;  %v4123_v32 = vld [vmem:[%s4401_s16 + $0xf0] sm:$0xff] }
 0x557   : > { %2958 = vst [vmem:[%s5397_s23 + $0x60] sm:$0xff] %v2894_v49  ;;  %v2895_v21 = vadd.f32 %v4110_v50, %v2679_v55  ;;  %v4124_v49 = vld [vmem:[%s4401_s16 + $0xe0] sm:$0xff] }
 0x558   : > { %2961 = vst [vmem:[%s5397_s23 + $0x78] sm:$0xff] %v2897_v18  ;;  %v4125_v18 = vld [vmem:[%s4401_s16 + $0xf8] sm:$0xff] }
 0x559   : > { %2959 = vst [vmem:[%s5397_s23 + $0x68] sm:$0xff] %v2895_v21  ;;  %v4126_v21 = vld [vmem:[%s4401_s16 + $0xe8] sm:$0xff] }
 0x56e   : > { %v3699_v8 = vpop.f32.mrb[80].mxu0 }
 0x56f   : > { %v2700_v9 = vadd.f32 %v3699_v8, %v5385_v5  ;;  %v2691_v62 = vpop.f32.mrb[81].mxu0 }
 0x570   : > { %v2692_v12 = vadd.f32 %v5385_v5, %v2691_v62  ;;  %v3700_v46 = vpop.f32.mrb[82].mxu0 }
 0x571   : > { %v2900_v45 = vadd.f32 %v4111_v38, %v2700_v9  ;;  %v2703_v37 = vadd.f32 %v3700_v46, %v5385_v5  ;;  %v2694_v1 = vpop.f32.mrb[83].mxu0 }
 0x572   : > { %v2898_v31 = vadd.f32 %v4112_v11, %v2692_v12  ;;  %v2695_v53 = vadd.f32 %v5385_v5, %v2694_v1 }
 0x573   : > { %2964 = vst [vmem:[%s5397_s23 + $0x90] sm:$0xff] %v2900_v45  ;;  %v2901_v10 = vadd.f32 %v4113_v28, %v2703_v37  ;;  %v4127_v45 = vld [vmem:[%s4401_s16 + $0x110] sm:$0xff] }
 0x574   : > { %2962 = vst [vmem:[%s5397_s23 + $0x80] sm:$0xff] %v2898_v31  ;;  %v2899_v23 = vadd.f32 %v4114_v0, %v2695_v53  ;;  %v4128_v31 = vld [vmem:[%s4401_s16 + $0x100] sm:$0xff] }
 0x575   : > { %2965 = vst [vmem:[%s5397_s23 + $0x98] sm:$0xff] %v2901_v10  ;;  %v4129_v10 = vld [vmem:[%s4401_s16 + $0x118] sm:$0xff] }
 0x576   : > { %2963 = vst [vmem:[%s5397_s23 + $0x88] sm:$0xff] %v2899_v23  ;;  %v4130_v23 = vld [vmem:[%s4401_s16 + $0x108] sm:$0xff] }
 0x579   : > { %v3703_v58 = vpop.f32.mrb[84].mxu0 }
 0x57a   : > { %v2716_v26 = vadd.f32 %v3703_v58, %v5385_v5  ;;  %v2707_v39 = vpop.f32.mrb[85].mxu0 }
 0x57b   : > { %v2708_v27 = vadd.f32 %v5385_v5, %v2707_v39  ;;  %v3704_v52 = vpop.f32.mrb[86].mxu0 }
 0x57c   : > { %v2904_v59 = vadd.f32 %v4115_v48, %v2716_v26  ;;  %v2719_v6 = vadd.f32 %v3704_v52, %v5385_v5  ;;  %v2710_v16 = vpop.f32.mrb[87].mxu0 }
 0x57d   : > { %v2902_v56 = vadd.f32 %v4116_v43, %v2708_v27  ;;  %v2711_v13 = vadd.f32 %v5385_v5, %v2710_v16 }
 0x57e   : > { %2968 = vst [vmem:[%s5397_s23 + $0xb0] sm:$0xff] %v2904_v59  ;;  %v2905_v33 = vadd.f32 %v4117_v63, %v2719_v6  ;;  %v4131_v59 = vld [vmem:[%s4401_s16 + $0x130] sm:$0xff] }
 0x57f   : > { %2966 = vst [vmem:[%s5397_s23 + $0xa0] sm:$0xff] %v2902_v56  ;;  %v2903_v7 = vadd.f32 %v4118_v2, %v2711_v13  ;;  %v4132_v56 = vld [vmem:[%s4401_s16 + $0x120] sm:$0xff] }
 0x580   : > { %2969 = vst [vmem:[%s5397_s23 + $0xb8] sm:$0xff] %v2905_v33  ;;  %v4133_v33 = vld [vmem:[%s4401_s16 + $0x138] sm:$0xff] }
 0x581   : > { %2967 = vst [vmem:[%s5397_s23 + $0xa8] sm:$0xff] %v2903_v7  ;;  %v3707_v29 = vpop.f32.mrb[88].mxu0  ;;  %v4134_v7 = vld [vmem:[%s4401_s16 + $0x128] sm:$0xff] }
 0x582   : > { %v2732_v15 = vadd.f32 %v3707_v29, %v5385_v5  ;;  %v2723_v25 = vpop.f32.mrb[89].mxu0 }
 0x583   : > { %v2724_v19 = vadd.f32 %v5385_v5, %v2723_v25  ;;  %v3708_v34 = vpop.f32.mrb[90].mxu0 }
 0x584   : > { %v2908_v61 = vadd.f32 %v4119_v20, %v2732_v15  ;;  %v2735_v54 = vadd.f32 %v3708_v34, %v5385_v5  ;;  %v2726_v4 = vpop.f32.mrb[91].mxu0 }
 0x585   : > { %v2906_v41 = vadd.f32 %v4120_v47, %v2724_v19  ;;  %v2727_v44 = vadd.f32 %v5385_v5, %v2726_v4 }
 0x586   : > { %2972 = vst [vmem:[%s5397_s23 + $0xd0] sm:$0xff] %v2908_v61  ;;  %v2909_v35 = vadd.f32 %v4121_v17, %v2735_v54  ;;  %v4135_v61 = vld [vmem:[%s4401_s16 + $0x150] sm:$0xff] }
 0x587   : > { %2970 = vst [vmem:[%s5397_s23 + $0xc0] sm:$0xff] %v2906_v41  ;;  %v2907_v60 = vadd.f32 %v4122_v3, %v2727_v44  ;;  %v4136_v41 = vld [vmem:[%s4401_s16 + $0x140] sm:$0xff] }
 0x588   : > { %2973 = vst [vmem:[%s5397_s23 + $0xd8] sm:$0xff] %v2909_v35  ;;  %v4137_v35 = vld [vmem:[%s4401_s16 + $0x158] sm:$0xff] }
 0x589   : > { %2971 = vst [vmem:[%s5397_s23 + $0xc8] sm:$0xff] %v2907_v60  ;;  %v3711_v51 = vpop.f32.mrb[92].mxu0  ;;  %v4138_v60 = vld [vmem:[%s4401_s16 + $0x148] sm:$0xff] }
 0x58a   : > { %v2748_v22 = vadd.f32 %v3711_v51, %v5385_v5  ;;  %v2739_v30 = vpop.f32.mrb[93].mxu0 }
 0x58b   : > { %v2740_v40 = vadd.f32 %v5385_v5, %v2739_v30  ;;  %v3712_v57 = vpop.f32.mrb[94].mxu0 }
 0x58c   : > { %v2912_v24 = vadd.f32 %v4123_v32, %v2748_v22  ;;  %v2751_v14 = vadd.f32 %v3712_v57, %v5385_v5  ;;  %v2742_v42 = vpop.f32.mrb[95].mxu0 }
 0x58d   : > { %v2910_v55 = vadd.f32 %v4124_v49, %v2740_v40  ;;  %v2743_v36 = vadd.f32 %v5385_v5, %v2742_v42 }
 0x58e   : > { %2976 = vst [vmem:[%s5397_s23 + $0xf0] sm:$0xff] %v2912_v24  ;;  %v2913_v50 = vadd.f32 %v4125_v18, %v2751_v14  ;;  %v4139_v24 = vld [vmem:[%s4401_s16 + $0x170] sm:$0xff] }
 0x58f   : > { %2974 = vst [vmem:[%s5397_s23 + $0xe0] sm:$0xff] %v2910_v55  ;;  %v2911_v8 = vadd.f32 %v4126_v21, %v2743_v36  ;;  %v4140_v55 = vld [vmem:[%s4401_s16 + $0x160] sm:$0xff] }
 0x590   : > { %2977 = vst [vmem:[%s5397_s23 + $0xf8] sm:$0xff] %v2913_v50  ;;  %v4141_v50 = vld [vmem:[%s4401_s16 + $0x178] sm:$0xff] }
 0x591   : > { %2975 = vst [vmem:[%s5397_s23 + $0xe8] sm:$0xff] %v2911_v8  ;;  %v3715_v9 = vpop.f32.mrb[96].mxu0  ;;  %v4142_v8 = vld [vmem:[%s4401_s16 + $0x168] sm:$0xff] }
 0x592   : > { %v2764_v62 = vadd.f32 %v3715_v9, %v5385_v5  ;;  %v2755_v12 = vpop.f32.mrb[97].mxu0 }
 0x593   : > { %v2756_v46 = vadd.f32 %v5385_v5, %v2755_v12  ;;  %v3716_v38 = vpop.f32.mrb[98].mxu0 }
 0x594   : > { %v2916_v37 = vadd.f32 %v4127_v45, %v2764_v62  ;;  %v2767_v1 = vadd.f32 %v3716_v38, %v5385_v5  ;;  %v2758_v11 = vpop.f32.mrb[99].mxu0 }
 0x595   : > { %v2914_v53 = vadd.f32 %v4128_v31, %v2756_v46  ;;  %v2759_v28 = vadd.f32 %v5385_v5, %v2758_v11 }
 0x596   : > { %2980 = vst [vmem:[%s5397_s23 + $0x110] sm:$0xff] %v2916_v37  ;;  %v2917_v0 = vadd.f32 %v4129_v10, %v2767_v1  ;;  %v4143_v37 = vld [vmem:[%s4401_s16 + $0x190] sm:$0xff] }
 0x597   : > { %2978 = vst [vmem:[%s5397_s23 + $0x100] sm:$0xff] %v2914_v53  ;;  %v2915_v58 = vadd.f32 %v4130_v23, %v2759_v28  ;;  %v4144_v53 = vld [vmem:[%s4401_s16 + $0x180] sm:$0xff] }
 0x598   : > { %2981 = vst [vmem:[%s5397_s23 + $0x118] sm:$0xff] %v2917_v0  ;;  %v4145_v0 = vld [vmem:[%s4401_s16 + $0x198] sm:$0xff] }
 0x599   : > { %2979 = vst [vmem:[%s5397_s23 + $0x108] sm:$0xff] %v2915_v58  ;;  %v3719_v26 = vpop.f32.mrb[100].mxu0  ;;  %v4146_v58 = vld [vmem:[%s4401_s16 + $0x188] sm:$0xff] }
 0x59a   : > { %v2780_v39 = vadd.f32 %v3719_v26, %v5385_v5  ;;  %v2771_v27 = vpop.f32.mrb[101].mxu0 }
 0x59b   : > { %v2772_v52 = vadd.f32 %v5385_v5, %v2771_v27  ;;  %v3720_v48 = vpop.f32.mrb[102].mxu0 }
 0x59c   : > { %v2920_v6 = vadd.f32 %v4131_v59, %v2780_v39  ;;  %v2783_v16 = vadd.f32 %v3720_v48, %v5385_v5  ;;  %v2774_v43 = vpop.f32.mrb[103].mxu0 }
 0x59d   : > { %v2918_v13 = vadd.f32 %v4132_v56, %v2772_v52  ;;  %v2775_v63 = vadd.f32 %v5385_v5, %v2774_v43 }
 0x59e   : > { %2984 = vst [vmem:[%s5397_s23 + $0x130] sm:$0xff] %v2920_v6  ;;  %v2921_v2 = vadd.f32 %v4133_v33, %v2783_v16  ;;  %v4147_v6 = vld [vmem:[%s4401_s16 + $0x1b0] sm:$0xff] }
 0x59f   : > { %2982 = vst [vmem:[%s5397_s23 + $0x120] sm:$0xff] %v2918_v13  ;;  %v2919_v29 = vadd.f32 %v4134_v7, %v2775_v63  ;;  %v4148_v13 = vld [vmem:[%s4401_s16 + $0x1a0] sm:$0xff] }
 0x5a0   : > { %2985 = vst [vmem:[%s5397_s23 + $0x138] sm:$0xff] %v2921_v2  ;;  %v4149_v2 = vld [vmem:[%s4401_s16 + $0x1b8] sm:$0xff] }
 0x5a1   : > { %2983 = vst [vmem:[%s5397_s23 + $0x128] sm:$0xff] %v2919_v29  ;;  %v3723_v15 = vpop.f32.mrb[104].mxu0  ;;  %v4150_v29 = vld [vmem:[%s4401_s16 + $0x1a8] sm:$0xff] }
 0x5a2   : > { %v2796_v25 = vadd.f32 %v3723_v15, %v5385_v5  ;;  %v2787_v19 = vpop.f32.mrb[105].mxu0 }
 0x5a3   : > { %v2788_v34 = vadd.f32 %v5385_v5, %v2787_v19  ;;  %v3724_v20 = vpop.f32.mrb[106].mxu0 }
 0x5a4   : > { %v2924_v54 = vadd.f32 %v4135_v61, %v2796_v25  ;;  %v2799_v4 = vadd.f32 %v3724_v20, %v5385_v5  ;;  %v2790_v47 = vpop.f32.mrb[107].mxu0 }
 0x5a5   : > { %v2922_v44 = vadd.f32 %v4136_v41, %v2788_v34  ;;  %v2791_v17 = vadd.f32 %v5385_v5, %v2790_v47 }
 0x5a6   : > { %2988 = vst [vmem:[%s5397_s23 + $0x150] sm:$0xff] %v2924_v54  ;;  %v2925_v3 = vadd.f32 %v4137_v35, %v2799_v4  ;;  %v4151_v54 = vld [vmem:[%s4401_s16 + $0x1d0] sm:$0xff] }
 0x5a7   : > { %2986 = vst [vmem:[%s5397_s23 + $0x140] sm:$0xff] %v2922_v44  ;;  %v2923_v51 = vadd.f32 %v4138_v60, %v2791_v17  ;;  %v4152_v44 = vld [vmem:[%s4401_s16 + $0x1c0] sm:$0xff] }
 0x5a8   : > { %2989 = vst [vmem:[%s5397_s23 + $0x158] sm:$0xff] %v2925_v3  ;;  %v4153_v3 = vld [vmem:[%s4401_s16 + $0x1d8] sm:$0xff] }
 0x5a9   : > { %2987 = vst [vmem:[%s5397_s23 + $0x148] sm:$0xff] %v2923_v51  ;;  %v3727_v22 = vpop.f32.mrb[108].mxu0  ;;  %v4154_v51 = vld [vmem:[%s4401_s16 + $0x1c8] sm:$0xff] }
 0x5aa   : > { %v2812_v30 = vadd.f32 %v3727_v22, %v5385_v5  ;;  %v2803_v40 = vpop.f32.mrb[109].mxu0 }
 0x5ab   : > { %v2804_v57 = vadd.f32 %v5385_v5, %v2803_v40  ;;  %v3728_v32 = vpop.f32.mrb[110].mxu0 }
 0x5ac   : > { %v2928_v14 = vadd.f32 %v4139_v24, %v2812_v30  ;;  %v2815_v42 = vadd.f32 %v3728_v32, %v5385_v5  ;;  %v2806_v49 = vpop.f32.mrb[111].mxu0 }
 0x5ad   : > { %v2926_v36 = vadd.f32 %v4140_v55, %v2804_v57  ;;  %v2807_v18 = vadd.f32 %v5385_v5, %v2806_v49 }
 0x5ae   : > { %2992 = vst [vmem:[%s5397_s23 + $0x170] sm:$0xff] %v2928_v14  ;;  %v2929_v21 = vadd.f32 %v4141_v50, %v2815_v42  ;;  %v4155_v14 = vld [vmem:[%s4401_s16 + $0x1f0] sm:$0xff] }
 0x5af   : > { %2990 = vst [vmem:[%s5397_s23 + $0x160] sm:$0xff] %v2926_v36  ;;  %v2927_v9 = vadd.f32 %v4142_v8, %v2807_v18  ;;  %v4156_v36 = vld [vmem:[%s4401_s16 + $0x1e0] sm:$0xff] }
 0x5b0   : > { %2993 = vst [vmem:[%s5397_s23 + $0x178] sm:$0xff] %v2929_v21  ;;  %v4157_v21 = vld [vmem:[%s4401_s16 + $0x1f8] sm:$0xff] }
 0x5b1   : > { %2991 = vst [vmem:[%s5397_s23 + $0x168] sm:$0xff] %v2927_v9  ;;  %v3731_v62 = vpop.f32.mrb[112].mxu0  ;;  %v4158_v9 = vld [vmem:[%s4401_s16 + $0x1e8] sm:$0xff] }
 0x5b2   : > { %v2828_v12 = vadd.f32 %v3731_v62, %v5385_v5  ;;  %v2819_v46 = vpop.f32.mrb[113].mxu0 }
 0x5b3   : > { %v2820_v38 = vadd.f32 %v5385_v5, %v2819_v46  ;;  %v3732_v45 = vpop.f32.mrb[114].mxu0 }
 0x5b4   : > { %v2932_v1 = vadd.f32 %v4143_v37, %v2828_v12  ;;  %v2831_v11 = vadd.f32 %v3732_v45, %v5385_v5  ;;  %v2822_v31 = vpop.f32.mrb[115].mxu0 }
 0x5b5   : > { %v2930_v28 = vadd.f32 %v4144_v53, %v2820_v38  ;;  %v2823_v10 = vadd.f32 %v5385_v5, %v2822_v31 }
 0x5b6   : > { %2996 = vst [vmem:[%s5397_s23 + $0x190] sm:$0xff] %v2932_v1  ;;  %v2933_v23 = vadd.f32 %v4145_v0, %v2831_v11 }
 0x5b7   : > { %2994 = vst [vmem:[%s5397_s23 + $0x180] sm:$0xff] %v2930_v28  ;;  %v2931_v26 = vadd.f32 %v4146_v58, %v2823_v10 }
 0x5b8   : > { %2997 = vst [vmem:[%s5397_s23 + $0x198] sm:$0xff] %v2933_v23 }
 0x5b9   : > { %2995 = vst [vmem:[%s5397_s23 + $0x188] sm:$0xff] %v2931_v26 }
 0x5c5   : > { %v3735_v39 = vpop.f32.mrb[116].mxu0 }
 0x5c6   : > { %v2844_v27 = vadd.f32 %v3735_v39, %v5385_v5  ;;  %v2835_v52 = vpop.f32.mrb[117].mxu0 }
 0x5c7   : > { %v2836_v48 = vadd.f32 %v5385_v5, %v2835_v52  ;;  %v3736_v59 = vpop.f32.mrb[118].mxu0 }
 0x5c8   : > { %v2936_v16 = vadd.f32 %v4147_v6, %v2844_v27  ;;  %v2847_v43 = vadd.f32 %v3736_v59, %v5385_v5  ;;  %v2838_v56 = vpop.f32.mrb[119].mxu0 }
 0x5c9   : > { %v2934_v63 = vadd.f32 %v4148_v13, %v2836_v48  ;;  %v2839_v33 = vadd.f32 %v5385_v5, %v2838_v56 }
 0x5ca   : > { %3000 = vst [vmem:[%s5397_s23 + $0x1b0] sm:$0xff] %v2936_v16  ;;  %v2937_v7 = vadd.f32 %v4149_v2, %v2847_v43 }
 0x5cb   : > { %2998 = vst [vmem:[%s5397_s23 + $0x1a0] sm:$0xff] %v2934_v63  ;;  %v2935_v15 = vadd.f32 %v4150_v29, %v2839_v33 }
 0x5cc   : > { %3001 = vst [vmem:[%s5397_s23 + $0x1b8] sm:$0xff] %v2937_v7 }
 0x5cd   : > { %2999 = vst [vmem:[%s5397_s23 + $0x1a8] sm:$0xff] %v2935_v15 }
 0x60a   : > { %v3739_v25 = vpop.f32.mrb[120].mxu0 }
 0x60b   : > { %v2860_v19 = vadd.f32 %v3739_v25, %v5385_v5  ;;  %v2851_v34 = vpop.f32.mrb[121].mxu0 }
 0x60c   : > { %v2852_v20 = vadd.f32 %v5385_v5, %v2851_v34  ;;  %v3740_v61 = vpop.f32.mrb[122].mxu0 }
 0x60d   : > { %v2940_v4 = vadd.f32 %v4151_v54, %v2860_v19  ;;  %v2863_v47 = vadd.f32 %v3740_v61, %v5385_v5  ;;  %v2854_v41 = vpop.f32.mrb[123].mxu0 }
 0x60e   : > { %v2938_v17 = vadd.f32 %v4152_v44, %v2852_v20  ;;  %v2855_v35 = vadd.f32 %v5385_v5, %v2854_v41 }
 0x60f   : > { %3004 = vst [vmem:[%s5397_s23 + $0x1d0] sm:$0xff] %v2940_v4  ;;  %v2941_v60 = vadd.f32 %v4153_v3, %v2863_v47 }
 0x610   : > { %3002 = vst [vmem:[%s5397_s23 + $0x1c0] sm:$0xff] %v2938_v17  ;;  %v2939_v22 = vadd.f32 %v4154_v51, %v2855_v35 }
 0x611   : > { %3005 = vst [vmem:[%s5397_s23 + $0x1d8] sm:$0xff] %v2941_v60 }
 0x612   : > { %3003 = vst [vmem:[%s5397_s23 + $0x1c8] sm:$0xff] %v2939_v22  ;;  %v3743_v30 = vpop.f32.mrb[124].mxu0 }
 0x613   : > { %v2876_v40 = vadd.f32 %v3743_v30, %v5385_v5  ;;  %v2867_v57 = vpop.f32.mrb[125].mxu0 }
 0x614   : > { %v2868_v32 = vadd.f32 %v5385_v5, %v2867_v57  ;;  %v3744_v24 = vpop.f32.mrb[126].mxu0 }
 0x615   : > { %v2944_v42 = vadd.f32 %v4155_v14, %v2876_v40  ;;  %v2879_v49 = vadd.f32 %v3744_v24, %v5385_v5  ;;  %v2870_v55 = vpop.f32.mrb[127].mxu0 }
 0x616   : > { %v2942_v18 = vadd.f32 %v4156_v36, %v2868_v32  ;;  %v2871_v50 = vadd.f32 %v5385_v5, %v2870_v55 }
 0x617   : > { %3008 = vst [vmem:[%s5397_s23 + $0x1f0] sm:$0xff] %v2944_v42  ;;  %v2945_v8 = vadd.f32 %v4157_v21, %v2879_v49 }
 0x618   : > { %3006 = vst [vmem:[%s5397_s23 + $0x1e0] sm:$0xff] %v2942_v18  ;;  %v2943_v62 = vadd.f32 %v4158_v9, %v2871_v50 }
 0x619   : > { %3009 = vst [vmem:[%s5397_s23 + $0x1f8] sm:$0xff] %v2945_v8 }
 0x61a   : > { %3007 = vst [vmem:[%s5397_s23 + $0x1e8] sm:$0xff] %v2943_v62 }
 0x61b   : > { %4172 = shalt.err (!%p4169_p5)
}
 0x61c   : > { %s4173_s16 = scalar_lea.hbm %s5588_s27, 8192  ;;  %s4177_s23 = scalar_lea.hbm %s5651_s7, 16384 }
 0x61d   : > { %p4174_p6 = scmp.ne.s32.totalorder %s5588_s27, %s4173_s16  ;;  %p4178_p10 = scmp.lt.u32.totalorder %s5588_s27, %s5651_s7 }
 0x61e   : > { %p4179_p11 = scmp.lt.u32.totalorder %s4177_s23, %s4173_s16  ;;  %p4181_p13 = scmp.lt.u32.totalorder %s4173_s16, %s5588_s27 }
 0x61f   : > { %p4175_p7 = pnand %p4174_p6, %p4323_p4 }
 0x620   : > { %p4180_p12 = por %p4179_p11, %p4178_p10 }
 0x621   : > { %p4176_p9 = pneg %p4175_p7 }
 0x622   : > { %p4182_p0 = por %p4181_p13, %p4180_p12 }
 0x624   : > { %p4183_p1 = pnand %p4182_p0, %p4176_p9 }
 0x626   : > { %4186 = shalt.err (!%p4183_p1)
}
 0x627   : > { %s4241_s15 = smov 128   ;;  %s4242_s17 = smov 8  }
 0x628   : > { %3753 = dma.vmem_to_hbm [thread:$0]  (%p4323_p4), %s5590_s10, 8192, %s5588_s27, %s5598_s19, %s4241_s15, %s4241_s15, %s4242_s17  }
 0x629 PF: > { %p3759_p2 = scmp.ge.s32.totalorder %s4237_s29, 2  ;;  %s3041_s18 = sand.u32 1, %s4217_s24  }
 0x62a   : > { %s3042_s8 = scalar_lea.sflag [#allocation5], %s3041_s18 }
 0x62b   : > { %p3756_p3 = pnand %p3759_p2, %p4330_p8 }
 0x62d   : > { %4212 = dma.done.wait (!%p3756_p3), %s3042_s8, 8192  }
 0x62e   : > { %4214 = vsyncadd (!%p3756_p3), %s3042_s8, 4294959104  ;;  %s20_s29 = sadd.s32 1, %s4237_s29   ;;  %s5762_s24 = smov %s4221_s25 }
 0x62f   : > { %p17_p5 = scmp.ge.s32.totalorder %s20_s29, 4   ;;  %s5763_s25 = smov %s4225_s26 }
 0x630   : > { %s5764_s26 = smov %s4336_s14  ;;  %s5765_s27 = smov %s4233_s28 }
 0x631   : > { %s5766_s28 = smov %s5768_s9  ;;  %19 = sbr.rel (!%p17_p5) target bundleno = 4 (0x4), region = 90 }
 0x638   :  { %3047 = vsyncpa [#allocation5], 1 }
 0x639   :  { %3049 = vsyncpa [#allocation5 + $0x1], 1 }

</bundles_post_ra>
